<compile_context>
chip_gen: v7x
topology: tpu7x:2x2x1
jax: 0.10.0
libtpu: 0.0.40
codegen_flags: <defaults>
</compile_context>

<pallas_src>
import math

import jax
import jax.numpy as jnp
from jax.experimental import pallas as pl
from jax.experimental.pallas import tpu as pltpu

# ----------------------- synthetic "bert-base" config (small) -----------------------
VOCAB = 100
HIDDEN = 32
LAYERS = 2
HEADS = 4
HEAD_DIM = HIDDEN // HEADS
INTERMEDIATE = 64
MAX_POS = 16
LABELS = 4          # dataset_config.labels_num ("logits: [batch, 4]")
LN_EPS = 1e-12


# --------------------------------- in-kernel helpers ---------------------------------
def _layernorm(x, g, b):
    mean = jnp.mean(x, axis=-1, keepdims=True)
    var = jnp.mean(jnp.square(x - mean), axis=-1, keepdims=True)
    return (x - mean) * jax.lax.rsqrt(var + LN_EPS) * g + b


def _gelu(y):
    # TODO(synk): tanh-approx GELU used instead of exact erf GELU (no erf lowering).
    c = math.sqrt(2.0 / math.pi)
    return 0.5 * y * (1.0 + jnp.tanh(c * (y + 0.044715 * y * y * y)))


# ----------------------------------- fused kernel ------------------------------------
def _bert_forward_kernel(
        x_ref, mask_ref,
        emb_g_ref, emb_b_ref,
        q_w_ref, q_b_ref, k_w_ref, k_b_ref, v_w_ref, v_b_ref,
        o_w_ref, o_b_ref, ln1_g_ref, ln1_b_ref,
        i_w_ref, i_b_ref, f_w_ref, f_b_ref,
        ln2_g_ref, ln2_b_ref,
        pool_w_ref, pool_b_ref, fc_w_ref, fc_b_ref,
        logits_ref):
    scale = 1.0 / math.sqrt(HEAD_DIM)

    def mm(x, w, b):
        # bf16 x bf16 -> f32 on the MXU; bias add in f32.
        return jnp.dot(x.astype(jnp.bfloat16), w,
                       preferred_element_type=jnp.float32) + b

    # ---- embedding LayerNorm; this batch element's activations [S, H] stay in VMEM ----
    x = _layernorm(x_ref[...], emb_g_ref[...], emb_b_ref[...])               # [S, H]

    # ---- additive padding mask for this batch element: [1, S] broadcast over rows ----
    add_mask = jnp.where(mask_ref[...] > 0.5, 0.0, -10000.0).astype(jnp.float32)

    # ---- encoder layers (Python-unrolled; all weights tiny & VMEM resident) ----
    for l in range(LAYERS):
        attn_out = None
        for h in range(HEADS):
            q_h = mm(x, q_w_ref[l, h], q_b_ref[l, h])                         # [S, Dh]
            k_h = mm(x, k_w_ref[l, h], k_b_ref[l, h])                         # [S, Dh]
            v_h = mm(x, v_w_ref[l, h], v_b_ref[l, h])                         # [S, Dh]
            s = jnp.einsum("qd,kd->qk", q_h, k_h,
                           preferred_element_type=jnp.float32) * scale        # [S, S]
            s = s + add_mask
            s = s - jnp.max(s, axis=-1, keepdims=True)
            p = jnp.exp(s)
            p = p / jnp.sum(p, axis=-1, keepdims=True)
            ctx_h = jnp.dot(p, v_h, preferred_element_type=jnp.float32)       # [S, Dh]
            contrib = jnp.dot(ctx_h.astype(jnp.bfloat16), o_w_ref[l, h],
                              preferred_element_type=jnp.float32)             # [S, H]
            attn_out = contrib if attn_out is None else attn_out + contrib
        # attention output bias + residual + LayerNorm (fused)
        x = _layernorm(x + attn_out + o_b_ref[l], ln1_g_ref[l], ln1_b_ref[l])
        # FFN: intermediate GELU + output projection + residual + LayerNorm (fused)
        inter = _gelu(mm(x, i_w_ref[l], i_b_ref[l]))
        x = _layernorm(x + mm(inter, f_w_ref[l], f_b_ref[l]),
                       ln2_g_ref[l], ln2_b_ref[l])

    # ---- [CLS] = row 0 of this batch block -> pooler (dense+tanh) -> classifier ----
    cls = x[0:1, :]                                                           # [1, H]
    pooled = jnp.tanh(mm(cls, pool_w_ref[...], pool_b_ref[...]))              # [1, H]
    # fc = nn.Sequential(Dropout(0.5), Linear); dropout is identity at inference.
    logits_ref[...] = mm(pooled, fc_w_ref[...], fc_b_ref[...])                # [1, LABELS]


# ------------------------------------- parameters ------------------------------------
def init_params(key):
    keys = iter(jax.random.split(key, 256))

    def nrm(shape, std=0.02):
        return (std * jax.random.normal(next(keys), shape)).astype(jnp.float32)

    def zeros(shape):
        return jnp.zeros(shape, jnp.float32)

    def ones(shape):
        return jnp.ones(shape, jnp.float32)

    layers = []
    for _ in range(LAYERS):
        layers.append(dict(
            q_w=nrm((HIDDEN, HIDDEN)), q_b=zeros((HIDDEN,)),
            k_w=nrm((HIDDEN, HIDDEN)), k_b=zeros((HIDDEN,)),
            v_w=nrm((HIDDEN, HIDDEN)), v_b=zeros((HIDDEN,)),
            o_w=nrm((HIDDEN, HIDDEN)), o_b=zeros((HIDDEN,)),
            ln1_g=ones((HIDDEN,)), ln1_b=zeros((HIDDEN,)),
            i_w=nrm((HIDDEN, INTERMEDIATE)), i_b=zeros((INTERMEDIATE,)),
            f_w=nrm((INTERMEDIATE, HIDDEN)), f_b=zeros((HIDDEN,)),
            ln2_g=ones((HIDDEN,)), ln2_b=zeros((HIDDEN,)),
        ))

    return dict(
        word_emb=nrm((VOCAB, HIDDEN)),
        pos_emb=nrm((MAX_POS, HIDDEN)),
        type_emb=nrm((2, HIDDEN)),
        emb_ln_g=ones((HIDDEN,)), emb_ln_b=zeros((HIDDEN,)),
        layers=layers,
        pool_w=nrm((HIDDEN, HIDDEN)), pool_b=zeros((HIDDEN,)),
        # nn.Sequential(Dropout(0.5), Linear(hidden, labels)) with init.normal_(std=0.01)
        fc_w=nrm((HIDDEN, LABELS), std=0.01), fc_b=nrm((LABELS,), std=0.01),
    )


def pack_params(p):
    """Per-head weight packing (no in-kernel lane slicing) + bf16 cast of MXU weights."""
    L = p["layers"]

    def stack_in_proj(wname):      # [H, H] per layer -> [L, HEADS, H, Dh] bf16
        return jnp.stack(
            [l[wname].reshape(HIDDEN, HEADS, HEAD_DIM).transpose(1, 0, 2) for l in L]
        ).astype(jnp.bfloat16)

    def stack_in_bias(bname):      # [H] per layer -> [L, HEADS, 1, Dh] f32
        return jnp.stack([l[bname].reshape(HEADS, 1, HEAD_DIM) for l in L])

    def stack_w(wname):            # [L, *w.shape] bf16
        return jnp.stack([l[wname] for l in L]).astype(jnp.bfloat16)

    def stack_b(bname):            # [L, 1, N] f32
        return jnp.stack([l[bname] for l in L])[:, None, :]

    o_w = jnp.stack(               # [H, H] per layer -> [L, HEADS, Dh, H] bf16
        [l["o_w"].reshape(HEADS, HEAD_DIM, HIDDEN) for l in L]).astype(jnp.bfloat16)

    return dict(
        word_emb=p["word_emb"], pos_emb=p["pos_emb"], type_emb=p["type_emb"],
        emb_g=p["emb_ln_g"][None, :], emb_b=p["emb_ln_b"][None, :],
        q_w=stack_in_proj("q_w"), q_b=stack_in_bias("q_b"),
        k_w=stack_in_proj("k_w"), k_b=stack_in_bias("k_b"),
        v_w=stack_in_proj("v_w"), v_b=stack_in_bias("v_b"),
        o_w=o_w, o_b=stack_b("o_b"),
        ln1_g=stack_b("ln1_g"), ln1_b=stack_b("ln1_b"),
        i_w=stack_w("i_w"), i_b=stack_b("i_b"),
        f_w=stack_w("f_w"), f_b=stack_b("f_b"),
        ln2_g=stack_b("ln2_g"), ln2_b=stack_b("ln2_b"),
        pool_w=p["pool_w"].astype(jnp.bfloat16), pool_b=p["pool_b"][None, :],
        fc_w=p["fc_w"].astype(jnp.bfloat16), fc_b=p["fc_b"][None, :],
    )


# -------------------------------------- forward --------------------------------------
@jax.jit
def forward(packed, inputs, inputs_mask):
    B, S = inputs.shape
    assert S <= MAX_POS

    # Embedding lookup + position + token-type (XLA glue); token_type_ids = 0.
    # TODO(synk): at BERT scale, fuse the gather into the kernel via scalar-prefetched
    # token ids instead of materializing x_emb in HBM.
    x_emb = (jnp.take(packed["word_emb"], inputs, axis=0)
             + packed["pos_emb"][None, :S, :]
             + packed["type_emb"][0][None, None, :])                           # [B, S, H]
    mask = inputs_mask.astype(jnp.float32).reshape(B, 1, S)

    vmem = pl.BlockSpec(memory_space=pltpu.MemorySpace.VMEM)
    logits = pl.pallas_call(
        _bert_forward_kernel,
        out_shape=jax.ShapeDtypeStruct((B, 1, LABELS), jnp.float32),
        grid=(B,),
        in_specs=[pl.BlockSpec((None, S, HIDDEN), lambda b: (b, 0, 0)),
                  pl.BlockSpec((None, 1, S), lambda b: (b, 0, 0))]
                 + [vmem] * 22,
        out_specs=pl.BlockSpec((None, 1, LABELS), lambda b: (b, 0, 0)),
        compiler_params=pltpu.CompilerParams(
            dimension_semantics=("parallel",),
            vmem_limit_bytes=32 * 1024 * 1024),
    )(x_emb, mask,
      packed["emb_g"], packed["emb_b"],
      packed["q_w"], packed["q_b"], packed["k_w"], packed["k_b"],
      packed["v_w"], packed["v_b"], packed["o_w"], packed["o_b"],
      packed["ln1_g"], packed["ln1_b"], packed["i_w"], packed["i_b"],
      packed["f_w"], packed["f_b"], packed["ln2_g"], packed["ln2_b"],
      packed["pool_w"], packed["pool_b"], packed["fc_w"], packed["fc_b"])
    return logits.reshape(B, LABELS)


# ---------------------------------------- main ----------------------------------------
if __name__ == "__main__":
    key = jax.random.PRNGKey(0)
    k_tok, k_par = jax.random.split(key)

    B, S = 2, 8
    inputs = jax.random.randint(k_tok, (B, S), 0, VOCAB, dtype=jnp.int32)
    inputs_mask = jnp.ones((B, S), dtype=jnp.float32).at[1, 6:].set(0.0)

    params = init_params(k_par)
    packed = pack_params(params)
    logits = forward(packed, inputs, inputs_mask)
    jax.block_until_ready(logits)
    assert logits.shape == (B, LABELS) and logits.dtype == jnp.float32
    assert bool(jnp.all(jnp.isfinite(logits)))
    print("KERNEL_OK")
</pallas_src>

<mosaic_0001>
module attributes {stable_mosaic.version = 11 : i64} {
  func.func @_bert_forward_kernel(%arg0: i32, %arg1: memref<1x8x32xf32, #tpu.memory_space<vmem>>, %arg2: memref<1x1x8xf32, #tpu.memory_space<vmem>>, %arg3: memref<1x32xf32, #tpu.memory_space<vmem>>, %arg4: memref<1x32xf32, #tpu.memory_space<vmem>>, %arg5: memref<2x4x32x8xbf16, #tpu.memory_space<vmem>>, %arg6: memref<2x4x1x8xf32, #tpu.memory_space<vmem>>, %arg7: memref<2x4x32x8xbf16, #tpu.memory_space<vmem>>, %arg8: memref<2x4x1x8xf32, #tpu.memory_space<vmem>>, %arg9: memref<2x4x32x8xbf16, #tpu.memory_space<vmem>>, %arg10: memref<2x4x1x8xf32, #tpu.memory_space<vmem>>, %arg11: memref<2x4x8x32xbf16, #tpu.memory_space<vmem>>, %arg12: memref<2x1x32xf32, #tpu.memory_space<vmem>>, %arg13: memref<2x1x32xf32, #tpu.memory_space<vmem>>, %arg14: memref<2x1x32xf32, #tpu.memory_space<vmem>>, %arg15: memref<2x32x64xbf16, #tpu.memory_space<vmem>>, %arg16: memref<2x1x64xf32, #tpu.memory_space<vmem>>, %arg17: memref<2x64x32xbf16, #tpu.memory_space<vmem>>, %arg18: memref<2x1x32xf32, #tpu.memory_space<vmem>>, %arg19: memref<2x1x32xf32, #tpu.memory_space<vmem>>, %arg20: memref<2x1x32xf32, #tpu.memory_space<vmem>>, %arg21: memref<32x32xbf16, #tpu.memory_space<vmem>>, %arg22: memref<1x32xf32, #tpu.memory_space<vmem>>, %arg23: memref<32x4xbf16, #tpu.memory_space<vmem>>, %arg24: memref<1x4xf32, #tpu.memory_space<vmem>>, %arg25: memref<1x1x4xf32, #tpu.memory_space<vmem>>) attributes {dimension_semantics = [#tpu.dimension_semantics<parallel>], iteration_bounds = array<i64: 2>, scalar_prefetch = 0 : i64, scratch_operands = 0 : i64, tpu.core_type = #tpu.core_type<tc>, window_params = [{transform_indices = @transform_0, window_bounds = array<i64: 1, 8, 32>}, {transform_indices = @transform_1, window_bounds = array<i64: 1, 1, 8>}, {pipeline_mode = #tpu.pipeline_mode<synchronous>, transform_indices = @transform_2, window_bounds = array<i64: 1, 32>}, {pipeline_mode = #tpu.pipeline_mode<synchronous>, transform_indices = @transform_3, window_bounds = array<i64: 1, 32>}, {pipeline_mode = #tpu.pipeline_mode<synchronous>, transform_indices = @transform_4, window_bounds = array<i64: 2, 4, 32, 8>}, {pipeline_mode = #tpu.pipeline_mode<synchronous>, transform_indices = @transform_5, window_bounds = array<i64: 2, 4, 1, 8>}, {pipeline_mode = #tpu.pipeline_mode<synchronous>, transform_indices = @transform_6, window_bounds = array<i64: 2, 4, 32, 8>}, {pipeline_mode = #tpu.pipeline_mode<synchronous>, transform_indices = @transform_7, window_bounds = array<i64: 2, 4, 1, 8>}, {pipeline_mode = #tpu.pipeline_mode<synchronous>, transform_indices = @transform_8, window_bounds = array<i64: 2, 4, 32, 8>}, {pipeline_mode = #tpu.pipeline_mode<synchronous>, transform_indices = @transform_9, window_bounds = array<i64: 2, 4, 1, 8>}, {pipeline_mode = #tpu.pipeline_mode<synchronous>, transform_indices = @transform_10, window_bounds = array<i64: 2, 4, 8, 32>}, {pipeline_mode = #tpu.pipeline_mode<synchronous>, transform_indices = @transform_11, window_bounds = array<i64: 2, 1, 32>}, {pipeline_mode = #tpu.pipeline_mode<synchronous>, transform_indices = @transform_12, window_bounds = array<i64: 2, 1, 32>}, {pipeline_mode = #tpu.pipeline_mode<synchronous>, transform_indices = @transform_13, window_bounds = array<i64: 2, 1, 32>}, {pipeline_mode = #tpu.pipeline_mode<synchronous>, transform_indices = @transform_14, window_bounds = array<i64: 2, 32, 64>}, {pipeline_mode = #tpu.pipeline_mode<synchronous>, transform_indices = @transform_15, window_bounds = array<i64: 2, 1, 64>}, {pipeline_mode = #tpu.pipeline_mode<synchronous>, transform_indices = @transform_16, window_bounds = array<i64: 2, 64, 32>}, {pipeline_mode = #tpu.pipeline_mode<synchronous>, transform_indices = @transform_17, window_bounds = array<i64: 2, 1, 32>}, {pipeline_mode = #tpu.pipeline_mode<synchronous>, transform_indices = @transform_18, window_bounds = array<i64: 2, 1, 32>}, {pipeline_mode = #tpu.pipeline_mode<synchronous>, transform_indices = @transform_19, window_bounds = array<i64: 2, 1, 32>}, {pipeline_mode = #tpu.pipeline_mode<synchronous>, transform_indices = @transform_20, window_bounds = array<i64: 32, 32>}, {pipeline_mode = #tpu.pipeline_mode<synchronous>, transform_indices = @transform_21, window_bounds = array<i64: 1, 32>}, {pipeline_mode = #tpu.pipeline_mode<synchronous>, transform_indices = @transform_22, window_bounds = array<i64: 32, 4>}, {pipeline_mode = #tpu.pipeline_mode<synchronous>, transform_indices = @transform_23, window_bounds = array<i64: 1, 4>}, {transform_indices = @transform_24, window_bounds = array<i64: 1, 1, 4>}]} {
    %c0 = arith.constant 0 : index
    %c0_0 = arith.constant 0 : index
    %c0_1 = arith.constant 0 : index
    %0 = vector.load %arg1[%c0, %c0_0, %c0_1] : memref<1x8x32xf32, #tpu.memory_space<vmem>>, vector<1x8x32xf32>
    %1 = vector.shape_cast %0 : vector<1x8x32xf32> to vector<8x32xf32>
    %c0_2 = arith.constant 0 : index
    %c0_3 = arith.constant 0 : index
    %2 = vector.load %arg3[%c0_2, %c0_3] : memref<1x32xf32, #tpu.memory_space<vmem>>, vector<1x32xf32>
    %c0_4 = arith.constant 0 : index
    %c0_5 = arith.constant 0 : index
    %3 = vector.load %arg4[%c0_4, %c0_5] : memref<1x32xf32, #tpu.memory_space<vmem>>, vector<1x32xf32>
    %cst = arith.constant dense<0.000000e+00> : vector<8xf32>
    %4 = vector.multi_reduction <add>, %1, %cst [1] : vector<8x32xf32> to vector<8xf32>
    %5 = vector.shape_cast %4 : vector<8xf32> to vector<8x1xf32>
    %cst_6 = arith.constant 3.200000e+01 : f32
    %6 = vector.broadcast %cst_6 : f32 to vector<8x1xf32>
    %7 = arith.divf %5, %6 : vector<8x1xf32>
    %8 = vector.broadcast %7 : vector<8x1xf32> to vector<8x32xf32>
    %9 = arith.subf %1, %8 : vector<8x32xf32>
    %10 = arith.mulf %9, %9 : vector<8x32xf32>
    %cst_7 = arith.constant dense<0.000000e+00> : vector<8xf32>
    %11 = vector.multi_reduction <add>, %10, %cst_7 [1] : vector<8x32xf32> to vector<8xf32>
    %12 = vector.shape_cast %11 : vector<8xf32> to vector<8x1xf32>
    %cst_8 = arith.constant 3.200000e+01 : f32
    %13 = vector.broadcast %cst_8 : f32 to vector<8x1xf32>
    %14 = arith.divf %12, %13 : vector<8x1xf32>
    %15 = vector.broadcast %7 : vector<8x1xf32> to vector<8x32xf32>
    %16 = arith.subf %1, %15 : vector<8x32xf32>
    %cst_9 = arith.constant 9.99999996E-13 : f32
    %17 = vector.broadcast %cst_9 : f32 to vector<8x1xf32>
    %18 = arith.addf %14, %17 : vector<8x1xf32>
    %19 = math.rsqrt %18 : vector<8x1xf32>
    %20 = vector.broadcast %19 : vector<8x1xf32> to vector<8x32xf32>
    %21 = arith.mulf %16, %20 : vector<8x32xf32>
    %22 = vector.broadcast %2 : vector<1x32xf32> to vector<8x32xf32>
    %23 = arith.mulf %21, %22 : vector<8x32xf32>
    %24 = vector.broadcast %3 : vector<1x32xf32> to vector<8x32xf32>
    %25 = arith.addf %23, %24 : vector<8x32xf32>
    %c0_10 = arith.constant 0 : index
    %c0_11 = arith.constant 0 : index
    %c0_12 = arith.constant 0 : index
    %26 = vector.load %arg2[%c0_10, %c0_11, %c0_12] : memref<1x1x8xf32, #tpu.memory_space<vmem>>, vector<1x1x8xf32>
    %27 = vector.shape_cast %26 : vector<1x1x8xf32> to vector<1x8xf32>
    %cst_13 = arith.constant 5.000000e-01 : f32
    %28 = vector.broadcast %cst_13 : f32 to vector<1x8xf32>
    %29 = arith.cmpf ogt, %27, %28 : vector<1x8xf32>
    %cst_14 = arith.constant 0.000000e+00 : f32
    %cst_15 = arith.constant -1.000000e+04 : f32
    %30 = vector.broadcast %cst_14 : f32 to vector<1x8xf32>
    %31 = vector.broadcast %cst_15 : f32 to vector<1x8xf32>
    %32 = arith.select %29, %30, %31 : vector<1x8xi1>, vector<1x8xf32>
    %c0_16 = arith.constant 0 : index
    %c0_17 = arith.constant 0 : index
    %c0_18 = arith.constant 0 : index
    %c0_19 = arith.constant 0 : index
    %33 = vector.load %arg5[%c0_16, %c0_17, %c0_18, %c0_19] : memref<2x4x32x8xbf16, #tpu.memory_space<vmem>>, vector<1x1x32x8xbf16>
    %34 = vector.shape_cast %33 : vector<1x1x32x8xbf16> to vector<32x8xbf16>
    %c0_20 = arith.constant 0 : index
    %c0_21 = arith.constant 0 : index
    %c0_22 = arith.constant 0 : index
    %c0_23 = arith.constant 0 : index
    %35 = vector.load %arg6[%c0_20, %c0_21, %c0_22, %c0_23] : memref<2x4x1x8xf32, #tpu.memory_space<vmem>>, vector<1x1x1x8xf32>
    %36 = vector.shape_cast %35 : vector<1x1x1x8xf32> to vector<1x8xf32>
    %37 = arith.truncf %25 : vector<8x32xf32> to vector<8x32xbf16>
    %cst_24 = arith.constant dense<0.000000e+00> : vector<8x8xf32>
    %38 = tpu.matmul %37, %34, %cst_24 {dimension_numbers = #tpu.dot_dimension_numbers<[1], [0], [0], [1], [0, 0, 1, 1], [], []>} : vector<8x32xbf16>, vector<32x8xbf16>, vector<8x8xf32> -> vector<8x8xf32>
    %39 = vector.broadcast %36 : vector<1x8xf32> to vector<8x8xf32>
    %40 = arith.addf %38, %39 : vector<8x8xf32>
    %c0_25 = arith.constant 0 : index
    %c0_26 = arith.constant 0 : index
    %c0_27 = arith.constant 0 : index
    %c0_28 = arith.constant 0 : index
    %41 = vector.load %arg7[%c0_25, %c0_26, %c0_27, %c0_28] : memref<2x4x32x8xbf16, #tpu.memory_space<vmem>>, vector<1x1x32x8xbf16>
    %42 = vector.shape_cast %41 : vector<1x1x32x8xbf16> to vector<32x8xbf16>
    %c0_29 = arith.constant 0 : index
    %c0_30 = arith.constant 0 : index
    %c0_31 = arith.constant 0 : index
    %c0_32 = arith.constant 0 : index
    %43 = vector.load %arg8[%c0_29, %c0_30, %c0_31, %c0_32] : memref<2x4x1x8xf32, #tpu.memory_space<vmem>>, vector<1x1x1x8xf32>
    %44 = vector.shape_cast %43 : vector<1x1x1x8xf32> to vector<1x8xf32>
    %45 = arith.truncf %25 : vector<8x32xf32> to vector<8x32xbf16>
    %cst_33 = arith.constant dense<0.000000e+00> : vector<8x8xf32>
    %46 = tpu.matmul %45, %42, %cst_33 {dimension_numbers = #tpu.dot_dimension_numbers<[1], [0], [0], [1], [0, 0, 1, 1], [], []>} : vector<8x32xbf16>, vector<32x8xbf16>, vector<8x8xf32> -> vector<8x8xf32>
    %47 = vector.broadcast %44 : vector<1x8xf32> to vector<8x8xf32>
    %48 = arith.addf %46, %47 : vector<8x8xf32>
    %c0_34 = arith.constant 0 : index
    %c0_35 = arith.constant 0 : index
    %c0_36 = arith.constant 0 : index
    %c0_37 = arith.constant 0 : index
    %49 = vector.load %arg9[%c0_34, %c0_35, %c0_36, %c0_37] : memref<2x4x32x8xbf16, #tpu.memory_space<vmem>>, vector<1x1x32x8xbf16>
    %50 = vector.shape_cast %49 : vector<1x1x32x8xbf16> to vector<32x8xbf16>
    %c0_38 = arith.constant 0 : index
    %c0_39 = arith.constant 0 : index
    %c0_40 = arith.constant 0 : index
    %c0_41 = arith.constant 0 : index
    %51 = vector.load %arg10[%c0_38, %c0_39, %c0_40, %c0_41] : memref<2x4x1x8xf32, #tpu.memory_space<vmem>>, vector<1x1x1x8xf32>
    %52 = vector.shape_cast %51 : vector<1x1x1x8xf32> to vector<1x8xf32>
    %53 = arith.truncf %25 : vector<8x32xf32> to vector<8x32xbf16>
    %cst_42 = arith.constant dense<0.000000e+00> : vector<8x8xf32>
    %54 = tpu.matmul %53, %50, %cst_42 {dimension_numbers = #tpu.dot_dimension_numbers<[1], [0], [0], [1], [0, 0, 1, 1], [], []>} : vector<8x32xbf16>, vector<32x8xbf16>, vector<8x8xf32> -> vector<8x8xf32>
    %55 = vector.broadcast %52 : vector<1x8xf32> to vector<8x8xf32>
    %56 = arith.addf %54, %55 : vector<8x8xf32>
    "tpu.trace_start"() <{level = 10 : i32, message = "qd,kd->qk"}> : () -> ()
    %cst_43 = arith.constant dense<0.000000e+00> : vector<8x8xf32>
    %57 = tpu.matmul %40, %48, %cst_43 {dimension_numbers = #tpu.dot_dimension_numbers<[1], [1], [0], [0], [0, 0, 1, 0], [], []>} : vector<8x8xf32>, vector<8x8xf32>, vector<8x8xf32> -> vector<8x8xf32>
    "tpu.trace_stop"() : () -> ()
    %cst_44 = arith.constant 0.353553385 : f32
    %58 = vector.broadcast %cst_44 : f32 to vector<8x8xf32>
    %59 = arith.mulf %57, %58 : vector<8x8xf32>
    %60 = vector.broadcast %32 : vector<1x8xf32> to vector<8x8xf32>
    %61 = arith.addf %59, %60 : vector<8x8xf32>
    %cst_45 = arith.constant dense<0xFF800000> : vector<8xf32>
    %62 = vector.multi_reduction <maximumf>, %61, %cst_45 [1] : vector<8x8xf32> to vector<8xf32>
    %63 = vector.shape_cast %62 : vector<8xf32> to vector<8x1xf32>
    %64 = vector.broadcast %63 : vector<8x1xf32> to vector<8x8xf32>
    %65 = arith.subf %61, %64 : vector<8x8xf32>
    %66 = math.exp %65 : vector<8x8xf32>
    %cst_46 = arith.constant dense<0.000000e+00> : vector<8xf32>
    %67 = vector.multi_reduction <add>, %66, %cst_46 [1] : vector<8x8xf32> to vector<8xf32>
    %68 = vector.shape_cast %67 : vector<8xf32> to vector<8x1xf32>
    %69 = vector.broadcast %68 : vector<8x1xf32> to vector<8x8xf32>
    %70 = arith.divf %66, %69 : vector<8x8xf32>
    %cst_47 = arith.constant dense<0.000000e+00> : vector<8x8xf32>
    %71 = tpu.matmul %70, %56, %cst_47 {dimension_numbers = #tpu.dot_dimension_numbers<[1], [0], [0], [1], [0, 0, 1, 1], [], []>} : vector<8x8xf32>, vector<8x8xf32>, vector<8x8xf32> -> vector<8x8xf32>
    %72 = arith.truncf %71 : vector<8x8xf32> to vector<8x8xbf16>
    %c0_48 = arith.constant 0 : index
    %c0_49 = arith.constant 0 : index
    %c0_50 = arith.constant 0 : index
    %c0_51 = arith.constant 0 : index
    %73 = vector.load %arg11[%c0_48, %c0_49, %c0_50, %c0_51] : memref<2x4x8x32xbf16, #tpu.memory_space<vmem>>, vector<1x1x8x32xbf16>
    %74 = vector.shape_cast %73 : vector<1x1x8x32xbf16> to vector<8x32xbf16>
    %cst_52 = arith.constant dense<0.000000e+00> : vector<8x32xf32>
    %75 = tpu.matmul %72, %74, %cst_52 {dimension_numbers = #tpu.dot_dimension_numbers<[1], [0], [0], [1], [0, 0, 1, 1], [], []>} : vector<8x8xbf16>, vector<8x32xbf16>, vector<8x32xf32> -> vector<8x32xf32>
    %c0_53 = arith.constant 0 : index
    %c1 = arith.constant 1 : index
    %c0_54 = arith.constant 0 : index
    %c0_55 = arith.constant 0 : index
    %76 = vector.load %arg5[%c0_53, %c1, %c0_54, %c0_55] : memref<2x4x32x8xbf16, #tpu.memory_space<vmem>>, vector<1x1x32x8xbf16>
    %77 = vector.shape_cast %76 : vector<1x1x32x8xbf16> to vector<32x8xbf16>
    %c0_56 = arith.constant 0 : index
    %c1_57 = arith.constant 1 : index
    %c0_58 = arith.constant 0 : index
    %c0_59 = arith.constant 0 : index
    %78 = vector.load %arg6[%c0_56, %c1_57, %c0_58, %c0_59] : memref<2x4x1x8xf32, #tpu.memory_space<vmem>>, vector<1x1x1x8xf32>
    %79 = vector.shape_cast %78 : vector<1x1x1x8xf32> to vector<1x8xf32>
    %80 = arith.truncf %25 : vector<8x32xf32> to vector<8x32xbf16>
    %cst_60 = arith.constant dense<0.000000e+00> : vector<8x8xf32>
    %81 = tpu.matmul %80, %77, %cst_60 {dimension_numbers = #tpu.dot_dimension_numbers<[1], [0], [0], [1], [0, 0, 1, 1], [], []>} : vector<8x32xbf16>, vector<32x8xbf16>, vector<8x8xf32> -> vector<8x8xf32>
    %82 = vector.broadcast %79 : vector<1x8xf32> to vector<8x8xf32>
    %83 = arith.addf %81, %82 : vector<8x8xf32>
    %c0_61 = arith.constant 0 : index
    %c1_62 = arith.constant 1 : index
    %c0_63 = arith.constant 0 : index
    %c0_64 = arith.constant 0 : index
    %84 = vector.load %arg7[%c0_61, %c1_62, %c0_63, %c0_64] : memref<2x4x32x8xbf16, #tpu.memory_space<vmem>>, vector<1x1x32x8xbf16>
    %85 = vector.shape_cast %84 : vector<1x1x32x8xbf16> to vector<32x8xbf16>
    %c0_65 = arith.constant 0 : index
    %c1_66 = arith.constant 1 : index
    %c0_67 = arith.constant 0 : index
    %c0_68 = arith.constant 0 : index
    %86 = vector.load %arg8[%c0_65, %c1_66, %c0_67, %c0_68] : memref<2x4x1x8xf32, #tpu.memory_space<vmem>>, vector<1x1x1x8xf32>
    %87 = vector.shape_cast %86 : vector<1x1x1x8xf32> to vector<1x8xf32>
    %88 = arith.truncf %25 : vector<8x32xf32> to vector<8x32xbf16>
    %cst_69 = arith.constant dense<0.000000e+00> : vector<8x8xf32>
    %89 = tpu.matmul %88, %85, %cst_69 {dimension_numbers = #tpu.dot_dimension_numbers<[1], [0], [0], [1], [0, 0, 1, 1], [], []>} : vector<8x32xbf16>, vector<32x8xbf16>, vector<8x8xf32> -> vector<8x8xf32>
    %90 = vector.broadcast %87 : vector<1x8xf32> to vector<8x8xf32>
    %91 = arith.addf %89, %90 : vector<8x8xf32>
    %c0_70 = arith.constant 0 : index
    %c1_71 = arith.constant 1 : index
    %c0_72 = arith.constant 0 : index
    %c0_73 = arith.constant 0 : index
    %92 = vector.load %arg9[%c0_70, %c1_71, %c0_72, %c0_73] : memref<2x4x32x8xbf16, #tpu.memory_space<vmem>>, vector<1x1x32x8xbf16>
    %93 = vector.shape_cast %92 : vector<1x1x32x8xbf16> to vector<32x8xbf16>
    %c0_74 = arith.constant 0 : index
    %c1_75 = arith.constant 1 : index
    %c0_76 = arith.constant 0 : index
    %c0_77 = arith.constant 0 : index
    %94 = vector.load %arg10[%c0_74, %c1_75, %c0_76, %c0_77] : memref<2x4x1x8xf32, #tpu.memory_space<vmem>>, vector<1x1x1x8xf32>
    %95 = vector.shape_cast %94 : vector<1x1x1x8xf32> to vector<1x8xf32>
    %96 = arith.truncf %25 : vector<8x32xf32> to vector<8x32xbf16>
    %cst_78 = arith.constant dense<0.000000e+00> : vector<8x8xf32>
    %97 = tpu.matmul %96, %93, %cst_78 {dimension_numbers = #tpu.dot_dimension_numbers<[1], [0], [0], [1], [0, 0, 1, 1], [], []>} : vector<8x32xbf16>, vector<32x8xbf16>, vector<8x8xf32> -> vector<8x8xf32>
    %98 = vector.broadcast %95 : vector<1x8xf32> to vector<8x8xf32>
    %99 = arith.addf %97, %98 : vector<8x8xf32>
    "tpu.trace_start"() <{level = 10 : i32, message = "qd,kd->qk"}> : () -> ()
    %cst_79 = arith.constant dense<0.000000e+00> : vector<8x8xf32>
    %100 = tpu.matmul %83, %91, %cst_79 {dimension_numbers = #tpu.dot_dimension_numbers<[1], [1], [0], [0], [0, 0, 1, 0], [], []>} : vector<8x8xf32>, vector<8x8xf32>, vector<8x8xf32> -> vector<8x8xf32>
    "tpu.trace_stop"() : () -> ()
    %cst_80 = arith.constant 0.353553385 : f32
    %101 = vector.broadcast %cst_80 : f32 to vector<8x8xf32>
    %102 = arith.mulf %100, %101 : vector<8x8xf32>
    %103 = vector.broadcast %32 : vector<1x8xf32> to vector<8x8xf32>
    %104 = arith.addf %102, %103 : vector<8x8xf32>
    %cst_81 = arith.constant dense<0xFF800000> : vector<8xf32>
    %105 = vector.multi_reduction <maximumf>, %104, %cst_81 [1] : vector<8x8xf32> to vector<8xf32>
    %106 = vector.shape_cast %105 : vector<8xf32> to vector<8x1xf32>
    %107 = vector.broadcast %106 : vector<8x1xf32> to vector<8x8xf32>
    %108 = arith.subf %104, %107 : vector<8x8xf32>
    %109 = math.exp %108 : vector<8x8xf32>
    %cst_82 = arith.constant dense<0.000000e+00> : vector<8xf32>
    %110 = vector.multi_reduction <add>, %109, %cst_82 [1] : vector<8x8xf32> to vector<8xf32>
    %111 = vector.shape_cast %110 : vector<8xf32> to vector<8x1xf32>
    %112 = vector.broadcast %111 : vector<8x1xf32> to vector<8x8xf32>
    %113 = arith.divf %109, %112 : vector<8x8xf32>
    %cst_83 = arith.constant dense<0.000000e+00> : vector<8x8xf32>
    %114 = tpu.matmul %113, %99, %cst_83 {dimension_numbers = #tpu.dot_dimension_numbers<[1], [0], [0], [1], [0, 0, 1, 1], [], []>} : vector<8x8xf32>, vector<8x8xf32>, vector<8x8xf32> -> vector<8x8xf32>
    %115 = arith.truncf %114 : vector<8x8xf32> to vector<8x8xbf16>
    %c0_84 = arith.constant 0 : index
    %c1_85 = arith.constant 1 : index
    %c0_86 = arith.constant 0 : index
    %c0_87 = arith.constant 0 : index
    %116 = vector.load %arg11[%c0_84, %c1_85, %c0_86, %c0_87] : memref<2x4x8x32xbf16, #tpu.memory_space<vmem>>, vector<1x1x8x32xbf16>
    %117 = vector.shape_cast %116 : vector<1x1x8x32xbf16> to vector<8x32xbf16>
    %cst_88 = arith.constant dense<0.000000e+00> : vector<8x32xf32>
    %118 = tpu.matmul %115, %117, %cst_88 {dimension_numbers = #tpu.dot_dimension_numbers<[1], [0], [0], [1], [0, 0, 1, 1], [], []>} : vector<8x8xbf16>, vector<8x32xbf16>, vector<8x32xf32> -> vector<8x32xf32>
    %119 = arith.addf %75, %118 : vector<8x32xf32>
    %c0_89 = arith.constant 0 : index
    %c2 = arith.constant 2 : index
    %c0_90 = arith.constant 0 : index
    %c0_91 = arith.constant 0 : index
    %120 = vector.load %arg5[%c0_89, %c2, %c0_90, %c0_91] : memref<2x4x32x8xbf16, #tpu.memory_space<vmem>>, vector<1x1x32x8xbf16>
    %121 = vector.shape_cast %120 : vector<1x1x32x8xbf16> to vector<32x8xbf16>
    %c0_92 = arith.constant 0 : index
    %c2_93 = arith.constant 2 : index
    %c0_94 = arith.constant 0 : index
    %c0_95 = arith.constant 0 : index
    %122 = vector.load %arg6[%c0_92, %c2_93, %c0_94, %c0_95] : memref<2x4x1x8xf32, #tpu.memory_space<vmem>>, vector<1x1x1x8xf32>
    %123 = vector.shape_cast %122 : vector<1x1x1x8xf32> to vector<1x8xf32>
    %124 = arith.truncf %25 : vector<8x32xf32> to vector<8x32xbf16>
    %cst_96 = arith.constant dense<0.000000e+00> : vector<8x8xf32>
    %125 = tpu.matmul %124, %121, %cst_96 {dimension_numbers = #tpu.dot_dimension_numbers<[1], [0], [0], [1], [0, 0, 1, 1], [], []>} : vector<8x32xbf16>, vector<32x8xbf16>, vector<8x8xf32> -> vector<8x8xf32>
    %126 = vector.broadcast %123 : vector<1x8xf32> to vector<8x8xf32>
    %127 = arith.addf %125, %126 : vector<8x8xf32>
    %c0_97 = arith.constant 0 : index
    %c2_98 = arith.constant 2 : index
    %c0_99 = arith.constant 0 : index
    %c0_100 = arith.constant 0 : index
    %128 = vector.load %arg7[%c0_97, %c2_98, %c0_99, %c0_100] : memref<2x4x32x8xbf16, #tpu.memory_space<vmem>>, vector<1x1x32x8xbf16>
    %129 = vector.shape_cast %128 : vector<1x1x32x8xbf16> to vector<32x8xbf16>
    %c0_101 = arith.constant 0 : index
    %c2_102 = arith.constant 2 : index
    %c0_103 = arith.constant 0 : index
    %c0_104 = arith.constant 0 : index
    %130 = vector.load %arg8[%c0_101, %c2_102, %c0_103, %c0_104] : memref<2x4x1x8xf32, #tpu.memory_space<vmem>>, vector<1x1x1x8xf32>
    %131 = vector.shape_cast %130 : vector<1x1x1x8xf32> to vector<1x8xf32>
    %132 = arith.truncf %25 : vector<8x32xf32> to vector<8x32xbf16>
    %cst_105 = arith.constant dense<0.000000e+00> : vector<8x8xf32>
    %133 = tpu.matmul %132, %129, %cst_105 {dimension_numbers = #tpu.dot_dimension_numbers<[1], [0], [0], [1], [0, 0, 1, 1], [], []>} : vector<8x32xbf16>, vector<32x8xbf16>, vector<8x8xf32> -> vector<8x8xf32>
    %134 = vector.broadcast %131 : vector<1x8xf32> to vector<8x8xf32>
    %135 = arith.addf %133, %134 : vector<8x8xf32>
    %c0_106 = arith.constant 0 : index
    %c2_107 = arith.constant 2 : index
    %c0_108 = arith.constant 0 : index
    %c0_109 = arith.constant 0 : index
    %136 = vector.load %arg9[%c0_106, %c2_107, %c0_108, %c0_109] : memref<2x4x32x8xbf16, #tpu.memory_space<vmem>>, vector<1x1x32x8xbf16>
    %137 = vector.shape_cast %136 : vector<1x1x32x8xbf16> to vector<32x8xbf16>
    %c0_110 = arith.constant 0 : index
    %c2_111 = arith.constant 2 : index
    %c0_112 = arith.constant 0 : index
    %c0_113 = arith.constant 0 : index
    %138 = vector.load %arg10[%c0_110, %c2_111, %c0_112, %c0_113] : memref<2x4x1x8xf32, #tpu.memory_space<vmem>>, vector<1x1x1x8xf32>
    %139 = vector.shape_cast %138 : vector<1x1x1x8xf32> to vector<1x8xf32>
    %140 = arith.truncf %25 : vector<8x32xf32> to vector<8x32xbf16>
    %cst_114 = arith.constant dense<0.000000e+00> : vector<8x8xf32>
    %141 = tpu.matmul %140, %137, %cst_114 {dimension_numbers = #tpu.dot_dimension_numbers<[1], [0], [0], [1], [0, 0, 1, 1], [], []>} : vector<8x32xbf16>, vector<32x8xbf16>, vector<8x8xf32> -> vector<8x8xf32>
    %142 = vector.broadcast %139 : vector<1x8xf32> to vector<8x8xf32>
    %143 = arith.addf %141, %142 : vector<8x8xf32>
    "tpu.trace_start"() <{level = 10 : i32, message = "qd,kd->qk"}> : () -> ()
    %cst_115 = arith.constant dense<0.000000e+00> : vector<8x8xf32>
    %144 = tpu.matmul %127, %135, %cst_115 {dimension_numbers = #tpu.dot_dimension_numbers<[1], [1], [0], [0], [0, 0, 1, 0], [], []>} : vector<8x8xf32>, vector<8x8xf32>, vector<8x8xf32> -> vector<8x8xf32>
    "tpu.trace_stop"() : () -> ()
    %cst_116 = arith.constant 0.353553385 : f32
    %145 = vector.broadcast %cst_116 : f32 to vector<8x8xf32>
    %146 = arith.mulf %144, %145 : vector<8x8xf32>
    %147 = vector.broadcast %32 : vector<1x8xf32> to vector<8x8xf32>
    %148 = arith.addf %146, %147 : vector<8x8xf32>
    %cst_117 = arith.constant dense<0xFF800000> : vector<8xf32>
    %149 = vector.multi_reduction <maximumf>, %148, %cst_117 [1] : vector<8x8xf32> to vector<8xf32>
    %150 = vector.shape_cast %149 : vector<8xf32> to vector<8x1xf32>
    %151 = vector.broadcast %150 : vector<8x1xf32> to vector<8x8xf32>
    %152 = arith.subf %148, %151 : vector<8x8xf32>
    %153 = math.exp %152 : vector<8x8xf32>
    %cst_118 = arith.constant dense<0.000000e+00> : vector<8xf32>
    %154 = vector.multi_reduction <add>, %153, %cst_118 [1] : vector<8x8xf32> to vector<8xf32>
    %155 = vector.shape_cast %154 : vector<8xf32> to vector<8x1xf32>
    %156 = vector.broadcast %155 : vector<8x1xf32> to vector<8x8xf32>
    %157 = arith.divf %153, %156 : vector<8x8xf32>
    %cst_119 = arith.constant dense<0.000000e+00> : vector<8x8xf32>
    %158 = tpu.matmul %157, %143, %cst_119 {dimension_numbers = #tpu.dot_dimension_numbers<[1], [0], [0], [1], [0, 0, 1, 1], [], []>} : vector<8x8xf32>, vector<8x8xf32>, vector<8x8xf32> -> vector<8x8xf32>
    %159 = arith.truncf %158 : vector<8x8xf32> to vector<8x8xbf16>
    %c0_120 = arith.constant 0 : index
    %c2_121 = arith.constant 2 : index
    %c0_122 = arith.constant 0 : index
    %c0_123 = arith.constant 0 : index
    %160 = vector.load %arg11[%c0_120, %c2_121, %c0_122, %c0_123] : memref<2x4x8x32xbf16, #tpu.memory_space<vmem>>, vector<1x1x8x32xbf16>
    %161 = vector.shape_cast %160 : vector<1x1x8x32xbf16> to vector<8x32xbf16>
    %cst_124 = arith.constant dense<0.000000e+00> : vector<8x32xf32>
    %162 = tpu.matmul %159, %161, %cst_124 {dimension_numbers = #tpu.dot_dimension_numbers<[1], [0], [0], [1], [0, 0, 1, 1], [], []>} : vector<8x8xbf16>, vector<8x32xbf16>, vector<8x32xf32> -> vector<8x32xf32>
    %163 = arith.addf %119, %162 : vector<8x32xf32>
    %c0_125 = arith.constant 0 : index
    %c3 = arith.constant 3 : index
    %c0_126 = arith.constant 0 : index
    %c0_127 = arith.constant 0 : index
    %164 = vector.load %arg5[%c0_125, %c3, %c0_126, %c0_127] : memref<2x4x32x8xbf16, #tpu.memory_space<vmem>>, vector<1x1x32x8xbf16>
    %165 = vector.shape_cast %164 : vector<1x1x32x8xbf16> to vector<32x8xbf16>
    %c0_128 = arith.constant 0 : index
    %c3_129 = arith.constant 3 : index
    %c0_130 = arith.constant 0 : index
    %c0_131 = arith.constant 0 : index
    %166 = vector.load %arg6[%c0_128, %c3_129, %c0_130, %c0_131] : memref<2x4x1x8xf32, #tpu.memory_space<vmem>>, vector<1x1x1x8xf32>
    %167 = vector.shape_cast %166 : vector<1x1x1x8xf32> to vector<1x8xf32>
    %168 = arith.truncf %25 : vector<8x32xf32> to vector<8x32xbf16>
    %cst_132 = arith.constant dense<0.000000e+00> : vector<8x8xf32>
    %169 = tpu.matmul %168, %165, %cst_132 {dimension_numbers = #tpu.dot_dimension_numbers<[1], [0], [0], [1], [0, 0, 1, 1], [], []>} : vector<8x32xbf16>, vector<32x8xbf16>, vector<8x8xf32> -> vector<8x8xf32>
    %170 = vector.broadcast %167 : vector<1x8xf32> to vector<8x8xf32>
    %171 = arith.addf %169, %170 : vector<8x8xf32>
    %c0_133 = arith.constant 0 : index
    %c3_134 = arith.constant 3 : index
    %c0_135 = arith.constant 0 : index
    %c0_136 = arith.constant 0 : index
    %172 = vector.load %arg7[%c0_133, %c3_134, %c0_135, %c0_136] : memref<2x4x32x8xbf16, #tpu.memory_space<vmem>>, vector<1x1x32x8xbf16>
    %173 = vector.shape_cast %172 : vector<1x1x32x8xbf16> to vector<32x8xbf16>
    %c0_137 = arith.constant 0 : index
    %c3_138 = arith.constant 3 : index
    %c0_139 = arith.constant 0 : index
    %c0_140 = arith.constant 0 : index
    %174 = vector.load %arg8[%c0_137, %c3_138, %c0_139, %c0_140] : memref<2x4x1x8xf32, #tpu.memory_space<vmem>>, vector<1x1x1x8xf32>
    %175 = vector.shape_cast %174 : vector<1x1x1x8xf32> to vector<1x8xf32>
    %176 = arith.truncf %25 : vector<8x32xf32> to vector<8x32xbf16>
    %cst_141 = arith.constant dense<0.000000e+00> : vector<8x8xf32>
    %177 = tpu.matmul %176, %173, %cst_141 {dimension_numbers = #tpu.dot_dimension_numbers<[1], [0], [0], [1], [0, 0, 1, 1], [], []>} : vector<8x32xbf16>, vector<32x8xbf16>, vector<8x8xf32> -> vector<8x8xf32>
    %178 = vector.broadcast %175 : vector<1x8xf32> to vector<8x8xf32>
    %179 = arith.addf %177, %178 : vector<8x8xf32>
    %c0_142 = arith.constant 0 : index
    %c3_143 = arith.constant 3 : index
    %c0_144 = arith.constant 0 : index
    %c0_145 = arith.constant 0 : index
    %180 = vector.load %arg9[%c0_142, %c3_143, %c0_144, %c0_145] : memref<2x4x32x8xbf16, #tpu.memory_space<vmem>>, vector<1x1x32x8xbf16>
    %181 = vector.shape_cast %180 : vector<1x1x32x8xbf16> to vector<32x8xbf16>
    %c0_146 = arith.constant 0 : index
    %c3_147 = arith.constant 3 : index
    %c0_148 = arith.constant 0 : index
    %c0_149 = arith.constant 0 : index
    %182 = vector.load %arg10[%c0_146, %c3_147, %c0_148, %c0_149] : memref<2x4x1x8xf32, #tpu.memory_space<vmem>>, vector<1x1x1x8xf32>
    %183 = vector.shape_cast %182 : vector<1x1x1x8xf32> to vector<1x8xf32>
    %184 = arith.truncf %25 : vector<8x32xf32> to vector<8x32xbf16>
    %cst_150 = arith.constant dense<0.000000e+00> : vector<8x8xf32>
    %185 = tpu.matmul %184, %181, %cst_150 {dimension_numbers = #tpu.dot_dimension_numbers<[1], [0], [0], [1], [0, 0, 1, 1], [], []>} : vector<8x32xbf16>, vector<32x8xbf16>, vector<8x8xf32> -> vector<8x8xf32>
    %186 = vector.broadcast %183 : vector<1x8xf32> to vector<8x8xf32>
    %187 = arith.addf %185, %186 : vector<8x8xf32>
    "tpu.trace_start"() <{level = 10 : i32, message = "qd,kd->qk"}> : () -> ()
    %cst_151 = arith.constant dense<0.000000e+00> : vector<8x8xf32>
    %188 = tpu.matmul %171, %179, %cst_151 {dimension_numbers = #tpu.dot_dimension_numbers<[1], [1], [0], [0], [0, 0, 1, 0], [], []>} : vector<8x8xf32>, vector<8x8xf32>, vector<8x8xf32> -> vector<8x8xf32>
    "tpu.trace_stop"() : () -> ()
    %cst_152 = arith.constant 0.353553385 : f32
    %189 = vector.broadcast %cst_152 : f32 to vector<8x8xf32>
    %190 = arith.mulf %188, %189 : vector<8x8xf32>
    %191 = vector.broadcast %32 : vector<1x8xf32> to vector<8x8xf32>
    %192 = arith.addf %190, %191 : vector<8x8xf32>
    %cst_153 = arith.constant dense<0xFF800000> : vector<8xf32>
    %193 = vector.multi_reduction <maximumf>, %192, %cst_153 [1] : vector<8x8xf32> to vector<8xf32>
    %194 = vector.shape_cast %193 : vector<8xf32> to vector<8x1xf32>
    %195 = vector.broadcast %194 : vector<8x1xf32> to vector<8x8xf32>
    %196 = arith.subf %192, %195 : vector<8x8xf32>
    %197 = math.exp %196 : vector<8x8xf32>
    %cst_154 = arith.constant dense<0.000000e+00> : vector<8xf32>
    %198 = vector.multi_reduction <add>, %197, %cst_154 [1] : vector<8x8xf32> to vector<8xf32>
    %199 = vector.shape_cast %198 : vector<8xf32> to vector<8x1xf32>
    %200 = vector.broadcast %199 : vector<8x1xf32> to vector<8x8xf32>
    %201 = arith.divf %197, %200 : vector<8x8xf32>
    %cst_155 = arith.constant dense<0.000000e+00> : vector<8x8xf32>
    %202 = tpu.matmul %201, %187, %cst_155 {dimension_numbers = #tpu.dot_dimension_numbers<[1], [0], [0], [1], [0, 0, 1, 1], [], []>} : vector<8x8xf32>, vector<8x8xf32>, vector<8x8xf32> -> vector<8x8xf32>
    %203 = arith.truncf %202 : vector<8x8xf32> to vector<8x8xbf16>
    %c0_156 = arith.constant 0 : index
    %c3_157 = arith.constant 3 : index
    %c0_158 = arith.constant 0 : index
    %c0_159 = arith.constant 0 : index
    %204 = vector.load %arg11[%c0_156, %c3_157, %c0_158, %c0_159] : memref<2x4x8x32xbf16, #tpu.memory_space<vmem>>, vector<1x1x8x32xbf16>
    %205 = vector.shape_cast %204 : vector<1x1x8x32xbf16> to vector<8x32xbf16>
    %cst_160 = arith.constant dense<0.000000e+00> : vector<8x32xf32>
    %206 = tpu.matmul %203, %205, %cst_160 {dimension_numbers = #tpu.dot_dimension_numbers<[1], [0], [0], [1], [0, 0, 1, 1], [], []>} : vector<8x8xbf16>, vector<8x32xbf16>, vector<8x32xf32> -> vector<8x32xf32>
    %207 = arith.addf %163, %206 : vector<8x32xf32>
    %208 = arith.addf %25, %207 : vector<8x32xf32>
    %c0_161 = arith.constant 0 : index
    %c0_162 = arith.constant 0 : index
    %c0_163 = arith.constant 0 : index
    %209 = vector.load %arg12[%c0_161, %c0_162, %c0_163] : memref<2x1x32xf32, #tpu.memory_space<vmem>>, vector<1x1x32xf32>
    %210 = vector.shape_cast %209 : vector<1x1x32xf32> to vector<1x32xf32>
    %211 = vector.broadcast %210 : vector<1x32xf32> to vector<8x32xf32>
    %212 = arith.addf %208, %211 : vector<8x32xf32>
    %c0_164 = arith.constant 0 : index
    %c0_165 = arith.constant 0 : index
    %c0_166 = arith.constant 0 : index
    %213 = vector.load %arg13[%c0_164, %c0_165, %c0_166] : memref<2x1x32xf32, #tpu.memory_space<vmem>>, vector<1x1x32xf32>
    %214 = vector.shape_cast %213 : vector<1x1x32xf32> to vector<1x32xf32>
    %c0_167 = arith.constant 0 : index
    %c0_168 = arith.constant 0 : index
    %c0_169 = arith.constant 0 : index
    %215 = vector.load %arg14[%c0_167, %c0_168, %c0_169] : memref<2x1x32xf32, #tpu.memory_space<vmem>>, vector<1x1x32xf32>
    %216 = vector.shape_cast %215 : vector<1x1x32xf32> to vector<1x32xf32>
    %cst_170 = arith.constant dense<0.000000e+00> : vector<8xf32>
    %217 = vector.multi_reduction <add>, %212, %cst_170 [1] : vector<8x32xf32> to vector<8xf32>
    %218 = vector.shape_cast %217 : vector<8xf32> to vector<8x1xf32>
    %cst_171 = arith.constant 3.200000e+01 : f32
    %219 = vector.broadcast %cst_171 : f32 to vector<8x1xf32>
    %220 = arith.divf %218, %219 : vector<8x1xf32>
    %221 = vector.broadcast %220 : vector<8x1xf32> to vector<8x32xf32>
    %222 = arith.subf %212, %221 : vector<8x32xf32>
    %223 = arith.mulf %222, %222 : vector<8x32xf32>
    %cst_172 = arith.constant dense<0.000000e+00> : vector<8xf32>
    %224 = vector.multi_reduction <add>, %223, %cst_172 [1] : vector<8x32xf32> to vector<8xf32>
    %225 = vector.shape_cast %224 : vector<8xf32> to vector<8x1xf32>
    %cst_173 = arith.constant 3.200000e+01 : f32
    %226 = vector.broadcast %cst_173 : f32 to vector<8x1xf32>
    %227 = arith.divf %225, %226 : vector<8x1xf32>
    %228 = vector.broadcast %220 : vector<8x1xf32> to vector<8x32xf32>
    %229 = arith.subf %212, %228 : vector<8x32xf32>
    %cst_174 = arith.constant 9.99999996E-13 : f32
    %230 = vector.broadcast %cst_174 : f32 to vector<8x1xf32>
    %231 = arith.addf %227, %230 : vector<8x1xf32>
    %232 = math.rsqrt %231 : vector<8x1xf32>
    %233 = vector.broadcast %232 : vector<8x1xf32> to vector<8x32xf32>
    %234 = arith.mulf %229, %233 : vector<8x32xf32>
    %235 = vector.broadcast %214 : vector<1x32xf32> to vector<8x32xf32>
    %236 = arith.mulf %234, %235 : vector<8x32xf32>
    %237 = vector.broadcast %216 : vector<1x32xf32> to vector<8x32xf32>
    %238 = arith.addf %236, %237 : vector<8x32xf32>
    %c0_175 = arith.constant 0 : index
    %c0_176 = arith.constant 0 : index
    %c0_177 = arith.constant 0 : index
    %239 = vector.load %arg15[%c0_175, %c0_176, %c0_177] : memref<2x32x64xbf16, #tpu.memory_space<vmem>>, vector<1x32x64xbf16>
    %240 = vector.shape_cast %239 : vector<1x32x64xbf16> to vector<32x64xbf16>
    %c0_178 = arith.constant 0 : index
    %c0_179 = arith.constant 0 : index
    %c0_180 = arith.constant 0 : index
    %241 = vector.load %arg16[%c0_178, %c0_179, %c0_180] : memref<2x1x64xf32, #tpu.memory_space<vmem>>, vector<1x1x64xf32>
    %242 = vector.shape_cast %241 : vector<1x1x64xf32> to vector<1x64xf32>
    %243 = arith.truncf %238 : vector<8x32xf32> to vector<8x32xbf16>
    %cst_181 = arith.constant dense<0.000000e+00> : vector<8x64xf32>
    %244 = tpu.matmul %243, %240, %cst_181 {dimension_numbers = #tpu.dot_dimension_numbers<[1], [0], [0], [1], [0, 0, 1, 1], [], []>} : vector<8x32xbf16>, vector<32x64xbf16>, vector<8x64xf32> -> vector<8x64xf32>
    %245 = vector.broadcast %242 : vector<1x64xf32> to vector<8x64xf32>
    %246 = arith.addf %244, %245 : vector<8x64xf32>
    %cst_182 = arith.constant 5.000000e-01 : f32
    %247 = vector.broadcast %cst_182 : f32 to vector<8x64xf32>
    %248 = arith.mulf %247, %246 : vector<8x64xf32>
    %cst_183 = arith.constant 4.471500e-02 : f32
    %249 = vector.broadcast %cst_183 : f32 to vector<8x64xf32>
    %250 = arith.mulf %249, %246 : vector<8x64xf32>
    %251 = arith.mulf %250, %246 : vector<8x64xf32>
    %252 = arith.mulf %251, %246 : vector<8x64xf32>
    %253 = arith.addf %246, %252 : vector<8x64xf32>
    %cst_184 = arith.constant 0.797884583 : f32
    %254 = vector.broadcast %cst_184 : f32 to vector<8x64xf32>
    %255 = arith.mulf %254, %253 : vector<8x64xf32>
    %256 = math.tanh %255 : vector<8x64xf32>
    %cst_185 = arith.constant 1.000000e+00 : f32
    %257 = vector.broadcast %cst_185 : f32 to vector<8x64xf32>
    %258 = arith.addf %257, %256 : vector<8x64xf32>
    %259 = arith.mulf %248, %258 : vector<8x64xf32>
    %c0_186 = arith.constant 0 : index
    %c0_187 = arith.constant 0 : index
    %c0_188 = arith.constant 0 : index
    %260 = vector.load %arg17[%c0_186, %c0_187, %c0_188] : memref<2x64x32xbf16, #tpu.memory_space<vmem>>, vector<1x64x32xbf16>
    %261 = vector.shape_cast %260 : vector<1x64x32xbf16> to vector<64x32xbf16>
    %c0_189 = arith.constant 0 : index
    %c0_190 = arith.constant 0 : index
    %c0_191 = arith.constant 0 : index
    %262 = vector.load %arg18[%c0_189, %c0_190, %c0_191] : memref<2x1x32xf32, #tpu.memory_space<vmem>>, vector<1x1x32xf32>
    %263 = vector.shape_cast %262 : vector<1x1x32xf32> to vector<1x32xf32>
    %264 = arith.truncf %259 : vector<8x64xf32> to vector<8x64xbf16>
    %cst_192 = arith.constant dense<0.000000e+00> : vector<8x32xf32>
    %265 = tpu.matmul %264, %261, %cst_192 {dimension_numbers = #tpu.dot_dimension_numbers<[1], [0], [0], [1], [0, 0, 1, 1], [], []>} : vector<8x64xbf16>, vector<64x32xbf16>, vector<8x32xf32> -> vector<8x32xf32>
    %266 = vector.broadcast %263 : vector<1x32xf32> to vector<8x32xf32>
    %267 = arith.addf %265, %266 : vector<8x32xf32>
    %268 = arith.addf %238, %267 : vector<8x32xf32>
    %c0_193 = arith.constant 0 : index
    %c0_194 = arith.constant 0 : index
    %c0_195 = arith.constant 0 : index
    %269 = vector.load %arg19[%c0_193, %c0_194, %c0_195] : memref<2x1x32xf32, #tpu.memory_space<vmem>>, vector<1x1x32xf32>
    %270 = vector.shape_cast %269 : vector<1x1x32xf32> to vector<1x32xf32>
    %c0_196 = arith.constant 0 : index
    %c0_197 = arith.constant 0 : index
    %c0_198 = arith.constant 0 : index
    %271 = vector.load %arg20[%c0_196, %c0_197, %c0_198] : memref<2x1x32xf32, #tpu.memory_space<vmem>>, vector<1x1x32xf32>
    %272 = vector.shape_cast %271 : vector<1x1x32xf32> to vector<1x32xf32>
    %cst_199 = arith.constant dense<0.000000e+00> : vector<8xf32>
    %273 = vector.multi_reduction <add>, %268, %cst_199 [1] : vector<8x32xf32> to vector<8xf32>
    %274 = vector.shape_cast %273 : vector<8xf32> to vector<8x1xf32>
    %cst_200 = arith.constant 3.200000e+01 : f32
    %275 = vector.broadcast %cst_200 : f32 to vector<8x1xf32>
    %276 = arith.divf %274, %275 : vector<8x1xf32>
    %277 = vector.broadcast %276 : vector<8x1xf32> to vector<8x32xf32>
    %278 = arith.subf %268, %277 : vector<8x32xf32>
    %279 = arith.mulf %278, %278 : vector<8x32xf32>
    %cst_201 = arith.constant dense<0.000000e+00> : vector<8xf32>
    %280 = vector.multi_reduction <add>, %279, %cst_201 [1] : vector<8x32xf32> to vector<8xf32>
    %281 = vector.shape_cast %280 : vector<8xf32> to vector<8x1xf32>
    %cst_202 = arith.constant 3.200000e+01 : f32
    %282 = vector.broadcast %cst_202 : f32 to vector<8x1xf32>
    %283 = arith.divf %281, %282 : vector<8x1xf32>
    %284 = vector.broadcast %276 : vector<8x1xf32> to vector<8x32xf32>
    %285 = arith.subf %268, %284 : vector<8x32xf32>
    %cst_203 = arith.constant 9.99999996E-13 : f32
    %286 = vector.broadcast %cst_203 : f32 to vector<8x1xf32>
    %287 = arith.addf %283, %286 : vector<8x1xf32>
    %288 = math.rsqrt %287 : vector<8x1xf32>
    %289 = vector.broadcast %288 : vector<8x1xf32> to vector<8x32xf32>
    %290 = arith.mulf %285, %289 : vector<8x32xf32>
    %291 = vector.broadcast %270 : vector<1x32xf32> to vector<8x32xf32>
    %292 = arith.mulf %290, %291 : vector<8x32xf32>
    %293 = vector.broadcast %272 : vector<1x32xf32> to vector<8x32xf32>
    %294 = arith.addf %292, %293 : vector<8x32xf32>
    %c1_204 = arith.constant 1 : index
    %c0_205 = arith.constant 0 : index
    %c0_206 = arith.constant 0 : index
    %c0_207 = arith.constant 0 : index
    %295 = vector.load %arg5[%c1_204, %c0_205, %c0_206, %c0_207] : memref<2x4x32x8xbf16, #tpu.memory_space<vmem>>, vector<1x1x32x8xbf16>
    %296 = vector.shape_cast %295 : vector<1x1x32x8xbf16> to vector<32x8xbf16>
    %c1_208 = arith.constant 1 : index
    %c0_209 = arith.constant 0 : index
    %c0_210 = arith.constant 0 : index
    %c0_211 = arith.constant 0 : index
    %297 = vector.load %arg6[%c1_208, %c0_209, %c0_210, %c0_211] : memref<2x4x1x8xf32, #tpu.memory_space<vmem>>, vector<1x1x1x8xf32>
    %298 = vector.shape_cast %297 : vector<1x1x1x8xf32> to vector<1x8xf32>
    %299 = arith.truncf %294 : vector<8x32xf32> to vector<8x32xbf16>
    %cst_212 = arith.constant dense<0.000000e+00> : vector<8x8xf32>
    %300 = tpu.matmul %299, %296, %cst_212 {dimension_numbers = #tpu.dot_dimension_numbers<[1], [0], [0], [1], [0, 0, 1, 1], [], []>} : vector<8x32xbf16>, vector<32x8xbf16>, vector<8x8xf32> -> vector<8x8xf32>
    %301 = vector.broadcast %298 : vector<1x8xf32> to vector<8x8xf32>
    %302 = arith.addf %300, %301 : vector<8x8xf32>
    %c1_213 = arith.constant 1 : index
    %c0_214 = arith.constant 0 : index
    %c0_215 = arith.constant 0 : index
    %c0_216 = arith.constant 0 : index
    %303 = vector.load %arg7[%c1_213, %c0_214, %c0_215, %c0_216] : memref<2x4x32x8xbf16, #tpu.memory_space<vmem>>, vector<1x1x32x8xbf16>
    %304 = vector.shape_cast %303 : vector<1x1x32x8xbf16> to vector<32x8xbf16>
    %c1_217 = arith.constant 1 : index
    %c0_218 = arith.constant 0 : index
    %c0_219 = arith.constant 0 : index
    %c0_220 = arith.constant 0 : index
    %305 = vector.load %arg8[%c1_217, %c0_218, %c0_219, %c0_220] : memref<2x4x1x8xf32, #tpu.memory_space<vmem>>, vector<1x1x1x8xf32>
    %306 = vector.shape_cast %305 : vector<1x1x1x8xf32> to vector<1x8xf32>
    %307 = arith.truncf %294 : vector<8x32xf32> to vector<8x32xbf16>
    %cst_221 = arith.constant dense<0.000000e+00> : vector<8x8xf32>
    %308 = tpu.matmul %307, %304, %cst_221 {dimension_numbers = #tpu.dot_dimension_numbers<[1], [0], [0], [1], [0, 0, 1, 1], [], []>} : vector<8x32xbf16>, vector<32x8xbf16>, vector<8x8xf32> -> vector<8x8xf32>
    %309 = vector.broadcast %306 : vector<1x8xf32> to vector<8x8xf32>
    %310 = arith.addf %308, %309 : vector<8x8xf32>
    %c1_222 = arith.constant 1 : index
    %c0_223 = arith.constant 0 : index
    %c0_224 = arith.constant 0 : index
    %c0_225 = arith.constant 0 : index
    %311 = vector.load %arg9[%c1_222, %c0_223, %c0_224, %c0_225] : memref<2x4x32x8xbf16, #tpu.memory_space<vmem>>, vector<1x1x32x8xbf16>
    %312 = vector.shape_cast %311 : vector<1x1x32x8xbf16> to vector<32x8xbf16>
    %c1_226 = arith.constant 1 : index
    %c0_227 = arith.constant 0 : index
    %c0_228 = arith.constant 0 : index
    %c0_229 = arith.constant 0 : index
    %313 = vector.load %arg10[%c1_226, %c0_227, %c0_228, %c0_229] : memref<2x4x1x8xf32, #tpu.memory_space<vmem>>, vector<1x1x1x8xf32>
    %314 = vector.shape_cast %313 : vector<1x1x1x8xf32> to vector<1x8xf32>
    %315 = arith.truncf %294 : vector<8x32xf32> to vector<8x32xbf16>
    %cst_230 = arith.constant dense<0.000000e+00> : vector<8x8xf32>
    %316 = tpu.matmul %315, %312, %cst_230 {dimension_numbers = #tpu.dot_dimension_numbers<[1], [0], [0], [1], [0, 0, 1, 1], [], []>} : vector<8x32xbf16>, vector<32x8xbf16>, vector<8x8xf32> -> vector<8x8xf32>
    %317 = vector.broadcast %314 : vector<1x8xf32> to vector<8x8xf32>
    %318 = arith.addf %316, %317 : vector<8x8xf32>
    "tpu.trace_start"() <{level = 10 : i32, message = "qd,kd->qk"}> : () -> ()
    %cst_231 = arith.constant dense<0.000000e+00> : vector<8x8xf32>
    %319 = tpu.matmul %302, %310, %cst_231 {dimension_numbers = #tpu.dot_dimension_numbers<[1], [1], [0], [0], [0, 0, 1, 0], [], []>} : vector<8x8xf32>, vector<8x8xf32>, vector<8x8xf32> -> vector<8x8xf32>
    "tpu.trace_stop"() : () -> ()
    %cst_232 = arith.constant 0.353553385 : f32
    %320 = vector.broadcast %cst_232 : f32 to vector<8x8xf32>
    %321 = arith.mulf %319, %320 : vector<8x8xf32>
    %322 = vector.broadcast %32 : vector<1x8xf32> to vector<8x8xf32>
    %323 = arith.addf %321, %322 : vector<8x8xf32>
    %cst_233 = arith.constant dense<0xFF800000> : vector<8xf32>
    %324 = vector.multi_reduction <maximumf>, %323, %cst_233 [1] : vector<8x8xf32> to vector<8xf32>
    %325 = vector.shape_cast %324 : vector<8xf32> to vector<8x1xf32>
    %326 = vector.broadcast %325 : vector<8x1xf32> to vector<8x8xf32>
    %327 = arith.subf %323, %326 : vector<8x8xf32>
    %328 = math.exp %327 : vector<8x8xf32>
    %cst_234 = arith.constant dense<0.000000e+00> : vector<8xf32>
    %329 = vector.multi_reduction <add>, %328, %cst_234 [1] : vector<8x8xf32> to vector<8xf32>
    %330 = vector.shape_cast %329 : vector<8xf32> to vector<8x1xf32>
    %331 = vector.broadcast %330 : vector<8x1xf32> to vector<8x8xf32>
    %332 = arith.divf %328, %331 : vector<8x8xf32>
    %cst_235 = arith.constant dense<0.000000e+00> : vector<8x8xf32>
    %333 = tpu.matmul %332, %318, %cst_235 {dimension_numbers = #tpu.dot_dimension_numbers<[1], [0], [0], [1], [0, 0, 1, 1], [], []>} : vector<8x8xf32>, vector<8x8xf32>, vector<8x8xf32> -> vector<8x8xf32>
    %334 = arith.truncf %333 : vector<8x8xf32> to vector<8x8xbf16>
    %c1_236 = arith.constant 1 : index
    %c0_237 = arith.constant 0 : index
    %c0_238 = arith.constant 0 : index
    %c0_239 = arith.constant 0 : index
    %335 = vector.load %arg11[%c1_236, %c0_237, %c0_238, %c0_239] : memref<2x4x8x32xbf16, #tpu.memory_space<vmem>>, vector<1x1x8x32xbf16>
    %336 = vector.shape_cast %335 : vector<1x1x8x32xbf16> to vector<8x32xbf16>
    %cst_240 = arith.constant dense<0.000000e+00> : vector<8x32xf32>
    %337 = tpu.matmul %334, %336, %cst_240 {dimension_numbers = #tpu.dot_dimension_numbers<[1], [0], [0], [1], [0, 0, 1, 1], [], []>} : vector<8x8xbf16>, vector<8x32xbf16>, vector<8x32xf32> -> vector<8x32xf32>
    %c1_241 = arith.constant 1 : index
    %c1_242 = arith.constant 1 : index
    %c0_243 = arith.constant 0 : index
    %c0_244 = arith.constant 0 : index
    %338 = vector.load %arg5[%c1_241, %c1_242, %c0_243, %c0_244] : memref<2x4x32x8xbf16, #tpu.memory_space<vmem>>, vector<1x1x32x8xbf16>
    %339 = vector.shape_cast %338 : vector<1x1x32x8xbf16> to vector<32x8xbf16>
    %c1_245 = arith.constant 1 : index
    %c1_246 = arith.constant 1 : index
    %c0_247 = arith.constant 0 : index
    %c0_248 = arith.constant 0 : index
    %340 = vector.load %arg6[%c1_245, %c1_246, %c0_247, %c0_248] : memref<2x4x1x8xf32, #tpu.memory_space<vmem>>, vector<1x1x1x8xf32>
    %341 = vector.shape_cast %340 : vector<1x1x1x8xf32> to vector<1x8xf32>
    %342 = arith.truncf %294 : vector<8x32xf32> to vector<8x32xbf16>
    %cst_249 = arith.constant dense<0.000000e+00> : vector<8x8xf32>
    %343 = tpu.matmul %342, %339, %cst_249 {dimension_numbers = #tpu.dot_dimension_numbers<[1], [0], [0], [1], [0, 0, 1, 1], [], []>} : vector<8x32xbf16>, vector<32x8xbf16>, vector<8x8xf32> -> vector<8x8xf32>
    %344 = vector.broadcast %341 : vector<1x8xf32> to vector<8x8xf32>
    %345 = arith.addf %343, %344 : vector<8x8xf32>
    %c1_250 = arith.constant 1 : index
    %c1_251 = arith.constant 1 : index
    %c0_252 = arith.constant 0 : index
    %c0_253 = arith.constant 0 : index
    %346 = vector.load %arg7[%c1_250, %c1_251, %c0_252, %c0_253] : memref<2x4x32x8xbf16, #tpu.memory_space<vmem>>, vector<1x1x32x8xbf16>
    %347 = vector.shape_cast %346 : vector<1x1x32x8xbf16> to vector<32x8xbf16>
    %c1_254 = arith.constant 1 : index
    %c1_255 = arith.constant 1 : index
    %c0_256 = arith.constant 0 : index
    %c0_257 = arith.constant 0 : index
    %348 = vector.load %arg8[%c1_254, %c1_255, %c0_256, %c0_257] : memref<2x4x1x8xf32, #tpu.memory_space<vmem>>, vector<1x1x1x8xf32>
    %349 = vector.shape_cast %348 : vector<1x1x1x8xf32> to vector<1x8xf32>
    %350 = arith.truncf %294 : vector<8x32xf32> to vector<8x32xbf16>
    %cst_258 = arith.constant dense<0.000000e+00> : vector<8x8xf32>
    %351 = tpu.matmul %350, %347, %cst_258 {dimension_numbers = #tpu.dot_dimension_numbers<[1], [0], [0], [1], [0, 0, 1, 1], [], []>} : vector<8x32xbf16>, vector<32x8xbf16>, vector<8x8xf32> -> vector<8x8xf32>
    %352 = vector.broadcast %349 : vector<1x8xf32> to vector<8x8xf32>
    %353 = arith.addf %351, %352 : vector<8x8xf32>
    %c1_259 = arith.constant 1 : index
    %c1_260 = arith.constant 1 : index
    %c0_261 = arith.constant 0 : index
    %c0_262 = arith.constant 0 : index
    %354 = vector.load %arg9[%c1_259, %c1_260, %c0_261, %c0_262] : memref<2x4x32x8xbf16, #tpu.memory_space<vmem>>, vector<1x1x32x8xbf16>
    %355 = vector.shape_cast %354 : vector<1x1x32x8xbf16> to vector<32x8xbf16>
    %c1_263 = arith.constant 1 : index
    %c1_264 = arith.constant 1 : index
    %c0_265 = arith.constant 0 : index
    %c0_266 = arith.constant 0 : index
    %356 = vector.load %arg10[%c1_263, %c1_264, %c0_265, %c0_266] : memref<2x4x1x8xf32, #tpu.memory_space<vmem>>, vector<1x1x1x8xf32>
    %357 = vector.shape_cast %356 : vector<1x1x1x8xf32> to vector<1x8xf32>
    %358 = arith.truncf %294 : vector<8x32xf32> to vector<8x32xbf16>
    %cst_267 = arith.constant dense<0.000000e+00> : vector<8x8xf32>
    %359 = tpu.matmul %358, %355, %cst_267 {dimension_numbers = #tpu.dot_dimension_numbers<[1], [0], [0], [1], [0, 0, 1, 1], [], []>} : vector<8x32xbf16>, vector<32x8xbf16>, vector<8x8xf32> -> vector<8x8xf32>
    %360 = vector.broadcast %357 : vector<1x8xf32> to vector<8x8xf32>
    %361 = arith.addf %359, %360 : vector<8x8xf32>
    "tpu.trace_start"() <{level = 10 : i32, message = "qd,kd->qk"}> : () -> ()
    %cst_268 = arith.constant dense<0.000000e+00> : vector<8x8xf32>
    %362 = tpu.matmul %345, %353, %cst_268 {dimension_numbers = #tpu.dot_dimension_numbers<[1], [1], [0], [0], [0, 0, 1, 0], [], []>} : vector<8x8xf32>, vector<8x8xf32>, vector<8x8xf32> -> vector<8x8xf32>
    "tpu.trace_stop"() : () -> ()
    %cst_269 = arith.constant 0.353553385 : f32
    %363 = vector.broadcast %cst_269 : f32 to vector<8x8xf32>
    %364 = arith.mulf %362, %363 : vector<8x8xf32>
    %365 = vector.broadcast %32 : vector<1x8xf32> to vector<8x8xf32>
    %366 = arith.addf %364, %365 : vector<8x8xf32>
    %cst_270 = arith.constant dense<0xFF800000> : vector<8xf32>
    %367 = vector.multi_reduction <maximumf>, %366, %cst_270 [1] : vector<8x8xf32> to vector<8xf32>
    %368 = vector.shape_cast %367 : vector<8xf32> to vector<8x1xf32>
    %369 = vector.broadcast %368 : vector<8x1xf32> to vector<8x8xf32>
    %370 = arith.subf %366, %369 : vector<8x8xf32>
    %371 = math.exp %370 : vector<8x8xf32>
    %cst_271 = arith.constant dense<0.000000e+00> : vector<8xf32>
    %372 = vector.multi_reduction <add>, %371, %cst_271 [1] : vector<8x8xf32> to vector<8xf32>
    %373 = vector.shape_cast %372 : vector<8xf32> to vector<8x1xf32>
    %374 = vector.broadcast %373 : vector<8x1xf32> to vector<8x8xf32>
    %375 = arith.divf %371, %374 : vector<8x8xf32>
    %cst_272 = arith.constant dense<0.000000e+00> : vector<8x8xf32>
    %376 = tpu.matmul %375, %361, %cst_272 {dimension_numbers = #tpu.dot_dimension_numbers<[1], [0], [0], [1], [0, 0, 1, 1], [], []>} : vector<8x8xf32>, vector<8x8xf32>, vector<8x8xf32> -> vector<8x8xf32>
    %377 = arith.truncf %376 : vector<8x8xf32> to vector<8x8xbf16>
    %c1_273 = arith.constant 1 : index
    %c1_274 = arith.constant 1 : index
    %c0_275 = arith.constant 0 : index
    %c0_276 = arith.constant 0 : index
    %378 = vector.load %arg11[%c1_273, %c1_274, %c0_275, %c0_276] : memref<2x4x8x32xbf16, #tpu.memory_space<vmem>>, vector<1x1x8x32xbf16>
    %379 = vector.shape_cast %378 : vector<1x1x8x32xbf16> to vector<8x32xbf16>
    %cst_277 = arith.constant dense<0.000000e+00> : vector<8x32xf32>
    %380 = tpu.matmul %377, %379, %cst_277 {dimension_numbers = #tpu.dot_dimension_numbers<[1], [0], [0], [1], [0, 0, 1, 1], [], []>} : vector<8x8xbf16>, vector<8x32xbf16>, vector<8x32xf32> -> vector<8x32xf32>
    %381 = arith.addf %337, %380 : vector<8x32xf32>
    %c1_278 = arith.constant 1 : index
    %c2_279 = arith.constant 2 : index
    %c0_280 = arith.constant 0 : index
    %c0_281 = arith.constant 0 : index
    %382 = vector.load %arg5[%c1_278, %c2_279, %c0_280, %c0_281] : memref<2x4x32x8xbf16, #tpu.memory_space<vmem>>, vector<1x1x32x8xbf16>
    %383 = vector.shape_cast %382 : vector<1x1x32x8xbf16> to vector<32x8xbf16>
    %c1_282 = arith.constant 1 : index
    %c2_283 = arith.constant 2 : index
    %c0_284 = arith.constant 0 : index
    %c0_285 = arith.constant 0 : index
    %384 = vector.load %arg6[%c1_282, %c2_283, %c0_284, %c0_285] : memref<2x4x1x8xf32, #tpu.memory_space<vmem>>, vector<1x1x1x8xf32>
    %385 = vector.shape_cast %384 : vector<1x1x1x8xf32> to vector<1x8xf32>
    %386 = arith.truncf %294 : vector<8x32xf32> to vector<8x32xbf16>
    %cst_286 = arith.constant dense<0.000000e+00> : vector<8x8xf32>
    %387 = tpu.matmul %386, %383, %cst_286 {dimension_numbers = #tpu.dot_dimension_numbers<[1], [0], [0], [1], [0, 0, 1, 1], [], []>} : vector<8x32xbf16>, vector<32x8xbf16>, vector<8x8xf32> -> vector<8x8xf32>
    %388 = vector.broadcast %385 : vector<1x8xf32> to vector<8x8xf32>
    %389 = arith.addf %387, %388 : vector<8x8xf32>
    %c1_287 = arith.constant 1 : index
    %c2_288 = arith.constant 2 : index
    %c0_289 = arith.constant 0 : index
    %c0_290 = arith.constant 0 : index
    %390 = vector.load %arg7[%c1_287, %c2_288, %c0_289, %c0_290] : memref<2x4x32x8xbf16, #tpu.memory_space<vmem>>, vector<1x1x32x8xbf16>
    %391 = vector.shape_cast %390 : vector<1x1x32x8xbf16> to vector<32x8xbf16>
    %c1_291 = arith.constant 1 : index
    %c2_292 = arith.constant 2 : index
    %c0_293 = arith.constant 0 : index
    %c0_294 = arith.constant 0 : index
    %392 = vector.load %arg8[%c1_291, %c2_292, %c0_293, %c0_294] : memref<2x4x1x8xf32, #tpu.memory_space<vmem>>, vector<1x1x1x8xf32>
    %393 = vector.shape_cast %392 : vector<1x1x1x8xf32> to vector<1x8xf32>
    %394 = arith.truncf %294 : vector<8x32xf32> to vector<8x32xbf16>
    %cst_295 = arith.constant dense<0.000000e+00> : vector<8x8xf32>
    %395 = tpu.matmul %394, %391, %cst_295 {dimension_numbers = #tpu.dot_dimension_numbers<[1], [0], [0], [1], [0, 0, 1, 1], [], []>} : vector<8x32xbf16>, vector<32x8xbf16>, vector<8x8xf32> -> vector<8x8xf32>
    %396 = vector.broadcast %393 : vector<1x8xf32> to vector<8x8xf32>
    %397 = arith.addf %395, %396 : vector<8x8xf32>
    %c1_296 = arith.constant 1 : index
    %c2_297 = arith.constant 2 : index
    %c0_298 = arith.constant 0 : index
    %c0_299 = arith.constant 0 : index
    %398 = vector.load %arg9[%c1_296, %c2_297, %c0_298, %c0_299] : memref<2x4x32x8xbf16, #tpu.memory_space<vmem>>, vector<1x1x32x8xbf16>
    %399 = vector.shape_cast %398 : vector<1x1x32x8xbf16> to vector<32x8xbf16>
    %c1_300 = arith.constant 1 : index
    %c2_301 = arith.constant 2 : index
    %c0_302 = arith.constant 0 : index
    %c0_303 = arith.constant 0 : index
    %400 = vector.load %arg10[%c1_300, %c2_301, %c0_302, %c0_303] : memref<2x4x1x8xf32, #tpu.memory_space<vmem>>, vector<1x1x1x8xf32>
    %401 = vector.shape_cast %400 : vector<1x1x1x8xf32> to vector<1x8xf32>
    %402 = arith.truncf %294 : vector<8x32xf32> to vector<8x32xbf16>
    %cst_304 = arith.constant dense<0.000000e+00> : vector<8x8xf32>
    %403 = tpu.matmul %402, %399, %cst_304 {dimension_numbers = #tpu.dot_dimension_numbers<[1], [0], [0], [1], [0, 0, 1, 1], [], []>} : vector<8x32xbf16>, vector<32x8xbf16>, vector<8x8xf32> -> vector<8x8xf32>
    %404 = vector.broadcast %401 : vector<1x8xf32> to vector<8x8xf32>
    %405 = arith.addf %403, %404 : vector<8x8xf32>
    "tpu.trace_start"() <{level = 10 : i32, message = "qd,kd->qk"}> : () -> ()
    %cst_305 = arith.constant dense<0.000000e+00> : vector<8x8xf32>
    %406 = tpu.matmul %389, %397, %cst_305 {dimension_numbers = #tpu.dot_dimension_numbers<[1], [1], [0], [0], [0, 0, 1, 0], [], []>} : vector<8x8xf32>, vector<8x8xf32>, vector<8x8xf32> -> vector<8x8xf32>
    "tpu.trace_stop"() : () -> ()
    %cst_306 = arith.constant 0.353553385 : f32
    %407 = vector.broadcast %cst_306 : f32 to vector<8x8xf32>
    %408 = arith.mulf %406, %407 : vector<8x8xf32>
    %409 = vector.broadcast %32 : vector<1x8xf32> to vector<8x8xf32>
    %410 = arith.addf %408, %409 : vector<8x8xf32>
    %cst_307 = arith.constant dense<0xFF800000> : vector<8xf32>
    %411 = vector.multi_reduction <maximumf>, %410, %cst_307 [1] : vector<8x8xf32> to vector<8xf32>
    %412 = vector.shape_cast %411 : vector<8xf32> to vector<8x1xf32>
    %413 = vector.broadcast %412 : vector<8x1xf32> to vector<8x8xf32>
    %414 = arith.subf %410, %413 : vector<8x8xf32>
    %415 = math.exp %414 : vector<8x8xf32>
    %cst_308 = arith.constant dense<0.000000e+00> : vector<8xf32>
    %416 = vector.multi_reduction <add>, %415, %cst_308 [1] : vector<8x8xf32> to vector<8xf32>
    %417 = vector.shape_cast %416 : vector<8xf32> to vector<8x1xf32>
    %418 = vector.broadcast %417 : vector<8x1xf32> to vector<8x8xf32>
    %419 = arith.divf %415, %418 : vector<8x8xf32>
    %cst_309 = arith.constant dense<0.000000e+00> : vector<8x8xf32>
    %420 = tpu.matmul %419, %405, %cst_309 {dimension_numbers = #tpu.dot_dimension_numbers<[1], [0], [0], [1], [0, 0, 1, 1], [], []>} : vector<8x8xf32>, vector<8x8xf32>, vector<8x8xf32> -> vector<8x8xf32>
    %421 = arith.truncf %420 : vector<8x8xf32> to vector<8x8xbf16>
    %c1_310 = arith.constant 1 : index
    %c2_311 = arith.constant 2 : index
    %c0_312 = arith.constant 0 : index
    %c0_313 = arith.constant 0 : index
    %422 = vector.load %arg11[%c1_310, %c2_311, %c0_312, %c0_313] : memref<2x4x8x32xbf16, #tpu.memory_space<vmem>>, vector<1x1x8x32xbf16>
    %423 = vector.shape_cast %422 : vector<1x1x8x32xbf16> to vector<8x32xbf16>
    %cst_314 = arith.constant dense<0.000000e+00> : vector<8x32xf32>
    %424 = tpu.matmul %421, %423, %cst_314 {dimension_numbers = #tpu.dot_dimension_numbers<[1], [0], [0], [1], [0, 0, 1, 1], [], []>} : vector<8x8xbf16>, vector<8x32xbf16>, vector<8x32xf32> -> vector<8x32xf32>
    %425 = arith.addf %381, %424 : vector<8x32xf32>
    %c1_315 = arith.constant 1 : index
    %c3_316 = arith.constant 3 : index
    %c0_317 = arith.constant 0 : index
    %c0_318 = arith.constant 0 : index
    %426 = vector.load %arg5[%c1_315, %c3_316, %c0_317, %c0_318] : memref<2x4x32x8xbf16, #tpu.memory_space<vmem>>, vector<1x1x32x8xbf16>
    %427 = vector.shape_cast %426 : vector<1x1x32x8xbf16> to vector<32x8xbf16>
    %c1_319 = arith.constant 1 : index
    %c3_320 = arith.constant 3 : index
    %c0_321 = arith.constant 0 : index
    %c0_322 = arith.constant 0 : index
    %428 = vector.load %arg6[%c1_319, %c3_320, %c0_321, %c0_322] : memref<2x4x1x8xf32, #tpu.memory_space<vmem>>, vector<1x1x1x8xf32>
    %429 = vector.shape_cast %428 : vector<1x1x1x8xf32> to vector<1x8xf32>
    %430 = arith.truncf %294 : vector<8x32xf32> to vector<8x32xbf16>
    %cst_323 = arith.constant dense<0.000000e+00> : vector<8x8xf32>
    %431 = tpu.matmul %430, %427, %cst_323 {dimension_numbers = #tpu.dot_dimension_numbers<[1], [0], [0], [1], [0, 0, 1, 1], [], []>} : vector<8x32xbf16>, vector<32x8xbf16>, vector<8x8xf32> -> vector<8x8xf32>
    %432 = vector.broadcast %429 : vector<1x8xf32> to vector<8x8xf32>
    %433 = arith.addf %431, %432 : vector<8x8xf32>
    %c1_324 = arith.constant 1 : index
    %c3_325 = arith.constant 3 : index
    %c0_326 = arith.constant 0 : index
    %c0_327 = arith.constant 0 : index
    %434 = vector.load %arg7[%c1_324, %c3_325, %c0_326, %c0_327] : memref<2x4x32x8xbf16, #tpu.memory_space<vmem>>, vector<1x1x32x8xbf16>
    %435 = vector.shape_cast %434 : vector<1x1x32x8xbf16> to vector<32x8xbf16>
    %c1_328 = arith.constant 1 : index
    %c3_329 = arith.constant 3 : index
    %c0_330 = arith.constant 0 : index
    %c0_331 = arith.constant 0 : index
    %436 = vector.load %arg8[%c1_328, %c3_329, %c0_330, %c0_331] : memref<2x4x1x8xf32, #tpu.memory_space<vmem>>, vector<1x1x1x8xf32>
    %437 = vector.shape_cast %436 : vector<1x1x1x8xf32> to vector<1x8xf32>
    %438 = arith.truncf %294 : vector<8x32xf32> to vector<8x32xbf16>
    %cst_332 = arith.constant dense<0.000000e+00> : vector<8x8xf32>
    %439 = tpu.matmul %438, %435, %cst_332 {dimension_numbers = #tpu.dot_dimension_numbers<[1], [0], [0], [1], [0, 0, 1, 1], [], []>} : vector<8x32xbf16>, vector<32x8xbf16>, vector<8x8xf32> -> vector<8x8xf32>
    %440 = vector.broadcast %437 : vector<1x8xf32> to vector<8x8xf32>
    %441 = arith.addf %439, %440 : vector<8x8xf32>
    %c1_333 = arith.constant 1 : index
    %c3_334 = arith.constant 3 : index
    %c0_335 = arith.constant 0 : index
    %c0_336 = arith.constant 0 : index
    %442 = vector.load %arg9[%c1_333, %c3_334, %c0_335, %c0_336] : memref<2x4x32x8xbf16, #tpu.memory_space<vmem>>, vector<1x1x32x8xbf16>
    %443 = vector.shape_cast %442 : vector<1x1x32x8xbf16> to vector<32x8xbf16>
    %c1_337 = arith.constant 1 : index
    %c3_338 = arith.constant 3 : index
    %c0_339 = arith.constant 0 : index
    %c0_340 = arith.constant 0 : index
    %444 = vector.load %arg10[%c1_337, %c3_338, %c0_339, %c0_340] : memref<2x4x1x8xf32, #tpu.memory_space<vmem>>, vector<1x1x1x8xf32>
    %445 = vector.shape_cast %444 : vector<1x1x1x8xf32> to vector<1x8xf32>
    %446 = arith.truncf %294 : vector<8x32xf32> to vector<8x32xbf16>
    %cst_341 = arith.constant dense<0.000000e+00> : vector<8x8xf32>
    %447 = tpu.matmul %446, %443, %cst_341 {dimension_numbers = #tpu.dot_dimension_numbers<[1], [0], [0], [1], [0, 0, 1, 1], [], []>} : vector<8x32xbf16>, vector<32x8xbf16>, vector<8x8xf32> -> vector<8x8xf32>
    %448 = vector.broadcast %445 : vector<1x8xf32> to vector<8x8xf32>
    %449 = arith.addf %447, %448 : vector<8x8xf32>
    "tpu.trace_start"() <{level = 10 : i32, message = "qd,kd->qk"}> : () -> ()
    %cst_342 = arith.constant dense<0.000000e+00> : vector<8x8xf32>
    %450 = tpu.matmul %433, %441, %cst_342 {dimension_numbers = #tpu.dot_dimension_numbers<[1], [1], [0], [0], [0, 0, 1, 0], [], []>} : vector<8x8xf32>, vector<8x8xf32>, vector<8x8xf32> -> vector<8x8xf32>
    "tpu.trace_stop"() : () -> ()
    %cst_343 = arith.constant 0.353553385 : f32
    %451 = vector.broadcast %cst_343 : f32 to vector<8x8xf32>
    %452 = arith.mulf %450, %451 : vector<8x8xf32>
    %453 = vector.broadcast %32 : vector<1x8xf32> to vector<8x8xf32>
    %454 = arith.addf %452, %453 : vector<8x8xf32>
    %cst_344 = arith.constant dense<0xFF800000> : vector<8xf32>
    %455 = vector.multi_reduction <maximumf>, %454, %cst_344 [1] : vector<8x8xf32> to vector<8xf32>
    %456 = vector.shape_cast %455 : vector<8xf32> to vector<8x1xf32>
    %457 = vector.broadcast %456 : vector<8x1xf32> to vector<8x8xf32>
    %458 = arith.subf %454, %457 : vector<8x8xf32>
    %459 = math.exp %458 : vector<8x8xf32>
    %cst_345 = arith.constant dense<0.000000e+00> : vector<8xf32>
    %460 = vector.multi_reduction <add>, %459, %cst_345 [1] : vector<8x8xf32> to vector<8xf32>
    %461 = vector.shape_cast %460 : vector<8xf32> to vector<8x1xf32>
    %462 = vector.broadcast %461 : vector<8x1xf32> to vector<8x8xf32>
    %463 = arith.divf %459, %462 : vector<8x8xf32>
    %cst_346 = arith.constant dense<0.000000e+00> : vector<8x8xf32>
    %464 = tpu.matmul %463, %449, %cst_346 {dimension_numbers = #tpu.dot_dimension_numbers<[1], [0], [0], [1], [0, 0, 1, 1], [], []>} : vector<8x8xf32>, vector<8x8xf32>, vector<8x8xf32> -> vector<8x8xf32>
    %465 = arith.truncf %464 : vector<8x8xf32> to vector<8x8xbf16>
    %c1_347 = arith.constant 1 : index
    %c3_348 = arith.constant 3 : index
    %c0_349 = arith.constant 0 : index
    %c0_350 = arith.constant 0 : index
    %466 = vector.load %arg11[%c1_347, %c3_348, %c0_349, %c0_350] : memref<2x4x8x32xbf16, #tpu.memory_space<vmem>>, vector<1x1x8x32xbf16>
    %467 = vector.shape_cast %466 : vector<1x1x8x32xbf16> to vector<8x32xbf16>
    %cst_351 = arith.constant dense<0.000000e+00> : vector<8x32xf32>
    %468 = tpu.matmul %465, %467, %cst_351 {dimension_numbers = #tpu.dot_dimension_numbers<[1], [0], [0], [1], [0, 0, 1, 1], [], []>} : vector<8x8xbf16>, vector<8x32xbf16>, vector<8x32xf32> -> vector<8x32xf32>
    %469 = arith.addf %425, %468 : vector<8x32xf32>
    %470 = arith.addf %294, %469 : vector<8x32xf32>
    %c1_352 = arith.constant 1 : index
    %c0_353 = arith.constant 0 : index
    %c0_354 = arith.constant 0 : index
    %471 = vector.load %arg12[%c1_352, %c0_353, %c0_354] : memref<2x1x32xf32, #tpu.memory_space<vmem>>, vector<1x1x32xf32>
    %472 = vector.shape_cast %471 : vector<1x1x32xf32> to vector<1x32xf32>
    %473 = vector.broadcast %472 : vector<1x32xf32> to vector<8x32xf32>
    %474 = arith.addf %470, %473 : vector<8x32xf32>
    %c1_355 = arith.constant 1 : index
    %c0_356 = arith.constant 0 : index
    %c0_357 = arith.constant 0 : index
    %475 = vector.load %arg13[%c1_355, %c0_356, %c0_357] : memref<2x1x32xf32, #tpu.memory_space<vmem>>, vector<1x1x32xf32>
    %476 = vector.shape_cast %475 : vector<1x1x32xf32> to vector<1x32xf32>
    %c1_358 = arith.constant 1 : index
    %c0_359 = arith.constant 0 : index
    %c0_360 = arith.constant 0 : index
    %477 = vector.load %arg14[%c1_358, %c0_359, %c0_360] : memref<2x1x32xf32, #tpu.memory_space<vmem>>, vector<1x1x32xf32>
    %478 = vector.shape_cast %477 : vector<1x1x32xf32> to vector<1x32xf32>
    %cst_361 = arith.constant dense<0.000000e+00> : vector<8xf32>
    %479 = vector.multi_reduction <add>, %474, %cst_361 [1] : vector<8x32xf32> to vector<8xf32>
    %480 = vector.shape_cast %479 : vector<8xf32> to vector<8x1xf32>
    %cst_362 = arith.constant 3.200000e+01 : f32
    %481 = vector.broadcast %cst_362 : f32 to vector<8x1xf32>
    %482 = arith.divf %480, %481 : vector<8x1xf32>
    %483 = vector.broadcast %482 : vector<8x1xf32> to vector<8x32xf32>
    %484 = arith.subf %474, %483 : vector<8x32xf32>
    %485 = arith.mulf %484, %484 : vector<8x32xf32>
    %cst_363 = arith.constant dense<0.000000e+00> : vector<8xf32>
    %486 = vector.multi_reduction <add>, %485, %cst_363 [1] : vector<8x32xf32> to vector<8xf32>
    %487 = vector.shape_cast %486 : vector<8xf32> to vector<8x1xf32>
    %cst_364 = arith.constant 3.200000e+01 : f32
    %488 = vector.broadcast %cst_364 : f32 to vector<8x1xf32>
    %489 = arith.divf %487, %488 : vector<8x1xf32>
    %490 = vector.broadcast %482 : vector<8x1xf32> to vector<8x32xf32>
    %491 = arith.subf %474, %490 : vector<8x32xf32>
    %cst_365 = arith.constant 9.99999996E-13 : f32
    %492 = vector.broadcast %cst_365 : f32 to vector<8x1xf32>
    %493 = arith.addf %489, %492 : vector<8x1xf32>
    %494 = math.rsqrt %493 : vector<8x1xf32>
    %495 = vector.broadcast %494 : vector<8x1xf32> to vector<8x32xf32>
    %496 = arith.mulf %491, %495 : vector<8x32xf32>
    %497 = vector.broadcast %476 : vector<1x32xf32> to vector<8x32xf32>
    %498 = arith.mulf %496, %497 : vector<8x32xf32>
    %499 = vector.broadcast %478 : vector<1x32xf32> to vector<8x32xf32>
    %500 = arith.addf %498, %499 : vector<8x32xf32>
    %c1_366 = arith.constant 1 : index
    %c0_367 = arith.constant 0 : index
    %c0_368 = arith.constant 0 : index
    %501 = vector.load %arg15[%c1_366, %c0_367, %c0_368] : memref<2x32x64xbf16, #tpu.memory_space<vmem>>, vector<1x32x64xbf16>
    %502 = vector.shape_cast %501 : vector<1x32x64xbf16> to vector<32x64xbf16>
    %c1_369 = arith.constant 1 : index
    %c0_370 = arith.constant 0 : index
    %c0_371 = arith.constant 0 : index
    %503 = vector.load %arg16[%c1_369, %c0_370, %c0_371] : memref<2x1x64xf32, #tpu.memory_space<vmem>>, vector<1x1x64xf32>
    %504 = vector.shape_cast %503 : vector<1x1x64xf32> to vector<1x64xf32>
    %505 = arith.truncf %500 : vector<8x32xf32> to vector<8x32xbf16>
    %cst_372 = arith.constant dense<0.000000e+00> : vector<8x64xf32>
    %506 = tpu.matmul %505, %502, %cst_372 {dimension_numbers = #tpu.dot_dimension_numbers<[1], [0], [0], [1], [0, 0, 1, 1], [], []>} : vector<8x32xbf16>, vector<32x64xbf16>, vector<8x64xf32> -> vector<8x64xf32>
    %507 = vector.broadcast %504 : vector<1x64xf32> to vector<8x64xf32>
    %508 = arith.addf %506, %507 : vector<8x64xf32>
    %cst_373 = arith.constant 5.000000e-01 : f32
    %509 = vector.broadcast %cst_373 : f32 to vector<8x64xf32>
    %510 = arith.mulf %509, %508 : vector<8x64xf32>
    %cst_374 = arith.constant 4.471500e-02 : f32
    %511 = vector.broadcast %cst_374 : f32 to vector<8x64xf32>
    %512 = arith.mulf %511, %508 : vector<8x64xf32>
    %513 = arith.mulf %512, %508 : vector<8x64xf32>
    %514 = arith.mulf %513, %508 : vector<8x64xf32>
    %515 = arith.addf %508, %514 : vector<8x64xf32>
    %cst_375 = arith.constant 0.797884583 : f32
    %516 = vector.broadcast %cst_375 : f32 to vector<8x64xf32>
    %517 = arith.mulf %516, %515 : vector<8x64xf32>
    %518 = math.tanh %517 : vector<8x64xf32>
    %cst_376 = arith.constant 1.000000e+00 : f32
    %519 = vector.broadcast %cst_376 : f32 to vector<8x64xf32>
    %520 = arith.addf %519, %518 : vector<8x64xf32>
    %521 = arith.mulf %510, %520 : vector<8x64xf32>
    %c1_377 = arith.constant 1 : index
    %c0_378 = arith.constant 0 : index
    %c0_379 = arith.constant 0 : index
    %522 = vector.load %arg17[%c1_377, %c0_378, %c0_379] : memref<2x64x32xbf16, #tpu.memory_space<vmem>>, vector<1x64x32xbf16>
    %523 = vector.shape_cast %522 : vector<1x64x32xbf16> to vector<64x32xbf16>
    %c1_380 = arith.constant 1 : index
    %c0_381 = arith.constant 0 : index
    %c0_382 = arith.constant 0 : index
    %524 = vector.load %arg18[%c1_380, %c0_381, %c0_382] : memref<2x1x32xf32, #tpu.memory_space<vmem>>, vector<1x1x32xf32>
    %525 = vector.shape_cast %524 : vector<1x1x32xf32> to vector<1x32xf32>
    %526 = arith.truncf %521 : vector<8x64xf32> to vector<8x64xbf16>
    %cst_383 = arith.constant dense<0.000000e+00> : vector<8x32xf32>
    %527 = tpu.matmul %526, %523, %cst_383 {dimension_numbers = #tpu.dot_dimension_numbers<[1], [0], [0], [1], [0, 0, 1, 1], [], []>} : vector<8x64xbf16>, vector<64x32xbf16>, vector<8x32xf32> -> vector<8x32xf32>
    %528 = vector.broadcast %525 : vector<1x32xf32> to vector<8x32xf32>
    %529 = arith.addf %527, %528 : vector<8x32xf32>
    %530 = arith.addf %500, %529 : vector<8x32xf32>
    %c1_384 = arith.constant 1 : index
    %c0_385 = arith.constant 0 : index
    %c0_386 = arith.constant 0 : index
    %531 = vector.load %arg19[%c1_384, %c0_385, %c0_386] : memref<2x1x32xf32, #tpu.memory_space<vmem>>, vector<1x1x32xf32>
    %532 = vector.shape_cast %531 : vector<1x1x32xf32> to vector<1x32xf32>
    %c1_387 = arith.constant 1 : index
    %c0_388 = arith.constant 0 : index
    %c0_389 = arith.constant 0 : index
    %533 = vector.load %arg20[%c1_387, %c0_388, %c0_389] : memref<2x1x32xf32, #tpu.memory_space<vmem>>, vector<1x1x32xf32>
    %534 = vector.shape_cast %533 : vector<1x1x32xf32> to vector<1x32xf32>
    %cst_390 = arith.constant dense<0.000000e+00> : vector<8xf32>
    %535 = vector.multi_reduction <add>, %530, %cst_390 [1] : vector<8x32xf32> to vector<8xf32>
    %536 = vector.shape_cast %535 : vector<8xf32> to vector<8x1xf32>
    %cst_391 = arith.constant 3.200000e+01 : f32
    %537 = vector.broadcast %cst_391 : f32 to vector<8x1xf32>
    %538 = arith.divf %536, %537 : vector<8x1xf32>
    %539 = vector.broadcast %538 : vector<8x1xf32> to vector<8x32xf32>
    %540 = arith.subf %530, %539 : vector<8x32xf32>
    %541 = arith.mulf %540, %540 : vector<8x32xf32>
    %cst_392 = arith.constant dense<0.000000e+00> : vector<8xf32>
    %542 = vector.multi_reduction <add>, %541, %cst_392 [1] : vector<8x32xf32> to vector<8xf32>
    %543 = vector.shape_cast %542 : vector<8xf32> to vector<8x1xf32>
    %cst_393 = arith.constant 3.200000e+01 : f32
    %544 = vector.broadcast %cst_393 : f32 to vector<8x1xf32>
    %545 = arith.divf %543, %544 : vector<8x1xf32>
    %546 = vector.broadcast %538 : vector<8x1xf32> to vector<8x32xf32>
    %547 = arith.subf %530, %546 : vector<8x32xf32>
    %cst_394 = arith.constant 9.99999996E-13 : f32
    %548 = vector.broadcast %cst_394 : f32 to vector<8x1xf32>
    %549 = arith.addf %545, %548 : vector<8x1xf32>
    %550 = math.rsqrt %549 : vector<8x1xf32>
    %551 = vector.broadcast %550 : vector<8x1xf32> to vector<8x32xf32>
    %552 = arith.mulf %547, %551 : vector<8x32xf32>
    %553 = vector.broadcast %532 : vector<1x32xf32> to vector<8x32xf32>
    %554 = arith.mulf %552, %553 : vector<8x32xf32>
    %555 = vector.broadcast %534 : vector<1x32xf32> to vector<8x32xf32>
    %556 = arith.addf %554, %555 : vector<8x32xf32>
    %557 = vector.extract_strided_slice %556 {offsets = [0, 0], sizes = [1, 32], strides = [1, 1]} : vector<8x32xf32> to vector<1x32xf32>
    %c0_395 = arith.constant 0 : index
    %c0_396 = arith.constant 0 : index
    %558 = vector.load %arg21[%c0_395, %c0_396] : memref<32x32xbf16, #tpu.memory_space<vmem>>, vector<32x32xbf16>
    %c0_397 = arith.constant 0 : index
    %c0_398 = arith.constant 0 : index
    %559 = vector.load %arg22[%c0_397, %c0_398] : memref<1x32xf32, #tpu.memory_space<vmem>>, vector<1x32xf32>
    %560 = arith.truncf %557 : vector<1x32xf32> to vector<1x32xbf16>
    %cst_399 = arith.constant dense<0.000000e+00> : vector<1x32xf32>
    %561 = tpu.matmul %560, %558, %cst_399 {dimension_numbers = #tpu.dot_dimension_numbers<[1], [0], [0], [1], [0, 0, 1, 1], [], []>} : vector<1x32xbf16>, vector<32x32xbf16>, vector<1x32xf32> -> vector<1x32xf32>
    %562 = arith.addf %561, %559 : vector<1x32xf32>
    %563 = math.tanh %562 : vector<1x32xf32>
    %c0_400 = arith.constant 0 : index
    %c0_401 = arith.constant 0 : index
    %564 = vector.load %arg23[%c0_400, %c0_401] : memref<32x4xbf16, #tpu.memory_space<vmem>>, vector<32x4xbf16>
    %c0_402 = arith.constant 0 : index
    %c0_403 = arith.constant 0 : index
    %565 = vector.load %arg24[%c0_402, %c0_403] : memref<1x4xf32, #tpu.memory_space<vmem>>, vector<1x4xf32>
    %566 = arith.truncf %563 : vector<1x32xf32> to vector<1x32xbf16>
    %cst_404 = arith.constant dense<0.000000e+00> : vector<1x4xf32>
    %567 = tpu.matmul %566, %564, %cst_404 {dimension_numbers = #tpu.dot_dimension_numbers<[1], [0], [0], [1], [0, 0, 1, 1], [], []>} : vector<1x32xbf16>, vector<32x4xbf16>, vector<1x4xf32> -> vector<1x4xf32>
    %568 = arith.addf %567, %565 : vector<1x4xf32>
    %c0_405 = arith.constant 0 : index
    %c0_406 = arith.constant 0 : index
    %c0_407 = arith.constant 0 : index
    %569 = vector.load %arg25[%c0_405, %c0_406, %c0_407] : memref<1x1x4xf32, #tpu.memory_space<vmem>>, vector<1x1x4xf32>
    %570 = vector.shape_cast %569 : vector<1x1x4xf32> to vector<1x4xf32>
    %571 = vector.shape_cast %568 : vector<1x4xf32> to vector<1x1x4xf32>
    tpu.vector_store %arg25[%c0_405, %c0_406, %c0_407], %571 {strides = array<i32>} : memref<1x1x4xf32, #tpu.memory_space<vmem>>, vector<1x1x4xf32>,
    return
  }
  func.func @transform_0(%arg0: i32) -> (i32, i32, i32) {
    %c0_i32 = arith.constant 0 : i32
    %c0_i32_0 = arith.constant 0 : i32
    %c0_i32_1 = arith.constant 0 : i32
    return %arg0, %c0_i32, %c0_i32_0 : i32, i32, i32
  }
  func.func @transform_1(%arg0: i32) -> (i32, i32, i32) {
    %c0_i32 = arith.constant 0 : i32
    %c0_i32_0 = arith.constant 0 : i32
    %c0_i32_1 = arith.constant 0 : i32
    return %arg0, %c0_i32, %c0_i32_0 : i32, i32, i32
  }
  func.func @transform_2(%arg0: i32) -> (i32, i32) {
    %c0_i32 = arith.constant 0 : i32
    %c0_i32_0 = arith.constant 0 : i32
    %c0_i32_1 = arith.constant 0 : i32
    return %c0_i32, %c0_i32_0 : i32, i32
  }
  func.func @transform_3(%arg0: i32) -> (i32, i32) {
    %c0_i32 = arith.constant 0 : i32
    %c0_i32_0 = arith.constant 0 : i32
    %c0_i32_1 = arith.constant 0 : i32
    return %c0_i32, %c0_i32_0 : i32, i32
  }
  func.func @transform_4(%arg0: i32) -> (i32, i32, i32, i32) {
    %c0_i32 = arith.constant 0 : i32
    %c0_i32_0 = arith.constant 0 : i32
    %c0_i32_1 = arith.constant 0 : i32
    %c0_i32_2 = arith.constant 0 : i32
    %c0_i32_3 = arith.constant 0 : i32
    return %c0_i32, %c0_i32_0, %c0_i32_1, %c0_i32_2 : i32, i32, i32, i32
  }
  func.func @transform_5(%arg0: i32) -> (i32, i32, i32, i32) {
    %c0_i32 = arith.constant 0 : i32
    %c0_i32_0 = arith.constant 0 : i32
    %c0_i32_1 = arith.constant 0 : i32
    %c0_i32_2 = arith.constant 0 : i32
    %c0_i32_3 = arith.constant 0 : i32
    return %c0_i32, %c0_i32_0, %c0_i32_1, %c0_i32_2 : i32, i32, i32, i32
  }
  func.func @transform_6(%arg0: i32) -> (i32, i32, i32, i32) {
    %c0_i32 = arith.constant 0 : i32
    %c0_i32_0 = arith.constant 0 : i32
    %c0_i32_1 = arith.constant 0 : i32
    %c0_i32_2 = arith.constant 0 : i32
    %c0_i32_3 = arith.constant 0 : i32
    return %c0_i32, %c0_i32_0, %c0_i32_1, %c0_i32_2 : i32, i32, i32, i32
  }
  func.func @transform_7(%arg0: i32) -> (i32, i32, i32, i32) {
    %c0_i32 = arith.constant 0 : i32
    %c0_i32_0 = arith.constant 0 : i32
    %c0_i32_1 = arith.constant 0 : i32
    %c0_i32_2 = arith.constant 0 : i32
    %c0_i32_3 = arith.constant 0 : i32
    return %c0_i32, %c0_i32_0, %c0_i32_1, %c0_i32_2 : i32, i32, i32, i32
  }
  func.func @transform_8(%arg0: i32) -> (i32, i32, i32, i32) {
    %c0_i32 = arith.constant 0 : i32
    %c0_i32_0 = arith.constant 0 : i32
    %c0_i32_1 = arith.constant 0 : i32
    %c0_i32_2 = arith.constant 0 : i32
    %c0_i32_3 = arith.constant 0 : i32
    return %c0_i32, %c0_i32_0, %c0_i32_1, %c0_i32_2 : i32, i32, i32, i32
  }
  func.func @transform_9(%arg0: i32) -> (i32, i32, i32, i32) {
    %c0_i32 = arith.constant 0 : i32
    %c0_i32_0 = arith.constant 0 : i32
    %c0_i32_1 = arith.constant 0 : i32
    %c0_i32_2 = arith.constant 0 : i32
    %c0_i32_3 = arith.constant 0 : i32
    return %c0_i32, %c0_i32_0, %c0_i32_1, %c0_i32_2 : i32, i32, i32, i32
  }
  func.func @transform_10(%arg0: i32) -> (i32, i32, i32, i32) {
    %c0_i32 = arith.constant 0 : i32
    %c0_i32_0 = arith.constant 0 : i32
    %c0_i32_1 = arith.constant 0 : i32
    %c0_i32_2 = arith.constant 0 : i32
    %c0_i32_3 = arith.constant 0 : i32
    return %c0_i32, %c0_i32_0, %c0_i32_1, %c0_i32_2 : i32, i32, i32, i32
  }
  func.func @transform_11(%arg0: i32) -> (i32, i32, i32) {
    %c0_i32 = arith.constant 0 : i32
    %c0_i32_0 = arith.constant 0 : i32
    %c0_i32_1 = arith.constant 0 : i32
    %c0_i32_2 = arith.constant 0 : i32
    return %c0_i32, %c0_i32_0, %c0_i32_1 : i32, i32, i32
  }
  func.func @transform_12(%arg0: i32) -> (i32, i32, i32) {
    %c0_i32 = arith.constant 0 : i32
    %c0_i32_0 = arith.constant 0 : i32
    %c0_i32_1 = arith.constant 0 : i32
    %c0_i32_2 = arith.constant 0 : i32
    return %c0_i32, %c0_i32_0, %c0_i32_1 : i32, i32, i32
  }
  func.func @transform_13(%arg0: i32) -> (i32, i32, i32) {
    %c0_i32 = arith.constant 0 : i32
    %c0_i32_0 = arith.constant 0 : i32
    %c0_i32_1 = arith.constant 0 : i32
    %c0_i32_2 = arith.constant 0 : i32
    return %c0_i32, %c0_i32_0, %c0_i32_1 : i32, i32, i32
  }
  func.func @transform_14(%arg0: i32) -> (i32, i32, i32) {
    %c0_i32 = arith.constant 0 : i32
    %c0_i32_0 = arith.constant 0 : i32
    %c0_i32_1 = arith.constant 0 : i32
    %c0_i32_2 = arith.constant 0 : i32
    return %c0_i32, %c0_i32_0, %c0_i32_1 : i32, i32, i32
  }
  func.func @transform_15(%arg0: i32) -> (i32, i32, i32) {
    %c0_i32 = arith.constant 0 : i32
    %c0_i32_0 = arith.constant 0 : i32
    %c0_i32_1 = arith.constant 0 : i32
    %c0_i32_2 = arith.constant 0 : i32
    return %c0_i32, %c0_i32_0, %c0_i32_1 : i32, i32, i32
  }
  func.func @transform_16(%arg0: i32) -> (i32, i32, i32) {
    %c0_i32 = arith.constant 0 : i32
    %c0_i32_0 = arith.constant 0 : i32
    %c0_i32_1 = arith.constant 0 : i32
    %c0_i32_2 = arith.constant 0 : i32
    return %c0_i32, %c0_i32_0, %c0_i32_1 : i32, i32, i32
  }
  func.func @transform_17(%arg0: i32) -> (i32, i32, i32) {
    %c0_i32 = arith.constant 0 : i32
    %c0_i32_0 = arith.constant 0 : i32
    %c0_i32_1 = arith.constant 0 : i32
    %c0_i32_2 = arith.constant 0 : i32
    return %c0_i32, %c0_i32_0, %c0_i32_1 : i32, i32, i32
  }
  func.func @transform_18(%arg0: i32) -> (i32, i32, i32) {
    %c0_i32 = arith.constant 0 : i32
    %c0_i32_0 = arith.constant 0 : i32
    %c0_i32_1 = arith.constant 0 : i32
    %c0_i32_2 = arith.constant 0 : i32
    return %c0_i32, %c0_i32_0, %c0_i32_1 : i32, i32, i32
  }
  func.func @transform_19(%arg0: i32) -> (i32, i32, i32) {
    %c0_i32 = arith.constant 0 : i32
    %c0_i32_0 = arith.constant 0 : i32
    %c0_i32_1 = arith.constant 0 : i32
    %c0_i32_2 = arith.constant 0 : i32
    return %c0_i32, %c0_i32_0, %c0_i32_1 : i32, i32, i32
  }
  func.func @transform_20(%arg0: i32) -> (i32, i32) {
    %c0_i32 = arith.constant 0 : i32
    %c0_i32_0 = arith.constant 0 : i32
    %c0_i32_1 = arith.constant 0 : i32
    return %c0_i32, %c0_i32_0 : i32, i32
  }
  func.func @transform_21(%arg0: i32) -> (i32, i32) {
    %c0_i32 = arith.constant 0 : i32
    %c0_i32_0 = arith.constant 0 : i32
    %c0_i32_1 = arith.constant 0 : i32
    return %c0_i32, %c0_i32_0 : i32, i32
  }
  func.func @transform_22(%arg0: i32) -> (i32, i32) {
    %c0_i32 = arith.constant 0 : i32
    %c0_i32_0 = arith.constant 0 : i32
    %c0_i32_1 = arith.constant 0 : i32
    return %c0_i32, %c0_i32_0 : i32, i32
  }
  func.func @transform_23(%arg0: i32) -> (i32, i32) {
    %c0_i32 = arith.constant 0 : i32
    %c0_i32_0 = arith.constant 0 : i32
    %c0_i32_1 = arith.constant 0 : i32
    return %c0_i32, %c0_i32_0 : i32, i32
  }
  func.func @transform_24(%arg0: i32) -> (i32, i32, i32) {
    %c0_i32 = arith.constant 0 : i32
    %c0_i32_0 = arith.constant 0 : i32
    %c0_i32_1 = arith.constant 0 : i32
    return %arg0, %c0_i32, %c0_i32_0 : i32, i32, i32
  }
}

</mosaic_0001>

<bundles_post_ra>
// kernel: forward.1
= control target key start
LH: loop header
LB: loop body
LE: loop exit
PB: predicated region body
PF: predicated region fallthrough
CT: control target
= control target key end

     0   :  { %s6674_s0 = inlined_call_operand.vmem [shape: f32[2,8,32], index: 0, kind: input, shape index: {}]   ;;  %s6675_s1 = inlined_call_operand.vmem [shape: f32[2,1,8], index: 1, kind: input, shape index: {}]   ;;  %s6676_s2 = inlined_call_operand.vmem [shape: f32[1,32], index: 2, kind: input, shape index: {}]   ;;  %s6677_s3 = inlined_call_operand.vmem [shape: f32[1,32], index: 3, kind: input, shape index: {}]   ;;  %s6678_s4 = inlined_call_operand.vmem [shape: bf16[2,4,32,8], index: 4, kind: input, shape index: {}]   ;;  %s6679_s5 = inlined_call_operand.vmem [shape: f32[2,4,1,8], index: 5, kind: input, shape index: {}]   ;;  %s6680_s6 = inlined_call_operand.vmem [shape: bf16[2,4,32,8], index: 6, kind: input, shape index: {}]   ;;  %s6681_s7 = inlined_call_operand.vmem [shape: f32[2,4,1,8], index: 7, kind: input, shape index: {}]   ;;  %s6682_s8 = inlined_call_operand.vmem [shape: bf16[2,4,32,8], index: 8, kind: input, shape index: {}]   ;;  %s6683_s9 = inlined_call_operand.vmem [shape: f32[2,4,1,8], index: 9, kind: input, shape index: {}]   ;;  %s6684_s10 = inlined_call_operand.vmem [shape: bf16[2,4,8,32], index: 10, kind: input, shape index: {}]   ;;  %s6685_s11 = inlined_call_operand.vmem [shape: f32[2,1,32], index: 11, kind: input, shape index: {}]   ;;  %s6686_s12 = inlined_call_operand.vmem [shape: f32[2,1,32], index: 12, kind: input, shape index: {}]   ;;  %s6687_s13 = inlined_call_operand.vmem [shape: f32[2,1,32], index: 13, kind: input, shape index: {}]   ;;  %s6688_s14 = inlined_call_operand.vmem [shape: bf16[2,32,64], index: 14, kind: input, shape index: {}]   ;;  %s6689_s15 = inlined_call_operand.vmem [shape: f32[2,1,64], index: 15, kind: input, shape index: {}]   ;;  %s6690_s16 = inlined_call_operand.vmem [shape: bf16[2,64,32], index: 16, kind: input, shape index: {}]   ;;  %s6691_s17 = inlined_call_operand.vmem [shape: f32[2,1,32], index: 17, kind: input, shape index: {}]   ;;  %s6692_s18 = inlined_call_operand.vmem [shape: f32[2,1,32], index: 18, kind: input, shape index: {}]   ;;  %s6693_s19 = inlined_call_operand.vmem [shape: f32[2,1,32], index: 19, kind: input, shape index: {}]   ;;  %s6694_s20 = inlined_call_operand.vmem [shape: bf16[32,32], index: 20, kind: input, shape index: {}]   ;;  %s6695_s21 = inlined_call_operand.vmem [shape: f32[1,32], index: 21, kind: input, shape index: {}]   ;;  %s6696_s22 = inlined_call_operand.vmem [shape: bf16[32,4], index: 22, kind: input, shape index: {}]   ;;  %s6697_s23 = inlined_call_operand.vmem [shape: f32[1,4], index: 23, kind: input, shape index: {}]   ;;  %s6698_s24 = inlined_call_operand.hbm [shape: f32[2,1,4], index: 24, kind: output, shape index: {}]  }
   0x1   :  { %6713 = sst [smem:[#allocation11_spill]] %s6674_s0 }
   0x2   :  { %6714 = sst [smem:[#allocation12_spill]] %s6675_s1 }
   0x3   :  { %6715 = sst [smem:[#allocation13_spill]] %s6676_s2 }
   0x4   :  { %6716 = sst [smem:[#allocation14_spill]] %s6677_s3 }
   0x5   :  { %6717 = sst [smem:[#allocation15_spill]] %s6678_s4 }
   0x6   :  { %6718 = sst [smem:[#allocation16_spill]] %s6679_s5 }
   0x7   :  { %6719 = sst [smem:[#allocation17_spill]] %s6680_s6 }
   0x8   :  { %6720 = sst [smem:[#allocation18_spill]] %s6681_s7 }
   0x9   :  { %6721 = sst [smem:[#allocation19_spill]] %s6682_s8 }
   0xa   :  { %6722 = sst [smem:[#allocation20_spill]] %s6683_s9 }
   0xb   :  { %6723 = sst [smem:[#allocation21_spill]] %s6698_s24 }
   0xc   :  { %29 = vsyncpa [#allocation3], 0 }
   0xd   :  { %31 = vsyncpa [#allocation3 + $0x1], 0  ;;  %s5879_s5 = smov 0   ;;  %s5881_s26 = smov 0  }
   0xe   :  { %s5883_s27 = smov 0   ;;  %s5885_s28 = smov 0  }
   0xf LB: > { %6724 = sst [smem:[#allocation5_spill]] %s5736_s5  ;;  %s5900_s6 = sadd.s32 4294967295, %s5748_s28   ;;  %s5748_s28 = sphi %s5885_s28, %s6748_s28   ;;  %s5744_s27 = sphi %s5883_s27, %s6753_s27   ;;  %s5740_s26 = sphi %s5881_s26, %s6752_s26   ;;  %s5736_s5 = sphi %s5879_s5, %s6751_s5  }
  0x10   : > { %6725 = sst [smem:[#allocation6_spill]] %s5744_s27  ;;  %s4709_s2 = sadd.s32 4294967294, %s5748_s28  }
  0x11   : > { %6726 = sst [smem:[#allocation7_spill]] %s5748_s28  ;;  %s5904_s29 = sadd.s32 1, %s5748_s28  }
  0x12   : > { %6727 = sst [smem:[#allocation8_spill]] %s5904_s29  ;;  %s558_s0 = sadd.s32 1, %s5744_s27 }
  0x13   : > { %s555_s7 = ssub.s32 %s5748_s28, %s5904_s29  ;;  %p568_p0 = scmp.ne.s32.totalorder %s5744_s27, %s5740_s26 }
  0x14   : > { %p556_p1 = scmp.eq.s32.totalorder %s555_s7, 0  ;;  %p569_p2 = scmp.eq.s32.totalorder %s5900_s6, 1 }
  0x15   : > { %p574_p3 = scmp.ne.s32.totalorder %s5740_s26, %s5736_s5  ;;  %p575_p4 = scmp.eq.s32.totalorder %s4709_s2, 1 }
  0x16   : > { %s5915_s30 = scalar_select %p556_p1, %s5744_s27, %s558_s0  }
  0x17   : > { %p5917_p5 = por %p569_p2, %p568_p0  ;;  %p5921_p6 = por %p575_p4, %p574_p3 }
  0x18   : > { %6728 = sst [smem:[#allocation9_spill]] %s5915_s30  ;;  %p4712_p7 = scmp.ge.s32.totalorder %s5748_s28, 1 }
  0x19   : > { %s6730_s25 = scalar_select %p5921_p6, 1, 0 }
  0x1a   : > { %p672_p8 = scmp.lt.s32.totalorder %s5748_s28, 3 }
  0x1b   : > { %6731 = sst [smem:[#allocation10_spill]] %s6730_s25 }
  0x1c   : > { %p673_p9 = pnand %p4712_p7, %p672_p8 }
  0x1d   : > { %p739_p10 = scmp.lt.s32.totalorder (!%p673_p9), %s5900_s6, 1  ;;  %vm750_vm0 = vcmask (!%p673_p9), 261120   ;;  %s6732_s0 = sld [smem:[#allocation11_spill]] (!%p673_p9)  ;;  %v5750_v9 = vmov (!%p673_p9), 0.0   ;;  %vm5751_vm1 = vmmov (!%p673_p9), 0   ;;  %vm975_vm2 = vcmask (!%p673_p9), 64512  }
  0x1e   : > { %676 = sbr.rel (%p673_p9) target bundleno = 10732 (0x29ec), region = 116  ;;  %s6733_s29 = sld [smem:[#allocation15_spill]] (!%p673_p9)  ;;  %5156 = vmatprep.subr.bf16.mxu0 (!%p673_p9), %v5750_v9  ;;  %5164 = vmatprep.subr.bf16.mxu1 (!%p673_p9), %v5750_v9  ;;  %v1054_v56 = vlaneseq (!%p673_p9)  ;;  %v5752_v60 = vmov (!%p673_p9), -10000.0   ;;  %vm1509_vm4 = vcmask (!%p673_p9), 1043456   ;;  %vm2567_vm5 = vcmask (!%p673_p9), 523264  }
  0x1f   : > { %s6734_s28 = sld [smem:[#allocation17_spill]] (!%p673_p9)  ;;  %5160 = vmatprep.mubr.msk.bf16.mxu0 (!%p673_p9), %vm5751_vm1, %v5750_v9  ;;  %5168 = vmatprep.mubr.msk.bf16.mxu1 (!%p673_p9), %vm5751_vm1, %v5750_v9  ;;  %s6736_s25 = sld [smem:[#allocation13_spill]] (!%p673_p9)  ;;  %vm4630_vm6 = vcmask (!%p673_p9), 24576  }
  0x20   : > { %s6738_s27 = sld [smem:[#allocation19_spill]] (!%p673_p9)  ;;  %s6740_s2 = sld [smem:[#allocation18_spill]] (!%p673_p9)  ;;  %v1055_v58 = vshrl.u32 (!%p673_p9), %v1054_v56, 7 }
  0x21   : > { %s6742_s9 = sld [smem:[#allocation20_spill]] (!%p673_p9)  ;;  %s737_s5 = sand.u32 (!%p673_p9), 1, %s5740_s26  }
  0x22   : > { %v1056_v59 = vsub.s32 (!%p673_p9), 0, %v1055_v58 }
  0x24   : > { %v5574_v7 = vld [vmem:[%s6733_s29] sm:$0xff] (!%p673_p9)   ;;  %v5576_v10 = vld [vmem:[%s6733_s29 + $0x8] sm:$0xff] (!%p673_p9)   ;;  %v5580_v24 = vld [vmem:[%s6733_s29 + $0x10] sm:$0xff] (!%p673_p9)  }
  0x25   : > { %s5929_s8 = scalar_select %p739_p10, %s5900_s6, 1  ;;  %v5575_v8 = vld [vmem:[%s6734_s28] sm:$0xff]   ;;  %5157 = vmatpush3.bf16.msra.mxu0 %v5574_v7  ;;  %v5581_v25 = vld [vmem:[%s6733_s29 + $0x18] sm:$0xff]  }
  0x26   : > { %s6735_s24 = smov %s6734_s28  ;;  %5165 = vmatpush3.bf16.msra.mxu1 %v5575_v8  ;;  %5158 = vmatprep.subr.bf16.mxu0 %v5750_v9  ;;  %v4714_v16 = vld [vmem:[%s6736_s25] ss:$0 sm:$0xff]  ;;  %s6739_s30 = smov %s6738_s27 }
  0x27   : > { %s4713_s4 = sshll.u32 %s5929_s8, 3  ;;  %5166 = vmatprep.subr.bf16.mxu1 %v5750_v9  ;;  %v5577_v11 = vld [vmem:[%s6735_s24 + $0x8] sm:$0xff]   ;;  %v5578_v21 = vld [vmem:[%s6738_s27] sm:$0xff]   ;;  %v5582_v26 = vld [vmem:[%s6739_s30 + $0x10] sm:$0xff]   ;;  %s5753_s25 = smov [#allocation2]  }
  0x28   : > { %s742_s7 = scalar_lea.vmem %s6732_s0, %s4713_s4  ;;  %v5579_v23 = vld [vmem:[%s6739_s30 + $0x8] sm:$0xff]   ;;  %v5583_v27 = vld [vmem:[%s6739_s30 + $0x18] sm:$0xff]   ;;  %v4720_v28 = vld [vmem:[%s6740_s2] ss:$0 sm:$0xff]  ;;  %s6741_s4 = sld [smem:[#allocation16_spill]] }
  0x29   : > { %v747_v0 = vld [vmem:[%s742_s7] sm:$0xff]  ;;  %5159 = vmatpush3.bf16.msra.mxu0 %v5576_v10  ;;  %s6737_s7 = sld [smem:[#allocation14_spill]]  ;;  %s5011_s0 = sshll.u32 %s5900_s6, 4 }
  0x2a   : > { %v751_v1 = vsel %vm750_vm0, %v747_v0, 0.0  ;;  %5167 = vmatpush3.bf16.msra.mxu1 %v5577_v11  ;;  %5172 = vmatprep.subr.bf16.mxu0 %v5750_v9  ;;  %v4724_v40 = vld [vmem:[%s6742_s9] ss:$0 sm:$0xff]  ;;  %v4754_v50 = vld [vmem:[%s6742_s9 + $0x1] ss:$0 sm:$0xff]  ;;  %s4633_s6 = scalar_lea.sflag [#allocation3], %s737_s5 }
  0x2b   : > { %752 = vadd.xlane.f32.xlu0 %v751_v1  ;;  %5180 = vmatprep.subr.mxu1 %v5750_v9  ;;  %v5590_v56 = vld [vmem:[%s6739_s30 + $0x20] sm:$0xff]  }
  0x2e   : > { %v4716_v31 = vld [vmem:[%s6741_s4] ss:$0 sm:$0xff] }
  0x2f   : > { %v4715_v18 = vld [vmem:[%s6737_s7] ss:$0 sm:$0xff]  ;;  %s6743_s7 = sld [smem:[#allocation12_spill]] }
  0x35   : > { %s745_s1 = scalar_lea.vmem %s6743_s7, %s5929_s8  ;;  %s738_s7 = scalar_lea.vmem [#allocation2], %s737_s5 }
  0x36   : > { %v779_v57 = vld [vmem:[%s745_s1] sm:$0x1]  ;;  %s4645_s1 = sshll.u32 %s738_s7, 4  ;;  %s6634_s1 = int_to_ptr.vmem [resolvable:$true] %s4645_s1 }
  0x37   : > { %vm780_vm3 = vcmp.gt.f32.partialorder %v779_v57, 0.5  ;;  %v4778_v57 = vld [vmem:[%s6740_s2 + $0x2] ss:$0 sm:$0xff]  ;;  %s5686_s28 = scalar_lea.vmem %s6634_s1, 16 }
  0x38   : > { %v781_v61 = vsel %vm780_vm3, 0.0, %v5752_v60  ;;  %p5687_p11 = scmp.ne.s32.totalorder %s6634_s1, %s5686_s28 }
  0x39   : > { %v6038_v62 = vrot.slane %v781_v61, %v1056_v59  ;;  %v5591_v59 = vld [vmem:[%s6739_s30 + $0x28] sm:$0xff]  }
  0x3a   : > { %p5688_p12 = pnand %p5687_p11, %p5917_p5 }
  0x3c   : > { %p5689_p13 = pneg %p5688_p12 }
  0xb8   : > { %v753_v2 = vpop.xlane.xlu0 %752 }
  0xb9   : > { %v755_v3 = vmul.f32 0.03125, %v753_v2 }
  0xbb   : > { %v756_v4 = vsub.f32 %v747_v0, %v755_v3 }
  0xbd   : > { %v757_v5 = vmul.f32 %v756_v4, %v756_v4 }
  0xbf   : > { %v758_v6 = vsel %vm750_vm0, %v757_v5, 0.0 }
  0xc0   : > { %759 = vadd.xlane.f32.xlu0 %v758_v6 }
 0x14d   : > { %v760_v12 = vpop.xlane.xlu0 %759 }
 0x14e   : > { %v761_v13 = vmul.f32 0.03125, %v760_v12  ;;  %v5584_v12 = vld [vmem:[%s6735_s24 + $0x10] sm:$0xff]  }
 0x150   : > { %v762_v14 = vadd.f32 1e-12, %v761_v13 }
 0x152   : > { %5638 = vrsqrt.f32 %v762_v14  ;;  %v5585_v14 = vld [vmem:[%s6735_s24 + $0x18] sm:$0xff]  }
 0x15c   : > { %v5639_v15 = vpop.eup %5638 }
 0x15d   : > { %v764_v17 = vmul.f32 %v5639_v15, %v756_v4 }
 0x15f   : > { %v771_v19 = vmul.f32 %v4714_v16, %v764_v17  ;;  %v4745_v17 = vld [vmem:[%s6740_s2 + $0x1] ss:$0 sm:$0xff] }
 0x161   : > { %v5965_v20 = vadd.f32 %v4715_v18, %v771_v19  ;;  %v4736_v19 = vld [vmem:[%s6741_s4 + $0x1] ss:$0 sm:$0xff] }
 0x163   : > { %v5972_v22 = vpack.c.bf16 %v5965_v20, %v5965_v20 }
 0x165   : > { %5161 = vmatmul.mubr.msk.bf16.vlgmr.msra.gmra.mrb[0].mxu0 %vm750_vm0, %v5972_v22  ;;  %5169 = vmatmul.mubr.msk.bf16.vlgmr.msra.gmra.mrb[0].mxu1 %vm750_vm0, %v5972_v22 }
 0x166   : > { %5173 = vmatpush3.bf16.msra.mxu0 %v5578_v21  ;;  %5176 = vmatprep.mubr.msk.bf16.mxu0 %vm5751_vm1, %v5750_v9 }
 0x167   : > { %5174 = vmatprep.subr.bf16.mxu0 %v5750_v9  ;;  %5182 = vmatprep.mubr.msk.f32.mxu1 %vm5751_vm1, %v5750_v9 }
 0x16a   : > { %5175 = vmatpush3.bf16.msra.mxu0 %v5579_v23 }
 0x16b   : > { %5190 = vmatprep.subr.bf16.mxu0 %v5750_v9 }
 0x16d   : > { %5177 = vmatmul.mubr.msk.bf16.vlgmr.msra.gmra.mrb[4].mxu0 %vm750_vm0, %v5972_v22 }
 0x16e   : > { %5191 = vmatpush3.bf16.msra.mxu0 %v5580_v24  ;;  %5194 = vmatprep.mubr.msk.bf16.mxu0 %vm5751_vm1, %v5750_v9 }
 0x16f   : > { %5192 = vmatprep.subr.bf16.mxu0 %v5750_v9 }
 0x172   : > { %5193 = vmatpush3.bf16.msra.mxu0 %v5581_v25 }
 0x173   : > { %5206 = vmatprep.subr.bf16.mxu0 %v5750_v9 }
 0x175   : > { %5195 = vmatmul.mubr.msk.bf16.vlgmr.msra.gmra.mrb[8].mxu0 %vm750_vm0, %v5972_v22 }
 0x176   : > { %5207 = vmatpush3.bf16.msra.mxu0 %v5582_v26  ;;  %5210 = vmatprep.mubr.msk.bf16.mxu0 %vm5751_vm1, %v5750_v9 }
 0x177   : > { %5208 = vmatprep.subr.bf16.mxu0 %v5750_v9 }
 0x17a   : > { %5209 = vmatpush3.bf16.msra.mxu0 %v5583_v27 }
 0x17b   : > { %5219 = vmatprep.subr.mxu0 %v5750_v9 }
 0x17d   : > { %5211 = vmatmul.mubr.msk.bf16.vlgmr.msra.gmra.mrb[12].mxu0 %vm750_vm0, %v5972_v22 }
 0x17e   : > { %5221 = vmatprep.mubr.msk.f32.mxu0 %vm5751_vm1, %v5750_v9 }
 0x238   : > { %v843_v29 = vpop.f32.mrb[0].mxu0  ;;  %v906_v30 = vpop.f32.mrb[0].mxu1 }
 0x239   : > { %v907_v32 = vadd.f32 %v4720_v28, %v906_v30  ;;  %v5162_v33 = vpop.f32.mrb[1].mxu0  ;;  %v5170_v34 = vpop.f32.mrb[1].mxu1  ;;  %v844_v39 = vadd.f32 %v4716_v31, %v843_v29 }
 0x23a   : > { %v846_v35 = vpop.f32.mrb[2].mxu0  ;;  %v909_v36 = vpop.f32.mrb[2].mxu1 }
 0x23b   : > { %v5163_v37 = vpop.f32.mrb[3].mxu0  ;;  %v5171_v38 = vpop.f32.mrb[3].mxu1  ;;  %5181 = vmatpush3.xpose.msk.msra.mxu1 %vm975_vm2, %v907_v32 }
 0x23c   : > { %5185 = vmatprep.subr.mxu1 %v5750_v9  ;;  %v1145_v38 = vld [vmem:[%s6684_s10] sm:$0xf] }
 0x23e   : > { %5183 = vmatmul.mubr.msk.f32.vlgmr.msra.gmra.mrb[4].mxu1 %vm975_vm2, %v844_v39 }
 0x23f   : > { %5187 = vmatprep.mubr.msk.f32.mxu1 %vm5751_vm1, %v5750_v9 }
 0x240   : > { %v969_v41 = vpop.f32.mrb[4].mxu0 }
 0x241   : > { %v970_v42 = vadd.f32 %v4724_v40, %v969_v41  ;;  %v5178_v43 = vpop.f32.mrb[5].mxu0  ;;  %v1557_v41 = vsel %vm1509_vm4, %v1145_v38, 0  ;;  %v4794_v38 = vld [vmem:[%s6684_s10 + $0x8] sm:$0xf] }
 0x242   : > { %v972_v44 = vpop.f32.mrb[6].mxu0 }
 0x243   : > { %v5179_v45 = vpop.f32.mrb[7].mxu0  ;;  %5186 = vmatpush3.msra.mxu1 %v970_v42  ;;  %v5586_v42 = vld [vmem:[%s6735_s24 + $0x20] sm:$0xff]   ;;  %v5587_v44 = vld [vmem:[%s6735_s24 + $0x28] sm:$0xff]  }
 0x244   : > { %5198 = vmatprep.subr.bf16.mxu1 %v5750_v9  ;;  %v4761_v45 = vld [vmem:[%s6684_s10 + $0x4] sm:$0xf] }
 0x248   : > { %v1205_v46 = vpop.f32.mrb[8].mxu0 }
 0x249   : > { %v5196_v47 = vpop.f32.mrb[9].mxu0  ;;  %v1206_v26 = vadd.f32 %v4736_v19, %v1205_v46  ;;  %v1511_v46 = vsel %vm1509_vm4, %v4761_v45, 0 }
 0x24a   : > { %v1208_v48 = vpop.f32.mrb[10].mxu0 }
 0x24b   : > { %v5197_v49 = vpop.f32.mrb[11].mxu0  ;;  %v5588_v48 = vld [vmem:[%s6733_s29 + $0x20] sm:$0xff]  }
 0x250   : > { %v1335_v51 = vpop.f32.mrb[12].mxu0 }
 0x251   : > { %v1336_v52 = vadd.f32 %v4754_v50, %v1335_v51  ;;  %v5212_v53 = vpop.f32.mrb[13].mxu0 }
 0x252   : > { %v1338_v54 = vpop.f32.mrb[14].mxu0 }
 0x253   : > { %v5213_v55 = vpop.f32.mrb[15].mxu0  ;;  %5220 = vmatpush3.msra.mxu0 %v1336_v52  ;;  %v5589_v52 = vld [vmem:[%s6733_s29 + $0x28] sm:$0xff]  }
 0x254   : > { %5230 = vmatprep.subr.bf16.mxu0 %v5750_v9 }
 0x311   : > { %v1048_v63 = vpop.f32.mrb[4].mxu1 }
 0x312   : > { %v1052_v0 = vmul.f32 0.35355338, %v1048_v63  ;;  %v5184_v1 = vpop.f32.mrb[5].mxu1 }
 0x314   : > { %v1059_v2 = vadd.f32 %v6038_v62, %v1052_v0 }
 0x316   : > { %v1060_v3 = vsel %vm975_vm2, %v1059_v2, -inf }
 0x317   : > { %1061 = vmax.xlane.f32.xlu1 %v1060_v3 }
 0x3a4   : > { %v1062_v4 = vpop.xlane.xlu1 %1061 }
 0x3a5   : > { %v1063_v5 = vsub.f32 %v1059_v2, %v1062_v4 }
 0x3a7   : > { %v1064_v6 = vmul.f32 1.442695, %v1063_v5 }
 0x3a9   : > { %5640 = vpow2.f32 %v1064_v6  ;;  %v4769_v6 = vld [vmem:[%s6741_s4 + $0x2] ss:$0 sm:$0xff] }
 0x3b3   : > { %v5641_v7 = vpop.eup %5640 }
 0x3b4   : > { %v1066_v8 = vsel %vm975_vm2, %v5641_v7, 0.0 }
 0x3b5   : > { %1067 = vadd.xlane.f32.xlu1 %v1066_v8 }
 0x442   : > { %v1068_v10 = vpop.xlane.xlu1 %1067 }
 0x443   : > { %5642 = vrcp.f32 %v1068_v10 }
 0x44d   : > { %v5643_v11 = vpop.eup %5642 }
 0x44e   : > { %v1070_v13 = vmul.f32 %v5643_v11, %v5641_v7 }
 0x450   : > { %5188 = vmatmul.mubr.msk.f32.vlgmr.msra.gmra.mrb[6].mxu1 %vm975_vm2, %v1070_v13  ;;  %v4787_v13 = vld [vmem:[%s6742_s9 + $0x2] ss:$0 sm:$0xff] }
 0x451   : > { %5199 = vmatpush3.bf16.msra.mxu1 %v5584_v12  ;;  %5202 = vmatprep.mubr.msk.bf16.mxu1 %vm5751_vm1, %v5750_v9 }
 0x452   : > { %5200 = vmatprep.subr.bf16.mxu1 %v5750_v9 }
 0x455   : > { %5201 = vmatpush3.bf16.msra.mxu1 %v5585_v14 }
 0x456   : > { %5214 = vmatprep.subr.mxu1 %v5750_v9 }
 0x458   : > { %5203 = vmatmul.mubr.msk.bf16.vlgmr.msra.gmra.mrb[8].mxu1 %vm750_vm0, %v5972_v22 }
 0x459   : > { %5216 = vmatprep.mubr.msk.f32.mxu1 %vm5751_vm1, %v5750_v9 }
 0x523   : > { %v1140_v15 = vpop.f32.mrb[6].mxu1 }
 0x524   : > { %v5189_v16 = vpop.f32.mrb[7].mxu1  ;;  %v1144_v43 = vpack.c.bf16 %v1140_v15, %v1140_v15 }
 0x52b   : > { %v1270_v18 = vpop.f32.mrb[8].mxu1 }
 0x52c   : > { %v1271_v21 = vadd.f32 %v4745_v17, %v1270_v18  ;;  %v5204_v23 = vpop.f32.mrb[9].mxu1 }
 0x52d   : > { %v1273_v24 = vpop.f32.mrb[10].mxu1 }
 0x52e   : > { %v5205_v25 = vpop.f32.mrb[11].mxu1  ;;  %5215 = vmatpush3.xpose.msk.msra.mxu1 %vm975_vm2, %v1271_v21 }
 0x52f   : > { %5224 = vmatprep.subr.bf16.mxu1 %v5750_v9 }
 0x531   : > { %5217 = vmatmul.mubr.msk.f32.vlgmr.msra.gmra.mrb[12].mxu1 %vm975_vm2, %v1206_v26 }
 0x532   : > { %5226 = vmatprep.mubr.msk.bf16.mxu1 %vm5751_vm1, %v5750_v9  ;;  %5225 = vmatpush3.bf16.msra.mxu1 %v1511_v46 }
 0x533   : > { %5236 = vmatprep.subr.bf16.mxu1 %v5750_v9 }
 0x604   : > { %v1413_v27 = vpop.f32.mrb[12].mxu1 }
 0x605   : > { %v1417_v28 = vmul.f32 0.35355338, %v1413_v27  ;;  %v5218_v29 = vpop.f32.mrb[13].mxu1 }
 0x607   : > { %v1418_v30 = vadd.f32 %v1417_v28, %v6038_v62 }
 0x609   : > { %v1419_v31 = vsel %vm975_vm2, %v1418_v30, -inf }
 0x60a   : > { %1420 = vmax.xlane.f32.xlu0 %v1419_v31 }
 0x697   : > { %v1421_v32 = vpop.xlane.xlu0 %1420 }
 0x698   : > { %v1422_v33 = vsub.f32 %v1418_v30, %v1421_v32 }
 0x69a   : > { %v1423_v34 = vmul.f32 1.442695, %v1422_v33  ;;  %v5592_v33 = vld [vmem:[%s6733_s29 + $0x30] sm:$0xff]  }
 0x69c   : > { %5644 = vpow2.f32 %v1423_v34 }
 0x6a6   : > { %v5645_v35 = vpop.eup %5644 }
 0x6a7   : > { %v1425_v36 = vsel %vm975_vm2, %v5645_v35, 0.0 }
 0x6a8   : > { %1426 = vadd.xlane.f32.xlu1 %v1425_v36  ;;  %v5594_v36 = vld [vmem:[%s6739_s30 + $0x30] sm:$0xff]  }
 0x735   : > { %v1427_v37 = vpop.xlane.xlu1 %1426 }
 0x736   : > { %5646 = vrcp.f32 %v1427_v37  ;;  %v5595_v37 = vld [vmem:[%s6739_s30 + $0x38] sm:$0xff]  }
 0x740   : > { %v5647_v39 = vpop.eup %5646 }
 0x741   : > { %v1429_v40 = vmul.f32 %v5647_v39, %v5645_v35  ;;  %v5593_v35 = vld [vmem:[%s6733_s29 + $0x38] sm:$0xff]   ;;  %v1963_v39 = vsel %vm1509_vm4, %v4794_v38, 0 }
 0x743   : > { %5222 = vmatmul.mubr.msk.f32.vlgmr.msra.gmra.mrb[16].mxu0 %vm975_vm2, %v1429_v40 }
 0x744   : > { %5231 = vmatpush3.bf16.msra.mxu0 %v1557_v41  ;;  %5232 = vmatprep.mubr.msk.bf16.mxu0 %vm5751_vm1, %v5750_v9  ;;  %v5596_v41 = vld [vmem:[%s6735_s24 + $0x30] sm:$0xff]  }
 0x745   : > { %5244 = vmatprep.subr.bf16.mxu0 %v5750_v9 }
 0x747   : > { %5233 = vmatmul.mubr.msk.bf16.vlgmr.msra.gmra.mrb[20].mxu0 %vm975_vm2, %v1144_v43 }
 0x748   : > { %5245 = vmatpush3.bf16.msra.mxu0 %v5586_v42  ;;  %5248 = vmatprep.mubr.msk.bf16.mxu0 %vm5751_vm1, %v5750_v9 }
 0x749   : > { %5246 = vmatprep.subr.bf16.mxu0 %v5750_v9 }
 0x74c   : > { %5247 = vmatpush3.bf16.msra.mxu0 %v5587_v44  ;;  %v5597_v44 = vld [vmem:[%s6735_s24 + $0x38] sm:$0xff]  }
 0x74d   : > { %5260 = vmatprep.subr.mxu0 %v5750_v9 }
 0x74f   : > { %5249 = vmatmul.mubr.msk.bf16.vlgmr.msra.gmra.mrb[24].mxu0 %vm750_vm0, %v5972_v22 }
 0x750   : > { %5262 = vmatprep.mubr.msk.f32.mxu0 %vm5751_vm1, %v5750_v9 }
 0x816   : > { %v1499_v47 = vpop.f32.mrb[16].mxu0 }
 0x817   : > { %v1503_v49 = vpack.c.bf16 %v1499_v47, %v1499_v47  ;;  %v5223_v50 = vpop.f32.mrb[17].mxu0 }
 0x819   : > { %5227 = vmatmul.mubr.msk.bf16.vlgmr.msra.gmra.mrb[16].mxu1 %vm975_vm2, %v1503_v49 }
 0x81a   : > { %v1593_v51 = vpop.f32.mrb[20].mxu0  ;;  %5237 = vmatpush3.bf16.msra.mxu1 %v5588_v48  ;;  %5240 = vmatprep.mubr.msk.bf16.mxu1 %vm5751_vm1, %v5750_v9 }
 0x81b   : > { %v5234_v53 = vpop.f32.mrb[21].mxu0  ;;  %5238 = vmatprep.subr.bf16.mxu1 %v5750_v9 }
 0x81c   : > { %v1596_v54 = vpop.f32.mrb[22].mxu0 }
 0x81d   : > { %v5235_v55 = vpop.f32.mrb[23].mxu0 }
 0x81e   : > { %5239 = vmatpush3.bf16.msra.mxu1 %v5589_v52 }
 0x81f   : > { %5252 = vmatprep.subr.bf16.mxu1 %v5750_v9 }
 0x821   : > { %5241 = vmatmul.mubr.msk.bf16.vlgmr.msra.gmra.mrb[20].mxu1 %vm750_vm0, %v5972_v22 }
 0x822   : > { %v1723_v58 = vpop.f32.mrb[24].mxu0  ;;  %5253 = vmatpush3.bf16.msra.mxu1 %v5590_v56  ;;  %5256 = vmatprep.mubr.msk.bf16.mxu1 %vm5751_vm1, %v5750_v9 }
 0x823   : > { %v1724_v60 = vadd.f32 %v4778_v57, %v1723_v58  ;;  %v5250_v61 = vpop.f32.mrb[25].mxu0  ;;  %5254 = vmatprep.subr.bf16.mxu1 %v5750_v9  ;;  %v4810_v58 = vld [vmem:[%s6740_s2 + $0x3] ss:$0 sm:$0xff] }
 0x824   : > { %v1726_v63 = vpop.f32.mrb[26].mxu0 }
 0x825   : > { %v5251_v0 = vpop.f32.mrb[27].mxu0  ;;  %5261 = vmatpush3.xpose.msk.msra.mxu0 %vm975_vm2, %v1724_v60  ;;  %v4819_v63 = vld [vmem:[%s6742_s9 + $0x3] ss:$0 sm:$0xff] }
 0x826   : > { %5255 = vmatpush3.bf16.msra.mxu1 %v5591_v59  ;;  %5265 = vmatprep.subr.mxu0 %v5750_v9 }
 0x827   : > { %5270 = vmatprep.subr.bf16.mxu1 %v5750_v9 }
 0x829   : > { %5257 = vmatmul.mubr.msk.bf16.vlgmr.msra.gmra.mrb[24].mxu1 %vm750_vm0, %v5972_v22 }
 0x82a   : > { %5272 = vmatprep.mubr.msk.bf16.mxu1 %vm5751_vm1, %v5750_v9  ;;  %5271 = vmatpush3.bf16.msra.mxu1 %v1963_v39  ;;  %v5598_v39 = vld [vmem:[%s6688_s14] sm:$0xff]  }
 0x82b   : > { %5284 = vmatprep.subr.bf16.mxu1 %v5750_v9 }
 0x8ec   : > { %v1547_v1 = vpop.f32.mrb[16].mxu1 }
 0x8ed   : > { %v6132_v2 = vadd.f32 %v1593_v51, %v1547_v1  ;;  %v5228_v3 = vpop.f32.mrb[17].mxu1 }
 0x8ee   : > { %v1550_v4 = vpop.f32.mrb[18].mxu1 }
 0x8ef   : > { %v5229_v5 = vpop.f32.mrb[19].mxu1 }
 0x8f4   : > { %v1658_v7 = vpop.f32.mrb[20].mxu1 }
 0x8f5   : > { %v1659_v8 = vadd.f32 %v4769_v6, %v1658_v7  ;;  %v5242_v10 = vpop.f32.mrb[21].mxu1 }
 0x8f6   : > { %v1661_v11 = vpop.f32.mrb[22].mxu1 }
 0x8f7   : > { %v5243_v12 = vpop.f32.mrb[23].mxu1  ;;  %5263 = vmatmul.mubr.msk.f32.vlgmr.msra.gmra.mrb[18].mxu0 %vm975_vm2, %v1659_v8 }
 0x8f8   : > { %5267 = vmatprep.mubr.msk.f32.mxu0 %vm5751_vm1, %v5750_v9 }
 0x8fc   : > { %v1788_v14 = vpop.f32.mrb[24].mxu1 }
 0x8fd   : > { %v1789_v15 = vadd.f32 %v4787_v13, %v1788_v14  ;;  %v5258_v16 = vpop.f32.mrb[25].mxu1 }
 0x8fe   : > { %v1791_v17 = vpop.f32.mrb[26].mxu1 }
 0x8ff   : > { %v5259_v18 = vpop.f32.mrb[27].mxu1  ;;  %5266 = vmatpush3.msra.mxu0 %v1789_v15 }
 0x900   : > { %5276 = vmatprep.subr.bf16.mxu0 %v5750_v9  ;;  %v4826_v18 = vld [vmem:[%s6684_s10 + $0xc] sm:$0xf] }
 0x9ca   : > { %v1866_v19 = vpop.f32.mrb[18].mxu0 }
 0x9cb   : > { %v1870_v21 = vmul.f32 0.35355338, %v1866_v19  ;;  %v5264_v23 = vpop.f32.mrb[19].mxu0  ;;  %v2370_v19 = vsel %vm1509_vm4, %v4826_v18, 0 }
 0x9cd   : > { %v1871_v24 = vadd.f32 %v1870_v21, %v6038_v62 }
 0x9cf   : > { %v1872_v25 = vsel %vm975_vm2, %v1871_v24, -inf }
 0x9d0   : > { %1873 = vmax.xlane.f32.xlu0 %v1872_v25 }
 0xa5d   : > { %v1874_v26 = vpop.xlane.xlu0 %1873 }
 0xa5e   : > { %v1875_v27 = vsub.f32 %v1871_v24, %v1874_v26 }
 0xa60   : > { %v1876_v28 = vmul.f32 1.442695, %v1875_v27 }
 0xa62   : > { %5648 = vpow2.f32 %v1876_v28 }
 0xa6c   : > { %v5649_v29 = vpop.eup %5648 }
 0xa6d   : > { %v1878_v30 = vsel %vm975_vm2, %v5649_v29, 0.0 }
 0xa6e   : > { %1879 = vadd.xlane.f32.xlu1 %v1878_v30 }
 0xafb   : > { %v1880_v31 = vpop.xlane.xlu1 %1879 }
 0xafc   : > { %5650 = vrcp.f32 %v1880_v31 }
 0xb06   : > { %v5651_v32 = vpop.eup %5650 }
 0xb07   : > { %v1882_v34 = vmul.f32 %v5651_v32, %v5649_v29  ;;  %v4828_v29 = vld [vmem:[%s6685_s11] ss:$0 sm:$0xff] }
 0xb09   : > { %5268 = vmatmul.mubr.msk.f32.vlgmr.msra.gmra.mrb[28].mxu0 %vm975_vm2, %v1882_v34 }
 0xb0a   : > { %5277 = vmatpush3.bf16.msra.mxu0 %v5592_v33  ;;  %5280 = vmatprep.mubr.msk.bf16.mxu0 %vm5751_vm1, %v5750_v9 }
 0xb0b   : > { %5278 = vmatprep.subr.bf16.mxu0 %v5750_v9 }
 0xb0e   : > { %5279 = vmatpush3.bf16.msra.mxu0 %v5593_v35 }
 0xb0f   : > { %5292 = vmatprep.subr.bf16.mxu0 %v5750_v9 }
 0xb11   : > { %5281 = vmatmul.mubr.msk.bf16.vlgmr.msra.gmra.mrb[32].mxu0 %vm750_vm0, %v5972_v22 }
 0xb12   : > { %5293 = vmatpush3.bf16.msra.mxu0 %v5594_v36  ;;  %5296 = vmatprep.mubr.msk.bf16.mxu0 %vm5751_vm1, %v5750_v9 }
 0xb13   : > { %5294 = vmatprep.subr.bf16.mxu0 %v5750_v9 }
 0xb16   : > { %5295 = vmatpush3.bf16.msra.mxu0 %v5595_v37 }
 0xb17   : > { %5310 = vmatprep.subr.bf16.mxu0 %v5750_v9 }
 0xb19   : > { %5297 = vmatmul.mubr.msk.bf16.vlgmr.msra.gmra.mrb[36].mxu0 %vm750_vm0, %v5972_v22 }
 0xb1a   : > { %5312 = vmatprep.mubr.msk.bf16.mxu0 %vm5751_vm1, %v5750_v9  ;;  %5311 = vmatpush3.bf16.msra.mxu0 %v2370_v19 }
 0xb1b   : > { %5324 = vmatprep.subr.bf16.mxu0 %v5750_v9 }
 0xbdc   : > { %v1952_v40 = vpop.f32.mrb[28].mxu0 }
 0xbdd   : > { %v1956_v42 = vpack.c.bf16 %v1952_v40, %v1952_v40  ;;  %v5269_v43 = vpop.f32.mrb[29].mxu0 }
 0xbdf   : > { %5273 = vmatmul.mubr.msk.bf16.vlgmr.msra.gmra.mrb[28].mxu1 %vm975_vm2, %v1956_v42 }
 0xbe0   : > { %5285 = vmatpush3.bf16.msra.mxu1 %v5596_v41  ;;  %5288 = vmatprep.mubr.msk.bf16.mxu1 %vm5751_vm1, %v5750_v9 }
 0xbe1   : > { %5286 = vmatprep.subr.bf16.mxu1 %v5750_v9 }
 0xbe4   : > { %v2065_v45 = vpop.f32.mrb[32].mxu0  ;;  %5287 = vmatpush3.bf16.msra.mxu1 %v5597_v44  ;;  %v4829_v44 = vld [vmem:[%s6686_s12] ss:$0 sm:$0xff] }
 0xbe5   : > { %v5282_v46 = vpop.f32.mrb[33].mxu0  ;;  %5300 = vmatprep.subr.mxu1 %v5750_v9 }
 0xbe6   : > { %v2068_v47 = vpop.f32.mrb[34].mxu0  ;;  %v4830_v46 = vld [vmem:[%s6687_s13] ss:$0 sm:$0xff] }
 0xbe7   : > { %v5283_v48 = vpop.f32.mrb[35].mxu0  ;;  %5289 = vmatmul.mubr.msk.bf16.vlgmr.msra.gmra.mrb[32].mxu1 %vm750_vm0, %v5972_v22  ;;  %v4801_v22 = vld [vmem:[%s6741_s4 + $0x3] ss:$0 sm:$0xff] }
 0xbe8   : > { %5302 = vmatprep.mubr.msk.f32.mxu1 %vm5751_vm1, %v5750_v9 }
 0xbec   : > { %v2195_v49 = vpop.f32.mrb[36].mxu0 }
 0xbed   : > { %v5298_v50 = vpop.f32.mrb[37].mxu0  ;;  %v2196_v3 = vadd.f32 %v4819_v63, %v2195_v49 }
 0xbee   : > { %v2198_v51 = vpop.f32.mrb[38].mxu0  ;;  %v5600_v50 = vld [vmem:[%s6690_s16] sm:$0xff]  }
 0xbef   : > { %v5299_v52 = vpop.f32.mrb[39].mxu0  ;;  %v5601_v51 = vld [vmem:[%s6690_s16 + $0x8] sm:$0xff]  }
 0xbf0   : > { %v5602_v52 = vld [vmem:[%s6690_s16 + $0x10] sm:$0xff]  }
 0xcb2   : > { %v1999_v53 = vpop.f32.mrb[28].mxu1 }
 0xcb3   : > { %v2005_v54 = vadd.f32 %v1999_v53, %v6132_v2  ;;  %v5274_v55 = vpop.f32.mrb[29].mxu1  ;;  %v2066_v2 = vadd.f32 %v4801_v22, %v2065_v45  ;;  %v5603_v53 = vld [vmem:[%s6690_s16 + $0x18] sm:$0xff]  }
 0xcb4   : > { %v2002_v56 = vpop.f32.mrb[30].mxu1 }
 0xcb5   : > { %v5275_v57 = vpop.f32.mrb[31].mxu1 }
 0xcba   : > { %v2130_v59 = vpop.f32.mrb[32].mxu1 }
 0xcbb   : > { %v2131_v60 = vadd.f32 %v4810_v58, %v2130_v59  ;;  %v5290_v61 = vpop.f32.mrb[33].mxu1 }
 0xcbc   : > { %v2133_v0 = vpop.f32.mrb[34].mxu1 }
 0xcbd   : > { %v5291_v1 = vpop.f32.mrb[35].mxu1  ;;  %5301 = vmatpush3.xpose.msk.msra.mxu1 %vm975_vm2, %v2131_v60 }
 0xcbe   : > { %5305 = vmatprep.subr.mxu1 %v5750_v9 }
 0xcc0   : > { %5303 = vmatmul.mubr.msk.f32.vlgmr.msra.gmra.mrb[14].mxu1 %vm975_vm2, %v2066_v2 }
 0xcc1   : > { %5306 = vmatpush3.msra.mxu1 %v2196_v3  ;;  %5307 = vmatprep.mubr.msk.f32.mxu1 %vm5751_vm1, %v5750_v9 }
 0xcc2   : > { %5316 = vmatprep.subr.bf16.mxu1 %v5750_v9 }
 0xd93   : > { %v2273_v4 = vpop.f32.mrb[14].mxu1 }
 0xd94   : > { %v2277_v5 = vmul.f32 0.35355338, %v2273_v4  ;;  %v5304_v6 = vpop.f32.mrb[15].mxu1 }
 0xd95   : > { %v4835_v6 = vld [vmem:[%s6691_s17] ss:$0 sm:$0xff] }
 0xd96   : > { %v2278_v7 = vadd.f32 %v2277_v5, %v6038_v62 }
 0xd98   : > { %v2279_v8 = vsel %vm975_vm2, %v2278_v7, -inf }
 0xd99   : > { %2280 = vmax.xlane.f32.xlu0 %v2279_v8 }
 0xe26   : > { %v2281_v10 = vpop.xlane.xlu0 %2280 }
 0xe27   : > { %v2282_v11 = vsub.f32 %v2278_v7, %v2281_v10 }
 0xe29   : > { %v2283_v12 = vmul.f32 1.442695, %v2282_v11 }
 0xe2b   : > { %5652 = vpow2.f32 %v2283_v12 }
 0xe35   : > { %v5653_v13 = vpop.eup %5652 }
 0xe36   : > { %v2285_v14 = vsel %vm975_vm2, %v5653_v13, 0.0 }
 0xe37   : > { %2286 = vadd.xlane.f32.xlu1 %v2285_v14 }
 0xec4   : > { %v2287_v15 = vpop.xlane.xlu1 %2286 }
 0xec5   : > { %5654 = vrcp.f32 %v2287_v15 }
 0xecf   : > { %v5655_v16 = vpop.eup %5654 }
 0xed0   : > { %v2289_v17 = vmul.f32 %v5655_v16, %v5653_v13 }
 0xed2   : > { %5308 = vmatmul.mubr.msk.f32.vlgmr.msra.gmra.mrb[36].mxu1 %vm975_vm2, %v2289_v17 }
 0xed3   : > { %5320 = vmatprep.mubr.msk.bf16.mxu1 %vm5751_vm1, %v5750_v9  ;;  %5317 = vmatpush3.bf16.msra.mxu1 %v5598_v39 }
 0xed4   : > { %5318 = vmatprep.subr.bf16.mxu1 %v5750_v9 }
 0xfa5   : > { %v2359_v21 = vpop.f32.mrb[36].mxu1 }
 0xfa6   : > { %v2363_v23 = vpack.c.bf16 %v2359_v21, %v2359_v21  ;;  %v5309_v24 = vpop.f32.mrb[37].mxu1  ;;  %v5604_v21 = vld [vmem:[%s6733_s29 + $0x40] sm:$0xff]  }
 0xfa7   : > { %v5606_v24 = vld [vmem:[%s6733_s29 + $0x48] sm:$0xff]  }
 0xfa8   : > { %5313 = vmatmul.mubr.msk.bf16.vlgmr.msra.gmra.mrb[40].mxu0 %vm975_vm2, %v2363_v23  ;;  %v5605_v23 = vld [vmem:[%s6739_s30 + $0x40] sm:$0xff]  }
 0xfa9   : > { %5332 = vmatprep.mubr.msk.bf16.mxu0 %vm5751_vm1, %v5750_v9  ;;  %5325 = vmatpush3.bf16.msra.mxu0 %v5600_v50 }
 0xfaa   : > { %5326 = vmatprep.subr.bf16.mxu0 %v5750_v9 }
 0xfad   : > { %5327 = vmatpush3.bf16.msra.mxu0 %v5601_v51 }
 0xfae   : > { %5328 = vmatprep.subr.bf16.mxu0 %v5750_v9 }
 0xfb1   : > { %5329 = vmatpush3.bf16.msra.mxu0 %v5602_v52 }
 0xfb2   : > { %5330 = vmatprep.subr.bf16.mxu0 %v5750_v9 }
 0xfb5   : > { %5331 = vmatpush3.bf16.msra.mxu0 %v5603_v53 }
 0xfb6   : > { %5352 = vmatprep.subr.bf16.mxu0 %v5750_v9 }
0x107b   : > { %v2406_v25 = vpop.f32.mrb[40].mxu0 }
0x107c   : > { %v2412_v26 = vadd.f32 %v2406_v25, %v2005_v54  ;;  %v5314_v27 = vpop.f32.mrb[41].mxu0  ;;  %v4831_v54 = vld [vmem:[%s6689_s15] ss:$0 sm:$0xff]  ;;  %v5607_v25 = vld [vmem:[%s6739_s30 + $0x48] sm:$0xff]  }
0x107d   : > { %v2409_v28 = vpop.f32.mrb[42].mxu0 }
0x107e   : > { %v2413_v30 = vadd.f32 %v2412_v26, %v5965_v20  ;;  %v5315_v31 = vpop.f32.mrb[43].mxu0  ;;  %v5599_v20 = vld [vmem:[%s6688_s14 + $0x8] sm:$0xff]  }
0x107f   : > { %5319 = vmatpush3.bf16.msra.mxu1 %v5599_v20 }
0x1080   : > { %v2421_v32 = vadd.f32 %v4828_v29, %v2413_v30  ;;  %5336 = vmatprep.subr.bf16.mxu1 %v5750_v9  ;;  %v4841_v30 = vld [vmem:[%s6692_s18] ss:$0 sm:$0xff] }
0x1082   : > { %v2424_v33 = vsel %vm750_vm0, %v2421_v32, 0.0 }
0x1083   : > { %2425 = vadd.xlane.f32.xlu0 %v2424_v33 }
0x1110   : > { %v2426_v34 = vpop.xlane.xlu0 %2425 }
0x1111   : > { %v2427_v35 = vmul.f32 0.03125, %v2426_v34 }
0x1113   : > { %v2428_v36 = vsub.f32 %v2421_v32, %v2427_v35  ;;  %v4842_v32 = vld [vmem:[%s6693_s19] ss:$0 sm:$0xff] }
0x1114   : > { %v5608_v35 = vld [vmem:[%s6735_s24 + $0x40] sm:$0xff]  }
0x1115   : > { %v2429_v37 = vmul.f32 %v2428_v36, %v2428_v36 }
0x1117   : > { %v2430_v38 = vsel %vm750_vm0, %v2429_v37, 0.0  ;;  %v5609_v37 = vld [vmem:[%s6735_s24 + $0x48] sm:$0xff]  }
0x1118   : > { %2431 = vadd.xlane.f32.xlu1 %v2430_v38  ;;  %v4866_v38 = vld [vmem:[%s6742_s9 + $0x4] ss:$0 sm:$0xff] }
0x11a5   : > { %v2432_v40 = vpop.xlane.xlu1 %2431 }
0x11a6   : > { %v2433_v41 = vmul.f32 0.03125, %v2432_v40 }
0x11a8   : > { %v2434_v42 = vadd.f32 1e-12, %v2433_v41 }
0x11aa   : > { %5656 = vrsqrt.f32 %v2434_v42 }
0x11b4   : > { %v5657_v43 = vpop.eup %5656 }
0x11b5   : > { %v2436_v45 = vmul.f32 %v5657_v43, %v2428_v36 }
0x11b7   : > { %v2443_v47 = vmul.f32 %v4829_v44, %v2436_v45 }
0x11b9   : > { %v2450_v48 = vadd.f32 %v4830_v46, %v2443_v47  ;;  %v4857_v47 = vld [vmem:[%s6740_s2 + $0x4] ss:$0 sm:$0xff] }
0x11bb   : > { %v2456_v49 = vpack.c.bf16 %v2450_v48, %v2450_v48 }
0x11bd   : > { %5321 = vmatmul.mubr.msk.bf16.vlgmr.msra.gmra.mrb[40].mxu1 %vm750_vm0, %v2456_v49  ;;  %v4848_v49 = vld [vmem:[%s6741_s4 + $0x4] ss:$0 sm:$0xff] }
0x11be   : > { %5340 = vmatprep.mubr.msk.bf16.mxu1 %vm5751_vm1, %v5750_v9  ;;  %5337 = vmatpush3.bf16.msra.mxu1 %v5604_v21 }
0x11bf   : > { %5338 = vmatprep.subr.bf16.mxu1 %v5750_v9 }
0x11c2   : > { %5339 = vmatpush3.bf16.msra.mxu1 %v5606_v24 }
0x11c3   : > { %5344 = vmatprep.subr.bf16.mxu1 %v5750_v9 }
0x1290   : > { %v2512_v55 = vpop.f32.mrb[40].mxu1 }
0x1291   : > { %v2513_v56 = vadd.f32 %v4831_v54, %v2512_v55  ;;  %v5322_v57 = vpop.f32.mrb[41].mxu1  ;;  %v5610_v54 = vld [vmem:[%s6733_s29 + $0x50] sm:$0xff]  }
0x1292   : > { %v2515_v58 = vpop.f32.mrb[42].mxu1  ;;  %v5612_v57 = vld [vmem:[%s6739_s30 + $0x50] sm:$0xff]  }
0x1293   : > { %v2519_v59 = vmul.f32 0.044715, %v2513_v56  ;;  %v5323_v22 = vpop.f32.mrb[43].mxu1  ;;  %v2518_v2 = vmul.f32 0.5, %v2513_v56  ;;  %v5613_v58 = vld [vmem:[%s6739_s30 + $0x58] sm:$0xff]  }
0x1295   : > { %v2520_v60 = vmul.f32 %v2519_v59, %v2513_v56 }
0x1297   : > { %v2521_v61 = vmul.f32 %v2520_v60, %v2513_v56 }
0x1299   : > { %v2522_v63 = vadd.f32 %v2521_v61, %v2513_v56  ;;  %v5611_v56 = vld [vmem:[%s6733_s29 + $0x58] sm:$0xff]  }
0x129b   : > { %v2523_v0 = vmul.f32 0.7978846, %v2522_v63 }
0x129d   : > { %5658 = vtanh.f32 %v2523_v0 }
0x12a7   : > { %v5659_v1 = vpop.eup %5658 }
0x12a8   : > { %v2525_v3 = vadd.f32 1.0, %v5659_v1 }
0x12aa   : > { %v2526_v4 = vmul.f32 %v2525_v3, %v2518_v2 }
0x12ac   : > { %v2536_v5 = vpack.c.bf16 %v2526_v4, %v2526_v4 }
0x12ae   : > { %5333 = vmatmul.mubr.msk.bf16.vlgmr.msra.gmra.mrb[44].mxu0 %vm2567_vm5, %v2536_v5 }
0x12af   : > { %5356 = vmatprep.mubr.msk.bf16.mxu0 %vm5751_vm1, %v5750_v9  ;;  %5353 = vmatpush3.bf16.msra.mxu0 %v5605_v23  ;;  %v4888_v23 = vld [vmem:[%s6740_s2 + $0x5] ss:$0 sm:$0xff] }
0x12b0   : > { %5354 = vmatprep.subr.bf16.mxu0 %v5750_v9 }
0x12b3   : > { %5355 = vmatpush3.bf16.msra.mxu0 %v5607_v25  ;;  %v4879_v25 = vld [vmem:[%s6741_s4 + $0x5] ss:$0 sm:$0xff] }
0x12b4   : > { %5365 = vmatprep.subr.mxu0 %v5750_v9 }
0x1381   : > { %v2605_v7 = vpop.f32.mrb[44].mxu0 }
0x1382   : > { %v2606_v8 = vadd.f32 %v4835_v6, %v2605_v7  ;;  %v5334_v10 = vpop.f32.mrb[45].mxu0 }
0x1383   : > { %v2608_v11 = vpop.f32.mrb[46].mxu0 }
0x1384   : > { %v5335_v12 = vpop.f32.mrb[47].mxu0  ;;  %v2611_v13 = vadd.f32 %v2606_v8, %v2450_v48 }
0x1386   : > { %v2614_v14 = vsel %vm750_vm0, %v2611_v13, 0.0 }
0x1387   : > { %2615 = vadd.xlane.f32.xlu0 %v2614_v14 }
0x1414   : > { %v2616_v15 = vpop.xlane.xlu0 %2615 }
0x1415   : > { %v2617_v16 = vmul.f32 0.03125, %v2616_v15 }
0x1417   : > { %v2618_v17 = vsub.f32 %v2611_v13, %v2617_v16  ;;  %v5614_v16 = vld [vmem:[%s6735_s24 + $0x50] sm:$0xff]  }
0x1419   : > { %v2619_v18 = vmul.f32 %v2618_v17, %v2618_v17 }
0x141b   : > { %v2620_v19 = vsel %vm750_vm0, %v2619_v18, 0.0  ;;  %v5615_v18 = vld [vmem:[%s6735_s24 + $0x58] sm:$0xff]  }
0x141c   : > { %2621 = vadd.xlane.f32.xlu1 %v2620_v19 }
0x14a9   : > { %v2622_v26 = vpop.xlane.xlu1 %2621 }
0x14aa   : > { %v2623_v27 = vmul.f32 0.03125, %v2622_v26 }
0x14ac   : > { %v2624_v28 = vadd.f32 1e-12, %v2623_v27 }
0x14ae   : > { %5660 = vrsqrt.f32 %v2624_v28  ;;  %v4897_v28 = vld [vmem:[%s6742_s9 + $0x5] ss:$0 sm:$0xff] }
0x14b8   : > { %v5661_v29 = vpop.eup %5660 }
0x14b9   : > { %v2626_v31 = vmul.f32 %v5661_v29, %v2618_v17 }
0x14bb   : > { %v2633_v33 = vmul.f32 %v4841_v30, %v2626_v31 }
0x14bd   : > { %v6296_v34 = vadd.f32 %v4842_v32, %v2633_v33 }
0x14bf   : > { %v6303_v36 = vpack.c.bf16 %v6296_v34, %v6296_v34 }
0x14c1   : > { %5341 = vmatmul.mubr.msk.bf16.vlgmr.msra.gmra.mrb[44].mxu1 %vm750_vm0, %v6303_v36  ;;  %5357 = vmatmul.mubr.msk.bf16.vlgmr.msra.gmra.mrb[48].mxu0 %vm750_vm0, %v6303_v36 }
0x14c2   : > { %5345 = vmatpush3.bf16.msra.mxu1 %v5608_v35  ;;  %5348 = vmatprep.mubr.msk.bf16.mxu1 %vm5751_vm1, %v5750_v9 }
0x14c3   : > { %5346 = vmatprep.subr.bf16.mxu1 %v5750_v9  ;;  %5367 = vmatprep.mubr.msk.f32.mxu0 %vm5751_vm1, %v5750_v9 }
0x14c6   : > { %5347 = vmatpush3.bf16.msra.mxu1 %v5609_v37 }
0x14c7   : > { %5360 = vmatprep.subr.mxu1 %v5750_v9 }
0x14c9   : > { %5349 = vmatmul.mubr.msk.bf16.vlgmr.msra.gmra.mrb[48].mxu1 %vm750_vm0, %v6303_v36 }
0x14ca   : > { %5362 = vmatprep.mubr.msk.f32.mxu1 %vm5751_vm1, %v5750_v9 }
0x1594   : > { %v2704_v39 = vpop.f32.mrb[44].mxu1  ;;  %v2834_v20 = vpop.f32.mrb[48].mxu0 }
0x1595   : > { %v2835_v40 = vadd.f32 %v4866_v38, %v2834_v20  ;;  %v5342_v41 = vpop.f32.mrb[45].mxu1  ;;  %v5358_v42 = vpop.f32.mrb[49].mxu0  ;;  %v2705_v55 = vadd.f32 %v4848_v49, %v2704_v39  ;;  %v5616_v49 = vld [vmem:[%s6735_s24 + $0x60] sm:$0xff]  }
0x1596   : > { %v2707_v43 = vpop.f32.mrb[46].mxu1  ;;  %v2837_v44 = vpop.f32.mrb[50].mxu0 }
0x1597   : > { %v5343_v45 = vpop.f32.mrb[47].mxu1  ;;  %v5359_v46 = vpop.f32.mrb[51].mxu0  ;;  %5366 = vmatpush3.msra.mxu0 %v2835_v40 }
0x1598   : > { %5378 = vmatprep.subr.bf16.mxu0 %v5750_v9  ;;  %v4873_v45 = vld [vmem:[%s6684_s10 + $0x10] sm:$0xf] }
0x159c   : > { %v2769_v48 = vpop.f32.mrb[48].mxu1 }
0x159d   : > { %v2770_v50 = vadd.f32 %v4857_v47, %v2769_v48  ;;  %v5350_v51 = vpop.f32.mrb[49].mxu1  ;;  %v3415_v48 = vsel %vm1509_vm4, %v4873_v45, 0  ;;  %v4937_v45 = vld [vmem:[%s6684_s10 + $0x18] sm:$0xf] }
0x159e   : > { %v2772_v52 = vpop.f32.mrb[50].mxu1  ;;  %v5617_v51 = vld [vmem:[%s6735_s24 + $0x68] sm:$0xff]  }
0x159f   : > { %v5351_v53 = vpop.f32.mrb[51].mxu1  ;;  %5361 = vmatpush3.xpose.msk.msra.mxu1 %vm975_vm2, %v2770_v50  ;;  %v4904_v52 = vld [vmem:[%s6684_s10 + $0x14] sm:$0xf] }
0x15a0   : > { %5370 = vmatprep.subr.bf16.mxu1 %v5750_v9  ;;  %v3369_v53 = vsel %vm1509_vm4, %v4904_v52, 0 }
0x15a2   : > { %5363 = vmatmul.mubr.msk.f32.vlgmr.msra.gmra.mrb[38].mxu1 %vm975_vm2, %v2705_v55  ;;  %v5618_v55 = vld [vmem:[%s6733_s29 + $0x60] sm:$0xff]  }
0x15a3   : > { %5371 = vmatpush3.bf16.msra.mxu1 %v5610_v54  ;;  %5374 = vmatprep.mubr.msk.bf16.mxu1 %vm5751_vm1, %v5750_v9 }
0x15a4   : > { %5372 = vmatprep.subr.bf16.mxu1 %v5750_v9 }
0x15a7   : > { %5373 = vmatpush3.bf16.msra.mxu1 %v5611_v56 }
0x15a8   : > { %5386 = vmatprep.subr.bf16.mxu1 %v5750_v9 }
0x15aa   : > { %5375 = vmatmul.mubr.msk.bf16.vlgmr.msra.gmra.mrb[52].mxu1 %vm750_vm0, %v6303_v36 }
0x15ab   : > { %5387 = vmatpush3.bf16.msra.mxu1 %v5612_v57  ;;  %5390 = vmatprep.mubr.msk.bf16.mxu1 %vm5751_vm1, %v5750_v9 }
0x15ac   : > { %5388 = vmatprep.subr.bf16.mxu1 %v5750_v9 }
0x15af   : > { %5389 = vmatpush3.bf16.msra.mxu1 %v5613_v58 }
0x15b0   : > { %5404 = vmatprep.subr.bf16.mxu1 %v5750_v9 }
0x15b2   : > { %5391 = vmatmul.mubr.msk.bf16.vlgmr.msra.gmra.mrb[56].mxu1 %vm750_vm0, %v6303_v36 }
0x15b3   : > { %5406 = vmatprep.mubr.msk.bf16.mxu1 %vm5751_vm1, %v5750_v9  ;;  %5405 = vmatpush3.bf16.msra.mxu1 %v3369_v53 }
0x15b4   : > { %5416 = vmatprep.subr.bf16.mxu1 %v5750_v9 }
0x1675   : > { %v2912_v59 = vpop.f32.mrb[38].mxu1 }
0x1676   : > { %v2916_v22 = vmul.f32 0.35355338, %v2912_v59  ;;  %v5364_v60 = vpop.f32.mrb[39].mxu1  ;;  %v5619_v59 = vld [vmem:[%s6733_s29 + $0x68] sm:$0xff]  }
0x1678   : > { %v2917_v61 = vadd.f32 %v2916_v22, %v6038_v62 }
0x167a   : > { %v2918_v63 = vsel %vm975_vm2, %v2917_v61, -inf }
0x167b   : > { %2919 = vmax.xlane.f32.xlu0 %v2918_v63  ;;  %v5620_v63 = vld [vmem:[%s6739_s30 + $0x60] sm:$0xff]  }
0x167d   : > { %v3064_v0 = vpop.f32.mrb[52].mxu1 }
0x167e   : > { %v5376_v1 = vpop.f32.mrb[53].mxu1  ;;  %v3065_v31 = vadd.f32 %v4879_v25, %v3064_v0  ;;  %v4921_v0 = vld [vmem:[%s6740_s2 + $0x6] ss:$0 sm:$0xff] }
0x167f   : > { %v3067_v2 = vpop.f32.mrb[54].mxu1 }
0x1680   : > { %v5377_v3 = vpop.f32.mrb[55].mxu1  ;;  %v5621_v2 = vld [vmem:[%s6739_s30 + $0x68] sm:$0xff]  }
0x1685   : > { %v3194_v4 = vpop.f32.mrb[56].mxu1 }
0x1686   : > { %v5392_v5 = vpop.f32.mrb[57].mxu1  ;;  %v3195_v32 = vadd.f32 %v4897_v28, %v3194_v4 }
0x1687   : > { %v3197_v6 = vpop.f32.mrb[58].mxu1 }
0x1688   : > { %v5393_v7 = vpop.f32.mrb[59].mxu1 }
0x1708   : > { %v2920_v8 = vpop.xlane.xlu0 %2919 }
0x1709   : > { %v2921_v10 = vsub.f32 %v2917_v61, %v2920_v8 }
0x170b   : > { %v2922_v11 = vmul.f32 1.442695, %v2921_v10 }
0x170d   : > { %5662 = vpow2.f32 %v2922_v11 }
0x1717   : > { %v5663_v12 = vpop.eup %5662 }
0x1718   : > { %v2924_v13 = vsel %vm975_vm2, %v5663_v12, 0.0 }
0x1719   : > { %2925 = vadd.xlane.f32.xlu1 %v2924_v13  ;;  %v4912_v13 = vld [vmem:[%s6741_s4 + $0x6] ss:$0 sm:$0xff] }
0x17a6   : > { %v2926_v14 = vpop.xlane.xlu1 %2925 }
0x17a7   : > { %5664 = vrcp.f32 %v2926_v14 }
0x17b1   : > { %v5665_v15 = vpop.eup %5664 }
0x17b2   : > { %v2928_v17 = vmul.f32 %v5665_v15, %v5663_v12 }
0x17b4   : > { %5368 = vmatmul.mubr.msk.f32.vlgmr.msra.gmra.mrb[30].mxu0 %vm975_vm2, %v2928_v17 }
0x17b5   : > { %5379 = vmatpush3.bf16.msra.mxu0 %v5614_v16  ;;  %5382 = vmatprep.mubr.msk.bf16.mxu0 %vm5751_vm1, %v5750_v9 }
0x17b6   : > { %5380 = vmatprep.subr.bf16.mxu0 %v5750_v9 }
0x17b9   : > { %5381 = vmatpush3.bf16.msra.mxu0 %v5615_v18 }
0x17ba   : > { %5394 = vmatprep.subr.mxu0 %v5750_v9 }
0x17bc   : > { %5383 = vmatmul.mubr.msk.bf16.vlgmr.msra.gmra.mrb[52].mxu0 %vm750_vm0, %v6303_v36 }
0x17bd   : > { %5396 = vmatprep.mubr.msk.f32.mxu0 %vm5751_vm1, %v5750_v9 }
0x1887   : > { %v2998_v19 = vpop.f32.mrb[30].mxu0 }
0x1888   : > { %v5369_v21 = vpop.f32.mrb[31].mxu0  ;;  %v3002_v50 = vpack.c.bf16 %v2998_v19, %v2998_v19  ;;  %v4930_v19 = vld [vmem:[%s6742_s9 + $0x6] ss:$0 sm:$0xff] }
0x188f   : > { %v3129_v24 = vpop.f32.mrb[52].mxu0 }
0x1890   : > { %v3130_v26 = vadd.f32 %v4888_v23, %v3129_v24  ;;  %v5384_v27 = vpop.f32.mrb[53].mxu0 }
0x1891   : > { %v3132_v29 = vpop.f32.mrb[54].mxu0 }
0x1892   : > { %v5385_v30 = vpop.f32.mrb[55].mxu0  ;;  %5395 = vmatpush3.xpose.msk.msra.mxu0 %vm975_vm2, %v3130_v26 }
0x1893   : > { %5399 = vmatprep.subr.mxu0 %v5750_v9 }
0x1895   : > { %5397 = vmatmul.mubr.msk.f32.vlgmr.msra.gmra.mrb[56].mxu0 %vm975_vm2, %v3065_v31 }
0x1896   : > { %5400 = vmatpush3.msra.mxu0 %v3195_v32  ;;  %5401 = vmatprep.mubr.msk.f32.mxu0 %vm5751_vm1, %v5750_v9 }
0x1897   : > { %5410 = vmatprep.subr.bf16.mxu0 %v5750_v9 }
0x1968   : > { %v3272_v33 = vpop.f32.mrb[56].mxu0 }
0x1969   : > { %v3276_v35 = vmul.f32 0.35355338, %v3272_v33  ;;  %v5398_v37 = vpop.f32.mrb[57].mxu0 }
0x196b   : > { %v3277_v38 = vadd.f32 %v3276_v35, %v6038_v62 }
0x196d   : > { %v3278_v39 = vsel %vm975_vm2, %v3277_v38, -inf }
0x196e   : > { %3279 = vmax.xlane.f32.xlu0 %v3278_v39 }
0x19fb   : > { %v3280_v20 = vpop.xlane.xlu0 %3279 }
0x19fc   : > { %v3281_v40 = vsub.f32 %v3277_v38, %v3280_v20 }
0x19fe   : > { %v3282_v41 = vmul.f32 1.442695, %v3281_v40  ;;  %v5622_v40 = vld [vmem:[%s6733_s29 + $0x70] sm:$0xff]  }
0x1a00   : > { %5666 = vpow2.f32 %v3282_v41 }
0x1a0a   : > { %v5667_v42 = vpop.eup %5666 }
0x1a0b   : > { %v3284_v43 = vsel %vm975_vm2, %v5667_v42, 0.0 }
0x1a0c   : > { %3285 = vadd.xlane.f32.xlu1 %v3284_v43  ;;  %v5624_v43 = vld [vmem:[%s6739_s30 + $0x70] sm:$0xff]  }
0x1a99   : > { %v3286_v44 = vpop.xlane.xlu1 %3285 }
0x1a9a   : > { %5668 = vrcp.f32 %v3286_v44  ;;  %v5625_v44 = vld [vmem:[%s6739_s30 + $0x78] sm:$0xff]  }
0x1aa4   : > { %v5669_v46 = vpop.eup %5668 }
0x1aa5   : > { %v3288_v47 = vmul.f32 %v5669_v46, %v5667_v42  ;;  %v5623_v42 = vld [vmem:[%s6733_s29 + $0x78] sm:$0xff]   ;;  %v3821_v46 = vsel %vm1509_vm4, %v4937_v45, 0  ;;  %v5628_v45 = vld [vmem:[%s6688_s14 + $0x10] sm:$0xff]  }
0x1aa7   : > { %5402 = vmatmul.mubr.msk.f32.vlgmr.msra.gmra.mrb[58].mxu0 %vm975_vm2, %v3288_v47 }
0x1aa8   : > { %5411 = vmatpush3.bf16.msra.mxu0 %v3415_v48  ;;  %5412 = vmatprep.mubr.msk.bf16.mxu0 %vm5751_vm1, %v5750_v9  ;;  %v5626_v48 = vld [vmem:[%s6735_s24 + $0x70] sm:$0xff]  }
0x1aa9   : > { %5424 = vmatprep.subr.bf16.mxu0 %v5750_v9 }
0x1aab   : > { %5413 = vmatmul.mubr.msk.bf16.vlgmr.msra.gmra.mrb[60].mxu0 %vm975_vm2, %v3002_v50 }
0x1aac   : > { %5425 = vmatpush3.bf16.msra.mxu0 %v5616_v49  ;;  %5428 = vmatprep.mubr.msk.bf16.mxu0 %vm5751_vm1, %v5750_v9 }
0x1aad   : > { %5426 = vmatprep.subr.bf16.mxu0 %v5750_v9 }
0x1ab0   : > { %5427 = vmatpush3.bf16.msra.mxu0 %v5617_v51  ;;  %v5627_v51 = vld [vmem:[%s6735_s24 + $0x78] sm:$0xff]  }
0x1ab1   : > { %5440 = vmatprep.subr.mxu0 %v5750_v9 }
0x1ab3   : > { %5429 = vmatmul.mubr.msk.bf16.vlgmr.msra.gmra.mrb[64].mxu0 %vm750_vm0, %v6303_v36 }
0x1ab4   : > { %5442 = vmatprep.mubr.msk.f32.mxu0 %vm5751_vm1, %v5750_v9 }
0x1b7a   : > { %v3358_v54 = vpop.f32.mrb[58].mxu0 }
0x1b7b   : > { %v3362_v56 = vpack.c.bf16 %v3358_v54, %v3358_v54  ;;  %v5403_v57 = vpop.f32.mrb[59].mxu0 }
0x1b7d   : > { %5407 = vmatmul.mubr.msk.bf16.vlgmr.msra.gmra.mrb[60].mxu1 %vm975_vm2, %v3362_v56 }
0x1b7e   : > { %v3451_v58 = vpop.f32.mrb[60].mxu0  ;;  %5417 = vmatpush3.bf16.msra.mxu1 %v5618_v55  ;;  %5420 = vmatprep.mubr.msk.bf16.mxu1 %vm5751_vm1, %v5750_v9 }
0x1b7f   : > { %v5414_v22 = vpop.f32.mrb[61].mxu0  ;;  %5418 = vmatprep.subr.bf16.mxu1 %v5750_v9 }
0x1b80   : > { %v3454_v60 = vpop.f32.mrb[62].mxu0 }
0x1b81   : > { %v5415_v61 = vpop.f32.mrb[63].mxu0 }
0x1b82   : > { %5419 = vmatpush3.bf16.msra.mxu1 %v5619_v59 }
0x1b83   : > { %5432 = vmatprep.subr.bf16.mxu1 %v5750_v9 }
0x1b85   : > { %5421 = vmatmul.mubr.msk.bf16.vlgmr.msra.gmra.mrb[64].mxu1 %vm750_vm0, %v6303_v36 }
0x1b86   : > { %v3581_v1 = vpop.f32.mrb[64].mxu0  ;;  %5433 = vmatpush3.bf16.msra.mxu1 %v5620_v63  ;;  %5436 = vmatprep.mubr.msk.bf16.mxu1 %vm5751_vm1, %v5750_v9 }
0x1b87   : > { %v3582_v3 = vadd.f32 %v4921_v0, %v3581_v1  ;;  %v5430_v4 = vpop.f32.mrb[65].mxu0  ;;  %5434 = vmatprep.subr.bf16.mxu1 %v5750_v9  ;;  %v4953_v1 = vld [vmem:[%s6740_s2 + $0x7] ss:$0 sm:$0xff]  ;;  %s6744_s2 = sld [smem:[#allocation21_spill]] }
0x1b88   : > { %v3584_v5 = vpop.f32.mrb[66].mxu0 }
0x1b89   : > { %v5431_v6 = vpop.f32.mrb[67].mxu0  ;;  %5441 = vmatpush3.xpose.msk.msra.mxu0 %vm975_vm2, %v3582_v3  ;;  %v4962_v5 = vld [vmem:[%s6742_s9 + $0x7] ss:$0 sm:$0xff]  ;;  %s5690_s9 = sshll.u32 %s5753_s25, 4  ;;  %s5691_s9 = int_to_ptr.vmem [resolvable:$false] %s5690_s9 }
0x1b8a   : > { %5435 = vmatpush3.bf16.msra.mxu1 %v5621_v2  ;;  %5445 = vmatprep.subr.mxu0 %v5750_v9  ;;  %s5692_s8 = scalar_lea.vmem %s5691_s9, 32  ;;  %p5693_p0 = scmp.lt.s32.totalorder %s6634_s1, %s5691_s9 }
0x1b8b   : > { %5450 = vmatprep.subr.bf16.mxu1 %v5750_v9  ;;  %p5694_p1 = scmp.lt.s32.totalorder %s5692_s8, %s5686_s28 }
0x1b8d   : > { %5437 = vmatmul.mubr.msk.bf16.vlgmr.msra.gmra.mrb[68].mxu1 %vm750_vm0, %v6303_v36  ;;  %p5695_p2 = por %p5694_p1, %p5693_p0 }
0x1b8e   : > { %5452 = vmatprep.mubr.msk.bf16.mxu1 %vm5751_vm1, %v5750_v9  ;;  %5451 = vmatpush3.bf16.msra.mxu1 %v3821_v46 }
0x1b8f   : > { %5464 = vmatprep.subr.bf16.mxu1 %v5750_v9  ;;  %p5696_p3 = pnand %p5695_p2, %p5689_p13 }
0x1c50   : > { %v3405_v7 = vpop.f32.mrb[60].mxu1 }
0x1c51   : > { %v6457_v8 = vadd.f32 %v3451_v58, %v3405_v7  ;;  %v5408_v10 = vpop.f32.mrb[61].mxu1 }
0x1c52   : > { %v3408_v11 = vpop.f32.mrb[62].mxu1 }
0x1c53   : > { %v5409_v12 = vpop.f32.mrb[63].mxu1 }
0x1c58   : > { %v3516_v14 = vpop.f32.mrb[64].mxu1 }
0x1c59   : > { %v3517_v15 = vadd.f32 %v4912_v13, %v3516_v14  ;;  %v5422_v16 = vpop.f32.mrb[65].mxu1 }
0x1c5a   : > { %v3519_v17 = vpop.f32.mrb[66].mxu1 }
0x1c5b   : > { %v5423_v18 = vpop.f32.mrb[67].mxu1  ;;  %5443 = vmatmul.mubr.msk.f32.vlgmr.msra.gmra.mrb[68].mxu0 %vm975_vm2, %v3517_v15 }
0x1c5c   : > { %5447 = vmatprep.mubr.msk.f32.mxu0 %vm5751_vm1, %v5750_v9 }
0x1c60   : > { %v3646_v21 = vpop.f32.mrb[68].mxu1 }
0x1c61   : > { %v3647_v23 = vadd.f32 %v4930_v19, %v3646_v21  ;;  %v5438_v24 = vpop.f32.mrb[69].mxu1 }
0x1c62   : > { %v3649_v25 = vpop.f32.mrb[70].mxu1 }
0x1c63   : > { %v5439_v26 = vpop.f32.mrb[71].mxu1  ;;  %5446 = vmatpush3.msra.mxu0 %v3647_v23 }
0x1c64   : > { %5456 = vmatprep.subr.bf16.mxu0 %v5750_v9 }
0x1d2e   : > { %v3724_v27 = vpop.f32.mrb[68].mxu0 }
0x1d2f   : > { %v3728_v28 = vmul.f32 0.35355338, %v3724_v27  ;;  %v5444_v29 = vpop.f32.mrb[69].mxu0 }
0x1d31   : > { %v3729_v30 = vadd.f32 %v3728_v28, %v6038_v62 }
0x1d33   : > { %v3730_v31 = vsel %vm975_vm2, %v3729_v30, -inf }
0x1d34   : > { %3731 = vmax.xlane.f32.xlu0 %v3730_v31 }
0x1dc1   : > { %v3732_v32 = vpop.xlane.xlu0 %3731 }
0x1dc2   : > { %v3733_v33 = vsub.f32 %v3729_v30, %v3732_v32 }
0x1dc4   : > { %v3734_v35 = vmul.f32 1.442695, %v3733_v33 }
0x1dc6   : > { %5670 = vpow2.f32 %v3734_v35  ;;  %v4972_v35 = vld [vmem:[%s6685_s11 + $0x1] ss:$0 sm:$0xff] }
0x1dd0   : > { %v5671_v37 = vpop.eup %5670 }
0x1dd1   : > { %v3736_v38 = vsel %vm975_vm2, %v5671_v37, 0.0 }
0x1dd2   : > { %3737 = vadd.xlane.f32.xlu1 %v3736_v38 }
0x1e5f   : > { %v3738_v39 = vpop.xlane.xlu1 %3737 }
0x1e60   : > { %5672 = vrcp.f32 %v3738_v39 }
0x1e6a   : > { %v5673_v20 = vpop.eup %5672 }
0x1e6b   : > { %v3740_v41 = vmul.f32 %v5673_v20, %v5671_v37 }
0x1e6d   : > { %5448 = vmatmul.mubr.msk.f32.vlgmr.msra.gmra.mrb[70].mxu0 %vm975_vm2, %v3740_v41 }
0x1e6e   : > { %5457 = vmatpush3.bf16.msra.mxu0 %v5622_v40  ;;  %5460 = vmatprep.mubr.msk.bf16.mxu0 %vm5751_vm1, %v5750_v9 }
0x1e6f   : > { %5458 = vmatprep.subr.bf16.mxu0 %v5750_v9 }
0x1e72   : > { %5459 = vmatpush3.bf16.msra.mxu0 %v5623_v42 }
0x1e73   : > { %5472 = vmatprep.subr.bf16.mxu0 %v5750_v9 }
0x1e75   : > { %5461 = vmatmul.mubr.msk.bf16.vlgmr.msra.gmra.mrb[72].mxu0 %vm750_vm0, %v6303_v36 }
0x1e76   : > { %5473 = vmatpush3.bf16.msra.mxu0 %v5624_v43  ;;  %5476 = vmatprep.mubr.msk.bf16.mxu0 %vm5751_vm1, %v5750_v9 }
0x1e77   : > { %5474 = vmatprep.subr.bf16.mxu0 %v5750_v9 }
0x1e7a   : > { %5475 = vmatpush3.bf16.msra.mxu0 %v5625_v44 }
0x1e7b   : > { %5490 = vmatprep.subr.bf16.mxu0 %v5750_v9 }
0x1e7d   : > { %5477 = vmatmul.mubr.msk.bf16.vlgmr.msra.gmra.mrb[76].mxu0 %vm750_vm0, %v6303_v36 }
0x1e7e   : > { %5492 = vmatprep.mubr.msk.bf16.mxu0 %vm5751_vm1, %v5750_v9 }
0x1f40   : > { %v3810_v47 = vpop.f32.mrb[70].mxu0 }
0x1f41   : > { %v3814_v49 = vpack.c.bf16 %v3810_v47, %v3810_v47  ;;  %v5449_v50 = vpop.f32.mrb[71].mxu0 }
0x1f42   : > { %v4975_v50 = vld [vmem:[%s6686_s12 + $0x1] ss:$0 sm:$0xff] }
0x1f43   : > { %5453 = vmatmul.mubr.msk.bf16.vlgmr.msra.gmra.mrb[72].mxu1 %vm975_vm2, %v3814_v49 }
0x1f44   : > { %5465 = vmatpush3.bf16.msra.mxu1 %v5626_v48  ;;  %5468 = vmatprep.mubr.msk.bf16.mxu1 %vm5751_vm1, %v5750_v9 }
0x1f45   : > { %5466 = vmatprep.subr.bf16.mxu1 %v5750_v9 }
0x1f48   : > { %v3923_v52 = vpop.f32.mrb[72].mxu0  ;;  %5467 = vmatpush3.bf16.msra.mxu1 %v5627_v51 }
0x1f49   : > { %v5462_v53 = vpop.f32.mrb[73].mxu0  ;;  %5480 = vmatprep.subr.mxu1 %v5750_v9 }
0x1f4a   : > { %v3926_v54 = vpop.f32.mrb[74].mxu0 }
0x1f4b   : > { %v5463_v55 = vpop.f32.mrb[75].mxu0  ;;  %5469 = vmatmul.mubr.msk.bf16.vlgmr.msra.gmra.mrb[76].mxu1 %vm750_vm0, %v6303_v36  ;;  %v4944_v36 = vld [vmem:[%s6741_s4 + $0x7] ss:$0 sm:$0xff]  ;;  %s6632_s4 = scalar_lea.hbm %s6744_s2, %s5011_s0 }
0x1f4c   : > { %5482 = vmatprep.mubr.msk.f32.mxu1 %vm5751_vm1, %v5750_v9 }
0x1f50   : > { %v4053_v56 = vpop.f32.mrb[76].mxu0 }
0x1f51   : > { %v5478_v57 = vpop.f32.mrb[77].mxu0  ;;  %v4054_v10 = vadd.f32 %v4962_v5, %v4053_v56  ;;  %v5630_v56 = vld [vmem:[%s6690_s16 + $0x20] sm:$0xff]  }
0x1f52   : > { %v4056_v58 = vpop.f32.mrb[78].mxu0  ;;  %v5631_v57 = vld [vmem:[%s6690_s16 + $0x28] sm:$0xff]  }
0x1f53   : > { %v5479_v59 = vpop.f32.mrb[79].mxu0  ;;  %v5632_v58 = vld [vmem:[%s6690_s16 + $0x30] sm:$0xff]  }
0x1f54   : > { %v5633_v59 = vld [vmem:[%s6690_s16 + $0x38] sm:$0xff]  }
0x2016   : > { %v3857_v22 = vpop.f32.mrb[72].mxu1 }
0x2017   : > { %v3863_v60 = vadd.f32 %v3857_v22, %v6457_v8  ;;  %v5454_v61 = vpop.f32.mrb[73].mxu1  ;;  %v3924_v8 = vadd.f32 %v4944_v36, %v3923_v52  ;;  %v4976_v52 = vld [vmem:[%s6687_s13 + $0x1] ss:$0 sm:$0xff] }
0x2018   : > { %v3860_v63 = vpop.f32.mrb[74].mxu1  ;;  %v4982_v22 = vld [vmem:[%s6689_s15 + $0x1] ss:$0 sm:$0xff] }
0x2019   : > { %v5455_v0 = vpop.f32.mrb[75].mxu1 }
0x201e   : > { %v3988_v2 = vpop.f32.mrb[76].mxu1 }
0x201f   : > { %v3989_v3 = vadd.f32 %v4953_v1, %v3988_v2  ;;  %v5470_v4 = vpop.f32.mrb[77].mxu1 }
0x2020   : > { %v3991_v6 = vpop.f32.mrb[78].mxu1 }
0x2021   : > { %v5471_v7 = vpop.f32.mrb[79].mxu1  ;;  %5481 = vmatpush3.xpose.msk.msra.mxu1 %vm975_vm2, %v3989_v3 }
0x2022   : > { %5485 = vmatprep.subr.mxu1 %v5750_v9 }
0x2024   : > { %5483 = vmatmul.mubr.msk.f32.vlgmr.msra.gmra.mrb[80].mxu1 %vm975_vm2, %v3924_v8 }
0x2025   : > { %5486 = vmatpush3.msra.mxu1 %v4054_v10  ;;  %5487 = vmatprep.mubr.msk.f32.mxu1 %vm5751_vm1, %v5750_v9 }
0x2026   : > { %5496 = vmatprep.subr.bf16.mxu1 %v5750_v9 }
0x20f7   : > { %v4131_v11 = vpop.f32.mrb[80].mxu1 }
0x20f8   : > { %v4135_v12 = vmul.f32 0.35355338, %v4131_v11  ;;  %v5484_v13 = vpop.f32.mrb[81].mxu1 }
0x20fa   : > { %v4136_v14 = vadd.f32 %v4135_v12, %v6038_v62  ;;  %v4969_v62 = vld [vmem:[%s6684_s10 + $0x1c] sm:$0xf]  ;;  %v4995_v12 = vld [vmem:[%s6691_s17 + $0x1] ss:$0 sm:$0xff] }
0x20fb   : > { %v4228_v26 = vsel %vm1509_vm4, %v4969_v62, 0 }
0x20fc   : > { %v4137_v15 = vsel %vm975_vm2, %v4136_v14, -inf  ;;  %5491 = vmatpush3.bf16.msra.mxu0 %v4228_v26  ;;  %v5634_v26 = vld [vmem:[%s6694_s20] sm:$0xff]  }
0x20fd   : > { %4138 = vmax.xlane.f32.xlu0 %v4137_v15  ;;  %5504 = vmatprep.subr.bf16.mxu0 %v5750_v9 }
0x218a   : > { %v4139_v16 = vpop.xlane.xlu0 %4138 }
0x218b   : > { %v4140_v17 = vsub.f32 %v4136_v14, %v4139_v16 }
0x218d   : > { %v4141_v18 = vmul.f32 1.442695, %v4140_v17 }
0x218f   : > { %5674 = vpow2.f32 %v4141_v18 }
0x2199   : > { %v5675_v19 = vpop.eup %5674 }
0x219a   : > { %v4143_v21 = vsel %vm975_vm2, %v5675_v19, 0.0 }
0x219b   : > { %4144 = vadd.xlane.f32.xlu1 %v4143_v21 }
0x2228   : > { %v4145_v23 = vpop.xlane.xlu1 %4144 }
0x2229   : > { %5676 = vrcp.f32 %v4145_v23 }
0x2233   : > { %v5677_v24 = vpop.eup %5676 }
0x2234   : > { %v4147_v25 = vmul.f32 %v5677_v24, %v5675_v19 }
0x2236   : > { %5488 = vmatmul.mubr.msk.f32.vlgmr.msra.gmra.mrb[82].mxu1 %vm975_vm2, %v4147_v25 }
0x2237   : > { %5500 = vmatprep.mubr.msk.bf16.mxu1 %vm5751_vm1, %v5750_v9  ;;  %5497 = vmatpush3.bf16.msra.mxu1 %v5628_v45 }
0x2238   : > { %5498 = vmatprep.subr.bf16.mxu1 %v5750_v9 }
0x2309   : > { %v4217_v27 = vpop.f32.mrb[82].mxu1 }
0x230a   : > { %v4221_v28 = vpack.c.bf16 %v4217_v27, %v4217_v27  ;;  %v5489_v29 = vpop.f32.mrb[83].mxu1  ;;  %v5635_v27 = vld [vmem:[%s6694_s20 + $0x8] sm:$0xff]  }
0x230c   : > { %5493 = vmatmul.mubr.msk.bf16.vlgmr.msra.gmra.mrb[80].mxu0 %vm975_vm2, %v4221_v28 }
0x230d   : > { %5512 = vmatprep.mubr.msk.bf16.mxu0 %vm5751_vm1, %v5750_v9  ;;  %5505 = vmatpush3.bf16.msra.mxu0 %v5630_v56 }
0x230e   : > { %5506 = vmatprep.subr.bf16.mxu0 %v5750_v9 }
0x2311   : > { %5507 = vmatpush3.bf16.msra.mxu0 %v5631_v57 }
0x2312   : > { %5508 = vmatprep.subr.bf16.mxu0 %v5750_v9 }
0x2315   : > { %5509 = vmatpush3.bf16.msra.mxu0 %v5632_v58 }
0x2316   : > { %5510 = vmatprep.subr.bf16.mxu0 %v5750_v9 }
0x2319   : > { %5511 = vmatpush3.bf16.msra.mxu0 %v5633_v59 }
0x23df   : > { %v4264_v30 = vpop.f32.mrb[80].mxu0 }
0x23e0   : > { %v4270_v31 = vadd.f32 %v4264_v30, %v3863_v60  ;;  %v5494_v32 = vpop.f32.mrb[81].mxu0 }
0x23e1   : > { %v4267_v33 = vpop.f32.mrb[82].mxu0  ;;  %v5003_v32 = vld [vmem:[%s6692_s18 + $0x1] ss:$0 sm:$0xff] }
0x23e2   : > { %v4271_v37 = vadd.f32 %v4270_v31, %v6296_v34  ;;  %v5495_v38 = vpop.f32.mrb[83].mxu0  ;;  %v5629_v34 = vld [vmem:[%s6688_s14 + $0x18] sm:$0xff]  }
0x23e3   : > { %5499 = vmatpush3.bf16.msra.mxu1 %v5629_v34 }
0x23e4   : > { %v4280_v39 = vadd.f32 %v4972_v35, %v4271_v37  ;;  %5516 = vmatprep.subr.bf16.mxu1 %v5750_v9  ;;  %v5004_v35 = vld [vmem:[%s6693_s19 + $0x1] ss:$0 sm:$0xff] }
0x23e6   : > { %v4285_v20 = vsel %vm750_vm0, %v4280_v39, 0.0 }
0x23e7   : > { %4286 = vadd.xlane.f32.xlu0 %v4285_v20  ;;  %v5636_v20 = vld [vmem:[%s6696_s22] sm:$0xff]  }
0x2474   : > { %v4287_v40 = vpop.xlane.xlu0 %4286 }
0x2475   : > { %v4288_v41 = vmul.f32 0.03125, %v4287_v40  ;;  %v5637_v40 = vld [vmem:[%s6696_s22 + $0x8] sm:$0xff]  }
0x2477   : > { %v4289_v42 = vsub.f32 %v4280_v39, %v4288_v41  ;;  %v4511_v41 = vld [vmem:[%s6695_s21] sm:$0x1] }
0x2479   : > { %v4290_v43 = vmul.f32 %v4289_v42, %v4289_v42 }
0x247b   : > { %v4291_v44 = vsel %vm750_vm0, %v4290_v43, 0.0 }
0x247c   : > { %4292 = vadd.xlane.f32.xlu1 %v4291_v44 }
0x2509   : > { %v4293_v46 = vpop.xlane.xlu1 %4292 }
0x250a   : > { %v4294_v47 = vmul.f32 0.03125, %v4293_v46 }
0x250c   : > { %v4295_v48 = vadd.f32 1e-12, %v4294_v47 }
0x250e   : > { %5678 = vrsqrt.f32 %v4295_v48 }
0x2518   : > { %v5679_v49 = vpop.eup %5678 }
0x2519   : > { %v4297_v51 = vmul.f32 %v5679_v49, %v4289_v42 }
0x251b   : > { %v4304_v53 = vmul.f32 %v4975_v50, %v4297_v51 }
0x251d   : > { %v4311_v54 = vadd.f32 %v4976_v52, %v4304_v53 }
0x251f   : > { %v4319_v55 = vpack.c.bf16 %v4311_v54, %v4311_v54 }
0x2521   : > { %5501 = vmatmul.mubr.msk.bf16.vlgmr.msra.gmra.mrb[84].mxu1 %vm750_vm0, %v4319_v55 }
0x2522   : > { %5520 = vmatprep.mubr.msk.bf16.mxu1 %vm5751_vm1, %v5750_v9  ;;  %5517 = vmatpush3.bf16.msra.mxu1 %v5634_v26 }
0x2523   : > { %5518 = vmatprep.subr.bf16.mxu1 %v5750_v9 }
0x2526   : > { %5519 = vmatpush3.bf16.msra.mxu1 %v5635_v27 }
0x2527   : > { %5524 = vmatprep.subr.bf16.mxu1 %v5750_v9 }
0x25f4   : > { %v4375_v60 = vpop.f32.mrb[84].mxu1 }
0x25f5   : > { %v4376_v61 = vadd.f32 %v4982_v22, %v4375_v60  ;;  %v5502_v63 = vpop.f32.mrb[85].mxu1 }
0x25f6   : > { %v4378_v0 = vpop.f32.mrb[86].mxu1 }
0x25f7   : > { %v4382_v1 = vmul.f32 0.044715, %v4376_v61  ;;  %v5503_v2 = vpop.f32.mrb[87].mxu1  ;;  %v4381_v7 = vmul.f32 0.5, %v4376_v61 }
0x25f9   : > { %v4383_v36 = vmul.f32 %v4382_v1, %v4376_v61 }
0x25fb   : > { %v4384_v3 = vmul.f32 %v4383_v36, %v4376_v61 }
0x25fd   : > { %v4385_v4 = vadd.f32 %v4384_v3, %v4376_v61 }
0x25ff   : > { %v4386_v5 = vmul.f32 0.7978846, %v4385_v4 }
0x2601   : > { %5680 = vtanh.f32 %v4386_v5 }
0x260b   : > { %v5681_v6 = vpop.eup %5680 }
0x260c   : > { %v4388_v8 = vadd.f32 1.0, %v5681_v6 }
0x260e   : > { %v4389_v10 = vmul.f32 %v4388_v8, %v4381_v7 }
0x2610   : > { %v4401_v11 = vpack.c.bf16 %v4389_v10, %v4389_v10 }
0x2612   : > { %5513 = vmatmul.mubr.msk.bf16.vlgmr.msra.gmra.mrb[84].mxu0 %vm2567_vm5, %v4401_v11 }
0x26e5   : > { %v4469_v13 = vpop.f32.mrb[84].mxu0 }
0x26e6   : > { %v4470_v14 = vadd.f32 %v4995_v12, %v4469_v13  ;;  %v5514_v15 = vpop.f32.mrb[85].mxu0 }
0x26e7   : > { %v4472_v16 = vpop.f32.mrb[86].mxu0 }
0x26e8   : > { %v5515_v17 = vpop.f32.mrb[87].mxu0  ;;  %v4475_v18 = vadd.f32 %v4470_v14, %v4311_v54 }
0x26ea   : > { %v4480_v19 = vsel %vm750_vm0, %v4475_v18, 0.0 }
0x26eb   : > { %4481 = vadd.xlane.f32.xlu0 %v4480_v19 }
0x2778   : > { %v4482_v21 = vpop.xlane.xlu0 %4481 }
0x2779   : > { %v4483_v23 = vmul.f32 0.03125, %v4482_v21 }
0x277b   : > { %v4484_v24 = vsub.f32 %v4475_v18, %v4483_v23 }
0x277d   : > { %v4485_v25 = vmul.f32 %v4484_v24, %v4484_v24 }
0x277f   : > { %v4486_v62 = vsel %vm750_vm0, %v4485_v25, 0.0 }
0x2780   : > { %4487 = vadd.xlane.f32.xlu1 %v4486_v62 }
0x280d   : > { %v4488_v28 = vpop.xlane.xlu1 %4487 }
0x280e   : > { %v4489_v29 = vmul.f32 0.03125, %v4488_v28 }
0x2810   : > { %v4490_v30 = vadd.f32 1e-12, %v4489_v29 }
0x2812   : > { %5682 = vrsqrt.f32 %v4490_v30 }
0x281c   : > { %v5683_v31 = vpop.eup %5682 }
0x281d   : > { %v4492_v33 = vmul.f32 %v5683_v31, %v4484_v24 }
0x281f   : > { %v4499_v37 = vmul.f32 %v5003_v32, %v4492_v33 }
0x2821   : > { %v4506_v38 = vadd.f32 %v5004_v35, %v4499_v37 }
0x2823   : > { %v4512_v39 = vpack.c.bf16 %v4506_v38, %v4506_v38 }
0x2825   : > { %5521 = vmatmul.mubr.msk.bf16.vlgmr.msra.gmra.mrb[88].mxu1 %vm750_vm0, %v4512_v39 }
0x2826   : > { %5528 = vmatprep.mubr.msk.bf16.mxu1 %vm5751_vm1, %v5750_v9  ;;  %5525 = vmatpush3.bf16.msra.mxu1 %v5636_v20 }
0x2827   : > { %5526 = vmatprep.subr.bf16.mxu1 %v5750_v9  ;;  %v4573_v9 = vld [vmem:[%s6697_s23] sm:$0x1] }
0x282a   : > { %5527 = vmatpush3.bf16.msra.mxu1 %v5637_v40 }
0x28f8   : > { %v4562_v42 = vpop.f32.mrb[88].mxu1 }
0x28f9   : > { %v4563_v43 = vadd.f32 %v4562_v42, %v4511_v41  ;;  %v5522_v44 = vpop.f32.mrb[89].mxu1 }
0x28fa   : > { %v4565_v45 = vpop.f32.mrb[90].mxu1 }
0x28fb   : > { %5684 = vtanh.f32 %v4563_v43  ;;  %v5523_v34 = vpop.f32.mrb[91].mxu1 }
0x2905   : > { %v5685_v46 = vpop.eup %5684 }
0x2906   : > { %v4574_v47 = vpack.c.bf16 %v5685_v46, %v5685_v46 }
0x2908   : > { %5529 = vmatmul.mubr.msk.bf16.vlgmr.msra.gmra.mrb[92].mxu1 %vm750_vm0, %v4574_v47 }
0x29db   : > { %v4624_v48 = vpop.f32.mrb[92].mxu1 }
0x29dc   : > { %v4625_v49 = vadd.f32 %v4624_v48, %v4573_v9  ;;  %v5530_v50 = vpop.f32.mrb[93].mxu1 }
0x29dd   : > { %v4627_v51 = vpop.f32.mrb[94].mxu1 }
0x29de   : > { %v5531_v52 = vpop.f32.mrb[95].mxu1  ;;  %4631 = vst.msk [vmem:[%s738_s7] sm:$0x1] %vm4630_vm6, %v4625_v49 }
0x29df   : > { %5699 = shalt.err (!%p5696_p3)
}
0x29e0   : > { %s5700_s5 = scalar_lea.hbm %s6632_s4, 16  ;;  %s5704_s27 = scalar_lea.hbm %s6744_s2, 32 }
0x29e1   : > { %p5701_p4 = scmp.ne.s32.totalorder %s6632_s4, %s5700_s5  ;;  %p5705_p9 = scmp.lt.u32.totalorder %s6632_s4, %s6744_s2 }
0x29e2   : > { %p5706_p10 = scmp.lt.u32.totalorder %s5704_s27, %s5700_s5  ;;  %p5708_p12 = scmp.lt.u32.totalorder %s5700_s5, %s6632_s4 }
0x29e3   : > { %p5702_p7 = pnand %p5701_p4, %p5917_p5 }
0x29e4   : > { %p5707_p11 = por %p5706_p10, %p5705_p9 }
0x29e5   : > { %p5703_p8 = pneg %p5702_p7 }
0x29e6   : > { %p5709_p13 = por %p5708_p12, %p5707_p11 }
0x29e8   : > { %p5710_p0 = pnand %p5709_p13, %p5703_p8 }
0x29ea   : > { %5713 = shalt.err (!%p5710_p0)
}
0x29eb   : > { %5532 = dma.vmem_to_hbm [thread:$0]  (%p5917_p5), %s6634_s1, 16, %s6632_s4, %s4633_s6  }
0x29ec PF: > { %s6745_s28 = sld [smem:[#allocation7_spill]]  ;;  %s6746_s8 = sld [smem:[#allocation5_spill]] }
0x29f2   : > { %p5538_p1 = scmp.ge.s32.totalorder %s6745_s28, 2  ;;  %s4657_s7 = sand.u32 1, %s6746_s8  }
0x29f3   : > { %s4658_s25 = scalar_lea.sflag [#allocation3], %s4657_s7 }
0x29f4   : > { %p5535_p2 = pnand %p5538_p1, %p5921_p6 }
0x29f6   : > { %5731 = dma.done.wait (!%p5535_p2), %s4658_s25, 16  }
0x29f7   : > { %5733 = vsyncadd (!%p5535_p2), %s4658_s25, 4294967280  ;;  %s6748_s28 = sld [smem:[#allocation8_spill]]  ;;  %s6749_s27 = sld [smem:[#allocation6_spill]] }
0x29f8   : > { %s6750_s9 = sld [smem:[#allocation9_spill]]  ;;  %s6751_s5 = smov %s5740_s26 }
0x29fd   : > { %p34_p3 = scmp.ge.s32.totalorder %s6748_s28, 4   ;;  %s6752_s26 = smov %s6749_s27 }
0x29fe   : > { %s6753_s27 = smov %s6750_s9 }
0x29ff   :  { %36 = sbr.rel (!%p34_p3) target bundleno = 15 (0xf), region = 212 }
0x2a06   :  { %4662 = vsyncpa [#allocation3], 1 }
0x2a07   :  { %4664 = vsyncpa [#allocation3 + $0x1], 1 }

</bundles_post_ra>
